<compile_context>
chip_gen: v7x
topology: tpu7x:2x2x1
jax: 0.10.0
libtpu: 0.0.40
codegen_flags: <defaults>
</compile_context>

<pallas_src>
import math

import jax
import jax.numpy as jnp
from jax.experimental import pallas as pl

# ---------------- small, consistent shapes ----------------
B = 2            # batch
N = 16           # n_genes (sequence length)
N_HEADS = 4
D_MODEL = 32
D_K = D_MODEL // N_HEADS
D_EMBED = 32     # residual-stream width (Embedder embedding_dim)
D_FF = 64
N_LAYERS = 2
EPS = 1e-5       # torch.nn.LayerNorm default eps
BN = B * N
BH = B * N_HEADS

# ---------------- vector-slab row layout (one padded 128-lane row per vector) ----------------
VEC_LANES = 128
ROWS_PER_LAYER = 8
R_BQKV, R_BO, R_B1, R_B2, R_LN1G, R_LN1B, R_LN2G, R_LN2B = range(ROWS_PER_LAYER)
R_FINAL_G = N_LAYERS * ROWS_PER_LAYER
R_FINAL_B = R_FINAL_G + 1
VEC_ROWS = R_FINAL_B + 1


# ---------------- in-kernel helpers ----------------
def _layer_norm(z, g, b):
    mu = jnp.mean(z, axis=-1, keepdims=True)
    var = jnp.mean((z - mu) ** 2, axis=-1, keepdims=True)
    return (z - mu) * jax.lax.rsqrt(var + EPS) * g + b


def _split_heads(x2d):
    # (BN, D_MODEL) -> (B*H, N, D_K); lane dim (D_K) preserved, sublane shuffle only.
    return (x2d.reshape(B, N, N_HEADS, D_K)
            .transpose(0, 2, 1, 3)
            .reshape(BH, N, D_K))


def _merge_heads(ctx):
    # (B*H, N, D_K) -> (BN, D_MODEL); inverse of _split_heads.
    return (ctx.reshape(B, N_HEADS, N, D_K)
            .transpose(0, 2, 1, 3)
            .reshape(BN, D_MODEL))


# ---------------- single fused kernel ----------------
def transformer_kernel(e0_ref, qt_ref, kt_ref, wqkv_ref, wo_ref, w1_ref, w2_ref,
                       vec_ref, out_ref):
    f32 = jnp.float32

    def vec(row, width):                 # static slice of the packed vector slab
        return vec_ref[row:row + 1, 0:width]          # (1, width)

    # ---- TUPE-A bias, batched over (B*H); scale already folded into qt ----
    tupe = jnp.einsum("bxd,byd->bxy", qt_ref[...], kt_ref[...],
                      preferred_element_type=f32)      # (BH, N, N)

    e = e0_ref[...]                                    # (BN, D_EMBED), pre-tiled

    for l in range(N_LAYERS):                          # static unroll (N_LAYERS=2)
        r = l * ROWS_PER_LAYER

        # fused QKV projection: single MXU matmul, 96-lane-wide output
        qkv = jnp.dot(e, wqkv_ref[l], preferred_element_type=f32) \
            + vec(r + R_BQKV, 3 * D_MODEL)             # (BN, 96)
        q = _split_heads(qkv[:, 0:D_MODEL])            # (BH, N, D_K), 1/sqrt(2dk) folded
        k = _split_heads(qkv[:, D_MODEL:2 * D_MODEL])
        v = _split_heads(qkv[:, 2 * D_MODEL:3 * D_MODEL])

        # per-(batch, head) 16x16 attention -- no block-diagonal mask, no wasted exp
        s = jnp.einsum("bxd,byd->bxy", q, k, preferred_element_type=f32) + tupe
        m = jnp.max(s, axis=-1, keepdims=True)
        p = jnp.exp(s - m)
        denom = jnp.sum(p, axis=-1, keepdims=True)
        inv = pl.reciprocal(denom, approx=True)        # EUP reciprocal
        inv = inv * (2.0 - denom * inv)                # one Newton step -> f32-accurate
        p = p * inv

        ctx = jnp.einsum("bxy,byd->bxd", p, v, preferred_element_type=f32)  # (BH,N,D_K)

        # head-sum fused into the output projection: one (BN,32)@(32,32) matmul
        attn = jnp.dot(_merge_heads(ctx), wo_ref[l],
                       preferred_element_type=f32) + vec(r + R_BO, D_EMBED)

        # post-norm encoder layer
        x1 = _layer_norm(e + attn, vec(r + R_LN1G, D_EMBED), vec(r + R_LN1B, D_EMBED))
        hid = jnp.maximum(
            jnp.dot(x1, w1_ref[l], preferred_element_type=f32) + vec(r + R_B1, D_FF),
            0.0)
        ff = jnp.dot(hid, w2_ref[l], preferred_element_type=f32) + vec(r + R_B2, D_EMBED)
        e = _layer_norm(x1 + ff, vec(r + R_LN2G, D_EMBED), vec(r + R_LN2B, D_EMBED))

    out_ref[...] = _layer_norm(e, vec(R_FINAL_G, D_EMBED), vec(R_FINAL_B, D_EMBED))


def transformer_forward(x, kp):
    """x: (B, N) float32 gene expression; kp: packed kernel params."""
    # TUPE q/k linears are elementwise-only and tiny -> done once here
    # (1/sqrt(2*d_k) already folded into twq/tbq at prepare time).
    xe = x.reshape(B, N, 1)

    def heads(z):   # (B, N, D_MODEL) -> (B*H, N, D_K)
        return z.reshape(B, N, N_HEADS, D_K).transpose(0, 2, 1, 3).reshape(BH, N, D_K)

    q_t = heads(xe * kp["twq"] + kp["tbq"])
    k_t = heads(xe * kp["twk"] + kp["tbk"])

    out = pl.pallas_call(
        transformer_kernel,
        out_shape=jax.ShapeDtypeStruct((BN, D_EMBED), jnp.float32),
        # no grid / no BlockSpecs: whole problem (<100 KiB) lives in VMEM for one
        # invocation; only 8 input DMAs total.
    )(kp["e0"], q_t, k_t, kp["wqkv"], kp["wo"], kp["w1"], kp["w2"], kp["vec"])
    return out.reshape(B, N, D_EMBED)


# ---------------- deterministic parameter init (PyTorch-style layout) ----------------
def init_params(key):
    ks = iter(jax.random.split(key, 5 + 6 * N_LAYERS))

    def nrm(shape, scale):
        return jax.random.normal(next(ks), shape, jnp.float32) * scale

    p = {
        "embed": nrm((N, D_EMBED), 0.1),          # synthetic gene-embedding table
        "tupe_wq": nrm((1, D_MODEL), 1.0),
        "tupe_bq": nrm((1, D_MODEL), 0.02),
        "tupe_wk": nrm((1, D_MODEL), 1.0),
        "tupe_bk": nrm((1, D_MODEL), 0.02),
        "ln_g": jnp.ones((1, D_EMBED), jnp.float32),
        "ln_b": jnp.zeros((1, D_EMBED), jnp.float32),
        "layers": [],
    }
    for _ in range(N_LAYERS):
        lp = {
            "wq": nrm((D_EMBED, D_MODEL), 1.0 / math.sqrt(D_EMBED)),
            "bq": jnp.zeros((1, D_MODEL), jnp.float32),
            "wk": nrm((D_EMBED, D_MODEL), 1.0 / math.sqrt(D_EMBED)),
            "bk": jnp.zeros((1, D_MODEL), jnp.float32),
            "wv": nrm((D_EMBED, D_MODEL), 1.0 / math.sqrt(D_EMBED)),
            "bv": jnp.zeros((1, D_MODEL), jnp.float32),
            "wo": nrm((D_MODEL, D_EMBED), 1.0 / math.sqrt(D_MODEL)),
            "bo": jnp.zeros((1, D_EMBED), jnp.float32),
            "ln1g": jnp.ones((1, D_EMBED), jnp.float32),
            "ln1b": jnp.zeros((1, D_EMBED), jnp.float32),
            "w1": nrm((D_EMBED, D_FF), 1.0 / math.sqrt(D_EMBED)),
            "b1": jnp.zeros((1, D_FF), jnp.float32),
            "w2": nrm((D_FF, D_EMBED), 1.0 / math.sqrt(D_FF)),
            "b2": jnp.zeros((1, D_EMBED), jnp.float32),
            "ln2g": jnp.ones((1, D_EMBED), jnp.float32),
            "ln2b": jnp.zeros((1, D_EMBED), jnp.float32),
        }
        p["layers"].append(lp)
    return p


# ---------------- one-time repack into the kernel's lane-dense slab layout ----------------
def prepare_kernel_params(p):
    scale = 1.0 / math.sqrt(2.0 * D_K)
    layers = p["layers"]

    # fused QKV weights, 1/sqrt(2*d_k) folded into the q-side columns
    wqkv = jnp.stack(
        [jnp.concatenate([lp["wq"] * scale, lp["wk"], lp["wv"]], axis=1) for lp in layers],
        axis=0)                                            # (L, D_EMBED, 3*D_MODEL)
    wo = jnp.stack([lp["wo"] for lp in layers], axis=0)    # (L, D_MODEL, D_EMBED)
    w1 = jnp.stack([lp["w1"] for lp in layers], axis=0)    # (L, D_EMBED, D_FF)
    w2 = jnp.stack([lp["w2"] for lp in layers], axis=0)    # (L, D_FF, D_EMBED)

    def row(v):   # (1, K) -> (1, VEC_LANES), zero-padded lanes
        v = jnp.asarray(v, jnp.float32).reshape(1, -1)
        return jnp.pad(v, ((0, 0), (0, VEC_LANES - v.shape[1])))

    rows = []
    for lp in layers:
        rows += [
            row(jnp.concatenate([lp["bq"] * scale, lp["bk"], lp["bv"]], axis=1)),  # R_BQKV
            row(lp["bo"]),                                                         # R_BO
            row(lp["b1"]),                                                         # R_B1
            row(lp["b2"]),                                                         # R_B2
            row(lp["ln1g"]), row(lp["ln1b"]),                                      # R_LN1*
            row(lp["ln2g"]), row(lp["ln2b"]),                                      # R_LN2*
        ]
    rows += [row(p["ln_g"]), row(p["ln_b"])]               # R_FINAL_G / R_FINAL_B
    vec = jnp.concatenate(rows, axis=0)                    # (VEC_ROWS, 128)

    return {
        "e0": jnp.concatenate([p["embed"]] * B, axis=0),   # (BN, D_EMBED), pre-tiled
        "wqkv": wqkv, "wo": wo, "w1": w1, "w2": w2, "vec": vec,
        # TUPE params with the q-side scale folded (used only in the thin wrapper)
        "twq": p["tupe_wq"] * scale, "tbq": p["tupe_bq"] * scale,
        "twk": p["tupe_wk"], "tbk": p["tupe_bk"],
    }


# ---------------- pure-JAX reference (original, un-repacked params) ----------------
def reference_forward(x, params):
    e = jnp.tile(params["embed"][None], (B, 1, 1))
    xc = x[..., None]
    q = xc * params["tupe_wq"] + params["tupe_bq"]
    k = xc * params["tupe_wk"] + params["tupe_bk"]
    qh = q.reshape(B, N, N_HEADS, D_K)
    kh = k.reshape(B, N, N_HEADS, D_K)
    tupe = jnp.einsum("bnhd,bmhd->bhnm", qh, kh) / math.sqrt(2.0 * D_K)

    def ln(z, g, b):
        mu = z.mean(-1, keepdims=True)
        var = ((z - mu) ** 2).mean(-1, keepdims=True)
        return (z - mu) / jnp.sqrt(var + EPS) * g + b

    for lp in params["layers"]:
        q = e @ lp["wq"] + lp["bq"]
        kk = e @ lp["wk"] + lp["bk"]
        v = e @ lp["wv"] + lp["bv"]
        qh = q.reshape(B, N, N_HEADS, D_K)
        kh = kk.reshape(B, N, N_HEADS, D_K)
        vh = v.reshape(B, N, N_HEADS, D_K)
        s = jnp.einsum("bnhd,bmhd->bhnm", qh, kh) / math.sqrt(2.0 * D_K) + tupe
        p = jax.nn.softmax(s, axis=-1)
        ctx = jnp.einsum("bhnm,bmhd->bnhd", p, vh).reshape(B, N, D_MODEL)
        attn_out = ctx @ lp["wo"] + lp["bo"]
        x1 = ln(e + attn_out, lp["ln1g"], lp["ln1b"])
        ff = jnp.maximum(x1 @ lp["w1"] + lp["b1"], 0.0) @ lp["w2"] + lp["b2"]
        e = ln(x1 + ff, lp["ln2g"], lp["ln2b"])
    return ln(e, params["ln_g"], params["ln_b"])


if __name__ == "__main__":
    key = jax.random.PRNGKey(0)
    pkey, xkey = jax.random.split(key)
    params = init_params(pkey)
    x = jax.random.normal(xkey, (B, N), jnp.float32)   # gene-expression input

    kparams = prepare_kernel_params(params)
    out = transformer_forward(x, kparams)
    out = jax.block_until_ready(out)

    ref = reference_forward(x, params)
    assert out.shape == (B, N, D_EMBED)
    # tolerance leaves margin for the EUP approx-reciprocal softmax + reassociated matmuls
    assert bool(jnp.allclose(out, ref, atol=3e-3, rtol=3e-3))
    print("KERNEL_OK")
</pallas_src>

<mosaic_0001>
module attributes {stable_mosaic.version = 11 : i64} {
  func.func @transformer_kernel(%arg0: memref<32x32xf32, #tpu.memory_space<vmem>>, %arg1: memref<8x16x8xf32, #tpu.memory_space<vmem>>, %arg2: memref<8x16x8xf32, #tpu.memory_space<vmem>>, %arg3: memref<2x32x96xf32, #tpu.memory_space<vmem>>, %arg4: memref<2x32x32xf32, #tpu.memory_space<vmem>>, %arg5: memref<2x32x64xf32, #tpu.memory_space<vmem>>, %arg6: memref<2x64x32xf32, #tpu.memory_space<vmem>>, %arg7: memref<18x128xf32, #tpu.memory_space<vmem>>, %arg8: memref<32x32xf32, #tpu.memory_space<vmem>>) attributes {dimension_semantics = [], scalar_prefetch = 0 : i64, scratch_operands = 0 : i64, tpu.core_type = #tpu.core_type<tc>} {
    %c0 = arith.constant 0 : index
    %c0_0 = arith.constant 0 : index
    %c0_1 = arith.constant 0 : index
    %0 = vector.load %arg1[%c0, %c0_0, %c0_1] : memref<8x16x8xf32, #tpu.memory_space<vmem>>, vector<8x16x8xf32>
    %c0_2 = arith.constant 0 : index
    %c0_3 = arith.constant 0 : index
    %c0_4 = arith.constant 0 : index
    %1 = vector.load %arg2[%c0_2, %c0_3, %c0_4] : memref<8x16x8xf32, #tpu.memory_space<vmem>>, vector<8x16x8xf32>
    "tpu.trace_start"() <{level = 10 : i32, message = "bxd,byd->bxy"}> : () -> ()
    %cst = arith.constant dense<0.000000e+00> : vector<8x16x16xf32>
    %2 = tpu.matmul %0, %1, %cst {dimension_numbers = #tpu.dot_dimension_numbers<[2], [2], [1], [1], [0, 0, 0, 1, 1, 1], [0], [0]>} : vector<8x16x8xf32>, vector<8x16x8xf32>, vector<8x16x16xf32> -> vector<8x16x16xf32>
    "tpu.trace_stop"() : () -> ()
    %c0_5 = arith.constant 0 : index
    %c0_6 = arith.constant 0 : index
    %3 = vector.load %arg0[%c0_5, %c0_6] : memref<32x32xf32, #tpu.memory_space<vmem>>, vector<32x32xf32>
    %c0_7 = arith.constant 0 : index
    %c0_8 = arith.constant 0 : index
    %c0_9 = arith.constant 0 : index
    %4 = vector.load %arg3[%c0_7, %c0_8, %c0_9] : memref<2x32x96xf32, #tpu.memory_space<vmem>>, vector<1x32x96xf32>
    %5 = vector.shape_cast %4 : vector<1x32x96xf32> to vector<32x96xf32>
    %cst_10 = arith.constant dense<0.000000e+00> : vector<32x96xf32>
    %6 = tpu.matmul %3, %5, %cst_10 {dimension_numbers = #tpu.dot_dimension_numbers<[1], [0], [0], [1], [0, 0, 1, 1], [], []>} : vector<32x32xf32>, vector<32x96xf32>, vector<32x96xf32> -> vector<32x96xf32>
    %c0_11 = arith.constant 0 : index
    %c0_12 = arith.constant 0 : index
    %7 = vector.load %arg7[%c0_11, %c0_12] : memref<18x128xf32, #tpu.memory_space<vmem>>, vector<1x96xf32>
    %8 = vector.broadcast %7 : vector<1x96xf32> to vector<32x96xf32>
    %9 = arith.addf %6, %8 : vector<32x96xf32>
    %10 = vector.extract_strided_slice %9 {offsets = [0, 0], sizes = [32, 32], strides = [1, 1]} : vector<32x96xf32> to vector<32x32xf32>
    %11 = vector.shape_cast %10 : vector<32x32xf32> to vector<2x16x4x8xf32>
    %12 = tpu.transpose %11, [0, 2, 1, 3] : vector<2x16x4x8xf32> -> vector<2x4x16x8xf32>
    %13 = vector.shape_cast %12 : vector<2x4x16x8xf32> to vector<8x16x8xf32>
    %14 = vector.extract_strided_slice %9 {offsets = [0, 32], sizes = [32, 32], strides = [1, 1]} : vector<32x96xf32> to vector<32x32xf32>
    %15 = vector.shape_cast %14 : vector<32x32xf32> to vector<2x16x4x8xf32>
    %16 = tpu.transpose %15, [0, 2, 1, 3] : vector<2x16x4x8xf32> -> vector<2x4x16x8xf32>
    %17 = vector.shape_cast %16 : vector<2x4x16x8xf32> to vector<8x16x8xf32>
    %18 = vector.extract_strided_slice %9 {offsets = [0, 64], sizes = [32, 32], strides = [1, 1]} : vector<32x96xf32> to vector<32x32xf32>
    %19 = vector.shape_cast %18 : vector<32x32xf32> to vector<2x16x4x8xf32>
    %20 = tpu.transpose %19, [0, 2, 1, 3] : vector<2x16x4x8xf32> -> vector<2x4x16x8xf32>
    %21 = vector.shape_cast %20 : vector<2x4x16x8xf32> to vector<8x16x8xf32>
    "tpu.trace_start"() <{level = 10 : i32, message = "bxd,byd->bxy"}> : () -> ()
    %cst_13 = arith.constant dense<0.000000e+00> : vector<8x16x16xf32>
    %22 = tpu.matmul %13, %17, %cst_13 {dimension_numbers = #tpu.dot_dimension_numbers<[2], [2], [1], [1], [0, 0, 0, 1, 1, 1], [0], [0]>} : vector<8x16x8xf32>, vector<8x16x8xf32>, vector<8x16x16xf32> -> vector<8x16x16xf32>
    "tpu.trace_stop"() : () -> ()
    %23 = arith.addf %22, %2 : vector<8x16x16xf32>
    %cst_14 = arith.constant dense<0xFF800000> : vector<8x16xf32>
    %24 = vector.multi_reduction <maximumf>, %23, %cst_14 [2] : vector<8x16x16xf32> to vector<8x16xf32>
    %25 = vector.shape_cast %24 : vector<8x16xf32> to vector<8x16x1xf32>
    %26 = vector.broadcast %25 : vector<8x16x1xf32> to vector<8x16x16xf32>
    %27 = arith.subf %23, %26 : vector<8x16x16xf32>
    %28 = math.exp %27 : vector<8x16x16xf32>
    %cst_15 = arith.constant dense<0.000000e+00> : vector<8x16xf32>
    %29 = vector.multi_reduction <add>, %28, %cst_15 [2] : vector<8x16x16xf32> to vector<8x16xf32>
    %30 = vector.shape_cast %29 : vector<8x16xf32> to vector<8x16x1xf32>
    %31 = tpu.reciprocal %30 {approx = true} : vector<8x16x1xf32> -> vector<8x16x1xf32>
    %32 = arith.mulf %30, %31 : vector<8x16x1xf32>
    %cst_16 = arith.constant 2.000000e+00 : f32
    %33 = vector.broadcast %cst_16 : f32 to vector<8x16x1xf32>
    %34 = arith.subf %33, %32 : vector<8x16x1xf32>
    %35 = arith.mulf %31, %34 : vector<8x16x1xf32>
    %36 = vector.broadcast %35 : vector<8x16x1xf32> to vector<8x16x16xf32>
    %37 = arith.mulf %28, %36 : vector<8x16x16xf32>
    "tpu.trace_start"() <{level = 10 : i32, message = "bxy,byd->bxd"}> : () -> ()
    %cst_17 = arith.constant dense<0.000000e+00> : vector<8x16x8xf32>
    %38 = tpu.matmul %37, %21, %cst_17 {dimension_numbers = #tpu.dot_dimension_numbers<[2], [1], [1], [2], [0, 0, 0, 1, 1, 2], [0], [0]>} : vector<8x16x16xf32>, vector<8x16x8xf32>, vector<8x16x8xf32> -> vector<8x16x8xf32>
    "tpu.trace_stop"() : () -> ()
    %39 = vector.shape_cast %38 : vector<8x16x8xf32> to vector<2x4x16x8xf32>
    %40 = tpu.transpose %39, [0, 2, 1, 3] : vector<2x4x16x8xf32> -> vector<2x16x4x8xf32>
    %41 = vector.shape_cast %40 : vector<2x16x4x8xf32> to vector<32x32xf32>
    %c0_18 = arith.constant 0 : index
    %c0_19 = arith.constant 0 : index
    %c0_20 = arith.constant 0 : index
    %42 = vector.load %arg4[%c0_18, %c0_19, %c0_20] : memref<2x32x32xf32, #tpu.memory_space<vmem>>, vector<1x32x32xf32>
    %43 = vector.shape_cast %42 : vector<1x32x32xf32> to vector<32x32xf32>
    %cst_21 = arith.constant dense<0.000000e+00> : vector<32x32xf32>
    %44 = tpu.matmul %41, %43, %cst_21 {dimension_numbers = #tpu.dot_dimension_numbers<[1], [0], [0], [1], [0, 0, 1, 1], [], []>} : vector<32x32xf32>, vector<32x32xf32>, vector<32x32xf32> -> vector<32x32xf32>
    %c1 = arith.constant 1 : index
    %c0_22 = arith.constant 0 : index
    %45 = vector.load %arg7[%c1, %c0_22] : memref<18x128xf32, #tpu.memory_space<vmem>>, vector<1x32xf32>
    %46 = vector.broadcast %45 : vector<1x32xf32> to vector<32x32xf32>
    %47 = arith.addf %44, %46 : vector<32x32xf32>
    %48 = arith.addf %3, %47 : vector<32x32xf32>
    %c4 = arith.constant 4 : index
    %c0_23 = arith.constant 0 : index
    %49 = vector.load %arg7[%c4, %c0_23] : memref<18x128xf32, #tpu.memory_space<vmem>>, vector<1x32xf32>
    %c5 = arith.constant 5 : index
    %c0_24 = arith.constant 0 : index
    %50 = vector.load %arg7[%c5, %c0_24] : memref<18x128xf32, #tpu.memory_space<vmem>>, vector<1x32xf32>
    %cst_25 = arith.constant dense<0.000000e+00> : vector<32xf32>
    %51 = vector.multi_reduction <add>, %48, %cst_25 [1] : vector<32x32xf32> to vector<32xf32>
    %52 = vector.shape_cast %51 : vector<32xf32> to vector<32x1xf32>
    %cst_26 = arith.constant 3.200000e+01 : f32
    %53 = vector.broadcast %cst_26 : f32 to vector<32x1xf32>
    %54 = arith.divf %52, %53 : vector<32x1xf32>
    %55 = vector.broadcast %54 : vector<32x1xf32> to vector<32x32xf32>
    %56 = arith.subf %48, %55 : vector<32x32xf32>
    %57 = arith.mulf %56, %56 : vector<32x32xf32>
    %cst_27 = arith.constant dense<0.000000e+00> : vector<32xf32>
    %58 = vector.multi_reduction <add>, %57, %cst_27 [1] : vector<32x32xf32> to vector<32xf32>
    %59 = vector.shape_cast %58 : vector<32xf32> to vector<32x1xf32>
    %cst_28 = arith.constant 3.200000e+01 : f32
    %60 = vector.broadcast %cst_28 : f32 to vector<32x1xf32>
    %61 = arith.divf %59, %60 : vector<32x1xf32>
    %62 = vector.broadcast %54 : vector<32x1xf32> to vector<32x32xf32>
    %63 = arith.subf %48, %62 : vector<32x32xf32>
    %cst_29 = arith.constant 9.99999974E-6 : f32
    %64 = vector.broadcast %cst_29 : f32 to vector<32x1xf32>
    %65 = arith.addf %61, %64 : vector<32x1xf32>
    %66 = math.rsqrt %65 : vector<32x1xf32>
    %67 = vector.broadcast %66 : vector<32x1xf32> to vector<32x32xf32>
    %68 = arith.mulf %63, %67 : vector<32x32xf32>
    %69 = vector.broadcast %49 : vector<1x32xf32> to vector<32x32xf32>
    %70 = arith.mulf %68, %69 : vector<32x32xf32>
    %71 = vector.broadcast %50 : vector<1x32xf32> to vector<32x32xf32>
    %72 = arith.addf %70, %71 : vector<32x32xf32>
    %c0_30 = arith.constant 0 : index
    %c0_31 = arith.constant 0 : index
    %c0_32 = arith.constant 0 : index
    %73 = vector.load %arg5[%c0_30, %c0_31, %c0_32] : memref<2x32x64xf32, #tpu.memory_space<vmem>>, vector<1x32x64xf32>
    %74 = vector.shape_cast %73 : vector<1x32x64xf32> to vector<32x64xf32>
    %cst_33 = arith.constant dense<0.000000e+00> : vector<32x64xf32>
    %75 = tpu.matmul %72, %74, %cst_33 {dimension_numbers = #tpu.dot_dimension_numbers<[1], [0], [0], [1], [0, 0, 1, 1], [], []>} : vector<32x32xf32>, vector<32x64xf32>, vector<32x64xf32> -> vector<32x64xf32>
    %c2 = arith.constant 2 : index
    %c0_34 = arith.constant 0 : index
    %76 = vector.load %arg7[%c2, %c0_34] : memref<18x128xf32, #tpu.memory_space<vmem>>, vector<1x64xf32>
    %77 = vector.broadcast %76 : vector<1x64xf32> to vector<32x64xf32>
    %78 = arith.addf %75, %77 : vector<32x64xf32>
    %cst_35 = arith.constant 0.000000e+00 : f32
    %79 = vector.broadcast %cst_35 : f32 to vector<32x64xf32>
    %80 = arith.maximumf %78, %79 : vector<32x64xf32>
    %c0_36 = arith.constant 0 : index
    %c0_37 = arith.constant 0 : index
    %c0_38 = arith.constant 0 : index
    %81 = vector.load %arg6[%c0_36, %c0_37, %c0_38] : memref<2x64x32xf32, #tpu.memory_space<vmem>>, vector<1x64x32xf32>
    %82 = vector.shape_cast %81 : vector<1x64x32xf32> to vector<64x32xf32>
    %cst_39 = arith.constant dense<0.000000e+00> : vector<32x32xf32>
    %83 = tpu.matmul %80, %82, %cst_39 {dimension_numbers = #tpu.dot_dimension_numbers<[1], [0], [0], [1], [0, 0, 1, 1], [], []>} : vector<32x64xf32>, vector<64x32xf32>, vector<32x32xf32> -> vector<32x32xf32>
    %c3 = arith.constant 3 : index
    %c0_40 = arith.constant 0 : index
    %84 = vector.load %arg7[%c3, %c0_40] : memref<18x128xf32, #tpu.memory_space<vmem>>, vector<1x32xf32>
    %85 = vector.broadcast %84 : vector<1x32xf32> to vector<32x32xf32>
    %86 = arith.addf %83, %85 : vector<32x32xf32>
    %87 = arith.addf %72, %86 : vector<32x32xf32>
    %c6 = arith.constant 6 : index
    %c0_41 = arith.constant 0 : index
    %88 = vector.load %arg7[%c6, %c0_41] : memref<18x128xf32, #tpu.memory_space<vmem>>, vector<1x32xf32>
    %c7 = arith.constant 7 : index
    %c0_42 = arith.constant 0 : index
    %89 = vector.load %arg7[%c7, %c0_42] : memref<18x128xf32, #tpu.memory_space<vmem>>, vector<1x32xf32>
    %cst_43 = arith.constant dense<0.000000e+00> : vector<32xf32>
    %90 = vector.multi_reduction <add>, %87, %cst_43 [1] : vector<32x32xf32> to vector<32xf32>
    %91 = vector.shape_cast %90 : vector<32xf32> to vector<32x1xf32>
    %cst_44 = arith.constant 3.200000e+01 : f32
    %92 = vector.broadcast %cst_44 : f32 to vector<32x1xf32>
    %93 = arith.divf %91, %92 : vector<32x1xf32>
    %94 = vector.broadcast %93 : vector<32x1xf32> to vector<32x32xf32>
    %95 = arith.subf %87, %94 : vector<32x32xf32>
    %96 = arith.mulf %95, %95 : vector<32x32xf32>
    %cst_45 = arith.constant dense<0.000000e+00> : vector<32xf32>
    %97 = vector.multi_reduction <add>, %96, %cst_45 [1] : vector<32x32xf32> to vector<32xf32>
    %98 = vector.shape_cast %97 : vector<32xf32> to vector<32x1xf32>
    %cst_46 = arith.constant 3.200000e+01 : f32
    %99 = vector.broadcast %cst_46 : f32 to vector<32x1xf32>
    %100 = arith.divf %98, %99 : vector<32x1xf32>
    %101 = vector.broadcast %93 : vector<32x1xf32> to vector<32x32xf32>
    %102 = arith.subf %87, %101 : vector<32x32xf32>
    %cst_47 = arith.constant 9.99999974E-6 : f32
    %103 = vector.broadcast %cst_47 : f32 to vector<32x1xf32>
    %104 = arith.addf %100, %103 : vector<32x1xf32>
    %105 = math.rsqrt %104 : vector<32x1xf32>
    %106 = vector.broadcast %105 : vector<32x1xf32> to vector<32x32xf32>
    %107 = arith.mulf %102, %106 : vector<32x32xf32>
    %108 = vector.broadcast %88 : vector<1x32xf32> to vector<32x32xf32>
    %109 = arith.mulf %107, %108 : vector<32x32xf32>
    %110 = vector.broadcast %89 : vector<1x32xf32> to vector<32x32xf32>
    %111 = arith.addf %109, %110 : vector<32x32xf32>
    %c1_48 = arith.constant 1 : index
    %c0_49 = arith.constant 0 : index
    %c0_50 = arith.constant 0 : index
    %112 = vector.load %arg3[%c1_48, %c0_49, %c0_50] : memref<2x32x96xf32, #tpu.memory_space<vmem>>, vector<1x32x96xf32>
    %113 = vector.shape_cast %112 : vector<1x32x96xf32> to vector<32x96xf32>
    %cst_51 = arith.constant dense<0.000000e+00> : vector<32x96xf32>
    %114 = tpu.matmul %111, %113, %cst_51 {dimension_numbers = #tpu.dot_dimension_numbers<[1], [0], [0], [1], [0, 0, 1, 1], [], []>} : vector<32x32xf32>, vector<32x96xf32>, vector<32x96xf32> -> vector<32x96xf32>
    %c8 = arith.constant 8 : index
    %c0_52 = arith.constant 0 : index
    %115 = vector.load %arg7[%c8, %c0_52] : memref<18x128xf32, #tpu.memory_space<vmem>>, vector<1x96xf32>
    %116 = vector.broadcast %115 : vector<1x96xf32> to vector<32x96xf32>
    %117 = arith.addf %114, %116 : vector<32x96xf32>
    %118 = vector.extract_strided_slice %117 {offsets = [0, 0], sizes = [32, 32], strides = [1, 1]} : vector<32x96xf32> to vector<32x32xf32>
    %119 = vector.shape_cast %118 : vector<32x32xf32> to vector<2x16x4x8xf32>
    %120 = tpu.transpose %119, [0, 2, 1, 3] : vector<2x16x4x8xf32> -> vector<2x4x16x8xf32>
    %121 = vector.shape_cast %120 : vector<2x4x16x8xf32> to vector<8x16x8xf32>
    %122 = vector.extract_strided_slice %117 {offsets = [0, 32], sizes = [32, 32], strides = [1, 1]} : vector<32x96xf32> to vector<32x32xf32>
    %123 = vector.shape_cast %122 : vector<32x32xf32> to vector<2x16x4x8xf32>
    %124 = tpu.transpose %123, [0, 2, 1, 3] : vector<2x16x4x8xf32> -> vector<2x4x16x8xf32>
    %125 = vector.shape_cast %124 : vector<2x4x16x8xf32> to vector<8x16x8xf32>
    %126 = vector.extract_strided_slice %117 {offsets = [0, 64], sizes = [32, 32], strides = [1, 1]} : vector<32x96xf32> to vector<32x32xf32>
    %127 = vector.shape_cast %126 : vector<32x32xf32> to vector<2x16x4x8xf32>
    %128 = tpu.transpose %127, [0, 2, 1, 3] : vector<2x16x4x8xf32> -> vector<2x4x16x8xf32>
    %129 = vector.shape_cast %128 : vector<2x4x16x8xf32> to vector<8x16x8xf32>
    "tpu.trace_start"() <{level = 10 : i32, message = "bxd,byd->bxy"}> : () -> ()
    %cst_53 = arith.constant dense<0.000000e+00> : vector<8x16x16xf32>
    %130 = tpu.matmul %121, %125, %cst_53 {dimension_numbers = #tpu.dot_dimension_numbers<[2], [2], [1], [1], [0, 0, 0, 1, 1, 1], [0], [0]>} : vector<8x16x8xf32>, vector<8x16x8xf32>, vector<8x16x16xf32> -> vector<8x16x16xf32>
    "tpu.trace_stop"() : () -> ()
    %131 = arith.addf %130, %2 : vector<8x16x16xf32>
    %cst_54 = arith.constant dense<0xFF800000> : vector<8x16xf32>
    %132 = vector.multi_reduction <maximumf>, %131, %cst_54 [2] : vector<8x16x16xf32> to vector<8x16xf32>
    %133 = vector.shape_cast %132 : vector<8x16xf32> to vector<8x16x1xf32>
    %134 = vector.broadcast %133 : vector<8x16x1xf32> to vector<8x16x16xf32>
    %135 = arith.subf %131, %134 : vector<8x16x16xf32>
    %136 = math.exp %135 : vector<8x16x16xf32>
    %cst_55 = arith.constant dense<0.000000e+00> : vector<8x16xf32>
    %137 = vector.multi_reduction <add>, %136, %cst_55 [2] : vector<8x16x16xf32> to vector<8x16xf32>
    %138 = vector.shape_cast %137 : vector<8x16xf32> to vector<8x16x1xf32>
    %139 = tpu.reciprocal %138 {approx = true} : vector<8x16x1xf32> -> vector<8x16x1xf32>
    %140 = arith.mulf %138, %139 : vector<8x16x1xf32>
    %cst_56 = arith.constant 2.000000e+00 : f32
    %141 = vector.broadcast %cst_56 : f32 to vector<8x16x1xf32>
    %142 = arith.subf %141, %140 : vector<8x16x1xf32>
    %143 = arith.mulf %139, %142 : vector<8x16x1xf32>
    %144 = vector.broadcast %143 : vector<8x16x1xf32> to vector<8x16x16xf32>
    %145 = arith.mulf %136, %144 : vector<8x16x16xf32>
    "tpu.trace_start"() <{level = 10 : i32, message = "bxy,byd->bxd"}> : () -> ()
    %cst_57 = arith.constant dense<0.000000e+00> : vector<8x16x8xf32>
    %146 = tpu.matmul %145, %129, %cst_57 {dimension_numbers = #tpu.dot_dimension_numbers<[2], [1], [1], [2], [0, 0, 0, 1, 1, 2], [0], [0]>} : vector<8x16x16xf32>, vector<8x16x8xf32>, vector<8x16x8xf32> -> vector<8x16x8xf32>
    "tpu.trace_stop"() : () -> ()
    %147 = vector.shape_cast %146 : vector<8x16x8xf32> to vector<2x4x16x8xf32>
    %148 = tpu.transpose %147, [0, 2, 1, 3] : vector<2x4x16x8xf32> -> vector<2x16x4x8xf32>
    %149 = vector.shape_cast %148 : vector<2x16x4x8xf32> to vector<32x32xf32>
    %c1_58 = arith.constant 1 : index
    %c0_59 = arith.constant 0 : index
    %c0_60 = arith.constant 0 : index
    %150 = vector.load %arg4[%c1_58, %c0_59, %c0_60] : memref<2x32x32xf32, #tpu.memory_space<vmem>>, vector<1x32x32xf32>
    %151 = vector.shape_cast %150 : vector<1x32x32xf32> to vector<32x32xf32>
    %cst_61 = arith.constant dense<0.000000e+00> : vector<32x32xf32>
    %152 = tpu.matmul %149, %151, %cst_61 {dimension_numbers = #tpu.dot_dimension_numbers<[1], [0], [0], [1], [0, 0, 1, 1], [], []>} : vector<32x32xf32>, vector<32x32xf32>, vector<32x32xf32> -> vector<32x32xf32>
    %c9 = arith.constant 9 : index
    %c0_62 = arith.constant 0 : index
    %153 = vector.load %arg7[%c9, %c0_62] : memref<18x128xf32, #tpu.memory_space<vmem>>, vector<1x32xf32>
    %154 = vector.broadcast %153 : vector<1x32xf32> to vector<32x32xf32>
    %155 = arith.addf %152, %154 : vector<32x32xf32>
    %156 = arith.addf %111, %155 : vector<32x32xf32>
    %c12 = arith.constant 12 : index
    %c0_63 = arith.constant 0 : index
    %157 = vector.load %arg7[%c12, %c0_63] : memref<18x128xf32, #tpu.memory_space<vmem>>, vector<1x32xf32>
    %c13 = arith.constant 13 : index
    %c0_64 = arith.constant 0 : index
    %158 = vector.load %arg7[%c13, %c0_64] : memref<18x128xf32, #tpu.memory_space<vmem>>, vector<1x32xf32>
    %cst_65 = arith.constant dense<0.000000e+00> : vector<32xf32>
    %159 = vector.multi_reduction <add>, %156, %cst_65 [1] : vector<32x32xf32> to vector<32xf32>
    %160 = vector.shape_cast %159 : vector<32xf32> to vector<32x1xf32>
    %cst_66 = arith.constant 3.200000e+01 : f32
    %161 = vector.broadcast %cst_66 : f32 to vector<32x1xf32>
    %162 = arith.divf %160, %161 : vector<32x1xf32>
    %163 = vector.broadcast %162 : vector<32x1xf32> to vector<32x32xf32>
    %164 = arith.subf %156, %163 : vector<32x32xf32>
    %165 = arith.mulf %164, %164 : vector<32x32xf32>
    %cst_67 = arith.constant dense<0.000000e+00> : vector<32xf32>
    %166 = vector.multi_reduction <add>, %165, %cst_67 [1] : vector<32x32xf32> to vector<32xf32>
    %167 = vector.shape_cast %166 : vector<32xf32> to vector<32x1xf32>
    %cst_68 = arith.constant 3.200000e+01 : f32
    %168 = vector.broadcast %cst_68 : f32 to vector<32x1xf32>
    %169 = arith.divf %167, %168 : vector<32x1xf32>
    %170 = vector.broadcast %162 : vector<32x1xf32> to vector<32x32xf32>
    %171 = arith.subf %156, %170 : vector<32x32xf32>
    %cst_69 = arith.constant 9.99999974E-6 : f32
    %172 = vector.broadcast %cst_69 : f32 to vector<32x1xf32>
    %173 = arith.addf %169, %172 : vector<32x1xf32>
    %174 = math.rsqrt %173 : vector<32x1xf32>
    %175 = vector.broadcast %174 : vector<32x1xf32> to vector<32x32xf32>
    %176 = arith.mulf %171, %175 : vector<32x32xf32>
    %177 = vector.broadcast %157 : vector<1x32xf32> to vector<32x32xf32>
    %178 = arith.mulf %176, %177 : vector<32x32xf32>
    %179 = vector.broadcast %158 : vector<1x32xf32> to vector<32x32xf32>
    %180 = arith.addf %178, %179 : vector<32x32xf32>
    %c1_70 = arith.constant 1 : index
    %c0_71 = arith.constant 0 : index
    %c0_72 = arith.constant 0 : index
    %181 = vector.load %arg5[%c1_70, %c0_71, %c0_72] : memref<2x32x64xf32, #tpu.memory_space<vmem>>, vector<1x32x64xf32>
    %182 = vector.shape_cast %181 : vector<1x32x64xf32> to vector<32x64xf32>
    %cst_73 = arith.constant dense<0.000000e+00> : vector<32x64xf32>
    %183 = tpu.matmul %180, %182, %cst_73 {dimension_numbers = #tpu.dot_dimension_numbers<[1], [0], [0], [1], [0, 0, 1, 1], [], []>} : vector<32x32xf32>, vector<32x64xf32>, vector<32x64xf32> -> vector<32x64xf32>
    %c10 = arith.constant 10 : index
    %c0_74 = arith.constant 0 : index
    %184 = vector.load %arg7[%c10, %c0_74] : memref<18x128xf32, #tpu.memory_space<vmem>>, vector<1x64xf32>
    %185 = vector.broadcast %184 : vector<1x64xf32> to vector<32x64xf32>
    %186 = arith.addf %183, %185 : vector<32x64xf32>
    %cst_75 = arith.constant 0.000000e+00 : f32
    %187 = vector.broadcast %cst_75 : f32 to vector<32x64xf32>
    %188 = arith.maximumf %186, %187 : vector<32x64xf32>
    %c1_76 = arith.constant 1 : index
    %c0_77 = arith.constant 0 : index
    %c0_78 = arith.constant 0 : index
    %189 = vector.load %arg6[%c1_76, %c0_77, %c0_78] : memref<2x64x32xf32, #tpu.memory_space<vmem>>, vector<1x64x32xf32>
    %190 = vector.shape_cast %189 : vector<1x64x32xf32> to vector<64x32xf32>
    %cst_79 = arith.constant dense<0.000000e+00> : vector<32x32xf32>
    %191 = tpu.matmul %188, %190, %cst_79 {dimension_numbers = #tpu.dot_dimension_numbers<[1], [0], [0], [1], [0, 0, 1, 1], [], []>} : vector<32x64xf32>, vector<64x32xf32>, vector<32x32xf32> -> vector<32x32xf32>
    %c11 = arith.constant 11 : index
    %c0_80 = arith.constant 0 : index
    %192 = vector.load %arg7[%c11, %c0_80] : memref<18x128xf32, #tpu.memory_space<vmem>>, vector<1x32xf32>
    %193 = vector.broadcast %192 : vector<1x32xf32> to vector<32x32xf32>
    %194 = arith.addf %191, %193 : vector<32x32xf32>
    %195 = arith.addf %180, %194 : vector<32x32xf32>
    %c14 = arith.constant 14 : index
    %c0_81 = arith.constant 0 : index
    %196 = vector.load %arg7[%c14, %c0_81] : memref<18x128xf32, #tpu.memory_space<vmem>>, vector<1x32xf32>
    %c15 = arith.constant 15 : index
    %c0_82 = arith.constant 0 : index
    %197 = vector.load %arg7[%c15, %c0_82] : memref<18x128xf32, #tpu.memory_space<vmem>>, vector<1x32xf32>
    %cst_83 = arith.constant dense<0.000000e+00> : vector<32xf32>
    %198 = vector.multi_reduction <add>, %195, %cst_83 [1] : vector<32x32xf32> to vector<32xf32>
    %199 = vector.shape_cast %198 : vector<32xf32> to vector<32x1xf32>
    %cst_84 = arith.constant 3.200000e+01 : f32
    %200 = vector.broadcast %cst_84 : f32 to vector<32x1xf32>
    %201 = arith.divf %199, %200 : vector<32x1xf32>
    %202 = vector.broadcast %201 : vector<32x1xf32> to vector<32x32xf32>
    %203 = arith.subf %195, %202 : vector<32x32xf32>
    %204 = arith.mulf %203, %203 : vector<32x32xf32>
    %cst_85 = arith.constant dense<0.000000e+00> : vector<32xf32>
    %205 = vector.multi_reduction <add>, %204, %cst_85 [1] : vector<32x32xf32> to vector<32xf32>
    %206 = vector.shape_cast %205 : vector<32xf32> to vector<32x1xf32>
    %cst_86 = arith.constant 3.200000e+01 : f32
    %207 = vector.broadcast %cst_86 : f32 to vector<32x1xf32>
    %208 = arith.divf %206, %207 : vector<32x1xf32>
    %209 = vector.broadcast %201 : vector<32x1xf32> to vector<32x32xf32>
    %210 = arith.subf %195, %209 : vector<32x32xf32>
    %cst_87 = arith.constant 9.99999974E-6 : f32
    %211 = vector.broadcast %cst_87 : f32 to vector<32x1xf32>
    %212 = arith.addf %208, %211 : vector<32x1xf32>
    %213 = math.rsqrt %212 : vector<32x1xf32>
    %214 = vector.broadcast %213 : vector<32x1xf32> to vector<32x32xf32>
    %215 = arith.mulf %210, %214 : vector<32x32xf32>
    %216 = vector.broadcast %196 : vector<1x32xf32> to vector<32x32xf32>
    %217 = arith.mulf %215, %216 : vector<32x32xf32>
    %218 = vector.broadcast %197 : vector<1x32xf32> to vector<32x32xf32>
    %219 = arith.addf %217, %218 : vector<32x32xf32>
    %c16 = arith.constant 16 : index
    %c0_88 = arith.constant 0 : index
    %220 = vector.load %arg7[%c16, %c0_88] : memref<18x128xf32, #tpu.memory_space<vmem>>, vector<1x32xf32>
    %c17 = arith.constant 17 : index
    %c0_89 = arith.constant 0 : index
    %221 = vector.load %arg7[%c17, %c0_89] : memref<18x128xf32, #tpu.memory_space<vmem>>, vector<1x32xf32>
    %cst_90 = arith.constant dense<0.000000e+00> : vector<32xf32>
    %222 = vector.multi_reduction <add>, %219, %cst_90 [1] : vector<32x32xf32> to vector<32xf32>
    %223 = vector.shape_cast %222 : vector<32xf32> to vector<32x1xf32>
    %cst_91 = arith.constant 3.200000e+01 : f32
    %224 = vector.broadcast %cst_91 : f32 to vector<32x1xf32>
    %225 = arith.divf %223, %224 : vector<32x1xf32>
    %226 = vector.broadcast %225 : vector<32x1xf32> to vector<32x32xf32>
    %227 = arith.subf %219, %226 : vector<32x32xf32>
    %228 = arith.mulf %227, %227 : vector<32x32xf32>
    %cst_92 = arith.constant dense<0.000000e+00> : vector<32xf32>
    %229 = vector.multi_reduction <add>, %228, %cst_92 [1] : vector<32x32xf32> to vector<32xf32>
    %230 = vector.shape_cast %229 : vector<32xf32> to vector<32x1xf32>
    %cst_93 = arith.constant 3.200000e+01 : f32
    %231 = vector.broadcast %cst_93 : f32 to vector<32x1xf32>
    %232 = arith.divf %230, %231 : vector<32x1xf32>
    %233 = vector.broadcast %225 : vector<32x1xf32> to vector<32x32xf32>
    %234 = arith.subf %219, %233 : vector<32x32xf32>
    %cst_94 = arith.constant 9.99999974E-6 : f32
    %235 = vector.broadcast %cst_94 : f32 to vector<32x1xf32>
    %236 = arith.addf %232, %235 : vector<32x1xf32>
    %237 = math.rsqrt %236 : vector<32x1xf32>
    %238 = vector.broadcast %237 : vector<32x1xf32> to vector<32x32xf32>
    %239 = arith.mulf %234, %238 : vector<32x32xf32>
    %240 = vector.broadcast %220 : vector<1x32xf32> to vector<32x32xf32>
    %241 = arith.mulf %239, %240 : vector<32x32xf32>
    %242 = vector.broadcast %221 : vector<1x32xf32> to vector<32x32xf32>
    %243 = arith.addf %241, %242 : vector<32x32xf32>
    %c0_95 = arith.constant 0 : index
    %c0_96 = arith.constant 0 : index
    %244 = vector.load %arg8[%c0_95, %c0_96] : memref<32x32xf32, #tpu.memory_space<vmem>>, vector<32x32xf32>
    tpu.vector_store %arg8[%c0_95, %c0_96], %243 {strides = array<i32>} : memref<32x32xf32, #tpu.memory_space<vmem>>, vector<32x32xf32>,
    return
  }
}

</mosaic_0001>

<bundles_post_ra>
// kernel: tpu_custom_call.1
= control target key start
LH: loop header
LB: loop body
LE: loop exit
PB: predicated region body
PF: predicated region fallthrough
CT: control target
= control target key end

     0   :  { %vm62_vm0 = vcmask 64512   ;;  %s13646_s0 = inlined_call_operand.vmem [shape: f32[32,32], index: 0, kind: input, shape index: {}]   ;;  %s13647_s1 = inlined_call_operand.vmem [shape: f32[8,16,8], index: 1, kind: input, shape index: {}]   ;;  %s13648_s2 = inlined_call_operand.vmem [shape: f32[8,16,8], index: 2, kind: input, shape index: {}]   ;;  %s13649_s3 = inlined_call_operand.vmem [shape: f32[2,32,96], index: 3, kind: input, shape index: {}]   ;;  %s13650_s4 = inlined_call_operand.vmem [shape: f32[2,32,32], index: 4, kind: input, shape index: {}]   ;;  %s13651_s5 = inlined_call_operand.vmem [shape: f32[2,32,64], index: 5, kind: input, shape index: {}]   ;;  %s13652_s6 = inlined_call_operand.vmem [shape: f32[2,64,32], index: 6, kind: input, shape index: {}]   ;;  %s13653_s7 = inlined_call_operand.vmem [shape: f32[18,128], index: 7, kind: input, shape index: {}]   ;;  %s13654_s8 = inlined_call_operand.hbm [shape: f32[32,32], index: 8, kind: output, shape index: {}]  }
   0x1   :  { %v50_v0 = vld [vmem:[%s13648_s2 + $0x20] sm:$0xff]  ;;  %v51_v1 = vld [vmem:[%s13648_s2 + $0x28] sm:$0xff]  ;;  %vm11368_vm1 = vmpackc.low %vm62_vm0, %vm62_vm0 }
   0x2   :  { %v34_v2 = vld [vmem:[%s13647_s1 + $0x20] sm:$0xff]  ;;  %v10816_v4 = vpack.c.bf16 %v51_v1, %v50_v0  ;;  %v55_v6 = vld [vmem:[%s13648_s2 + $0x48] sm:$0xff] }
   0x3   :  { %10414 = vmatprep.mubr.msk.f32.mxu0 %vm62_vm0, %v34_v2  ;;  %v54_v5 = vld [vmem:[%s13648_s2 + $0x40] sm:$0xff]  ;;  %v59_v9 = vld [vmem:[%s13648_s2 + $0x68] sm:$0xff] }
   0x4   :  { %10818 = vmatprep.subr.msk.bf16.mxu0 %vm11368_vm1, %v10816_v4  ;;  %v10828_v7 = vpack.c.bf16 %v55_v6, %v54_v5  ;;  %v58_v8 = vld [vmem:[%s13648_s2 + $0x60] sm:$0xff] }
   0x5   :  { %10821 = vmatpush3.bf16.xpose.msk.msra.mxu0 %vm11368_vm1, %v10816_v4 }
   0x6   :  { %10830 = vmatprep.subr.msk.bf16.mxu0 %vm11368_vm1, %v10828_v7 }
   0x7   :  { %13 = vsyncpa [#allocation3], 0  ;;  %v35_v10 = vld [vmem:[%s13647_s1 + $0x28] sm:$0xff]  ;;  %v38_v11 = vld [vmem:[%s13647_s1 + $0x40] sm:$0xff]  ;;  %v10840_v12 = vpack.c.bf16 %v59_v9, %v58_v8  ;;  %vm772_vm2 = vcmask 261120   ;;  %s11300_s9 = smov 112  }
   0x8   :  { %v763_v13 = vld [vmem:[%s13649_s3] sm:$0xff]  ;;  %v764_v14 = vld [vmem:[%s13649_s3 + $0x8] sm:$0xff]  ;;  %v765_v18 = vld [vmem:[%s13649_s3 + $0x10] sm:$0xff]  ;;  %s11301_s10 = smov 120   ;;  %s11303_s23 = smov 96   ;;  %vm3334_vm3 = vcmask 130048  }
   0x9   :  { %v39_v15 = vld [vmem:[%s13647_s1 + $0x48] sm:$0xff]  ;;  %v42_v16 = vld [vmem:[%s13647_s1 + $0x60] sm:$0xff]  ;;  %v10852_v17 = vpack.c.bf16 %v764_v14, %v763_v13  ;;  %v766_v19 = vld [vmem:[%s13649_s3 + $0x18] sm:$0xff]  ;;  %v11304_v5 = vmov 1983009808   ;;  %s11307_s12 = smov 8  }
   0xa   :  { %v43_v20 = vld [vmem:[%s13647_s1 + $0x68] sm:$0xff]  ;;  %v10856_v21 = vpack.c.bf16 %v766_v19, %v765_v18  ;;  %v759_v22 = vld [vmem:[%s13646_s0] sm:$0xff]  ;;  %v761_v24 = vld [vmem:[%s13646_s0 + $0x10] sm:$0xff]  ;;  %v913_v6 = vunpack.c.l.s4 %v11304_v5  ;;  %s11308_s13 = smov 16   ;;  %s11309_s14 = smov 24   ;;  %vm4807_vm4 = vcmask 195584  }
   0xb   :  { %v760_v23 = vld [vmem:[%s13646_s0 + $0x8] sm:$0xff]  ;;  %v762_v25 = vld [vmem:[%s13646_s0 + $0x18] sm:$0xff]  ;;  %v46_v26 = vld [vmem:[%s13648_s2] sm:$0xff]  ;;  %vm5116_vm5 = vcmask 523264  }
   0xc   :  { %10415 = vmatmul.mubr.msk.f32.vlgmr.msra.gmra.mrb[0].mxu0 %vm62_vm0, %v35_v10  ;;  %v47_v27 = vld [vmem:[%s13648_s2 + $0x8] sm:$0xff]  ;;  %v30_v28 = vld [vmem:[%s13647_s1] sm:$0xff]  ;;  %v48_v30 = vld [vmem:[%s13648_s2 + $0x10] sm:$0xff]  ;;  %v11305_v10 = vmov 1934713408  }
   0xd   :  { %10833 = vmatpush3.bf16.xpose.msk.msra.mxu0 %vm11368_vm1, %v10828_v7  ;;  %10428 = vmatprep.mubr.msk.f32.mxu0 %vm62_vm0, %v38_v11  ;;  %v10804_v29 = vpack.c.bf16 %v47_v27, %v46_v26  ;;  %v49_v31 = vld [vmem:[%s13648_s2 + $0x18] sm:$0xff]  ;;  %v31_v33 = vld [vmem:[%s13647_s1 + $0x8] sm:$0xff]  ;;  %v52_v38 = vld [vmem:[%s13648_s2 + $0x30] sm:$0xff]  ;;  %v915_v7 = vlaneseq  ;;  %v945_v11 = vunpack.c.l.s4 %v11305_v10 }
   0xe   :  { %10842 = vmatprep.subr.msk.bf16.mxu0 %vm11368_vm1, %v10840_v12  ;;  %10400 = vmatprep.mubr.msk.f32.mxu1 %vm62_vm0, %v30_v28  ;;  %v10810_v32 = vpack.c.bf16 %v49_v31, %v48_v30  ;;  %v53_v39 = vld [vmem:[%s13648_s2 + $0x38] sm:$0xff]  ;;  %v32_v41 = vld [vmem:[%s13647_s1 + $0x10] sm:$0xff]  ;;  %v9934_v47 = vld [vmem:[%s13653_s7] ss:$0 sm:$0xff] }
   0xf   :  { %10806 = vmatprep.subr.msk.bf16.mxu1 %vm11368_vm1, %v10804_v29  ;;  %v10822_v40 = vpack.c.bf16 %v53_v39, %v52_v38  ;;  %v33_v42 = vld [vmem:[%s13647_s1 + $0x18] sm:$0xff]  ;;  %v56_v45 = vld [vmem:[%s13648_s2 + $0x50] sm:$0xff]  ;;  %v916_v13 = vshrl.u32 %v915_v7, 7 }
  0x10   :  { %10809 = vmatpush3.bf16.xpose.msk.msra.mxu1 %vm11368_vm1, %v10804_v29  ;;  %v57_v46 = vld [vmem:[%s13648_s2 + $0x58] sm:$0xff]  ;;  %v36_v49 = vld [vmem:[%s13647_s1 + $0x30] sm:$0xff] }
  0x11   :  { %10812 = vmatprep.subr.msk.bf16.mxu1 %vm11368_vm1, %v10810_v32  ;;  %v10834_v48 = vpack.c.bf16 %v57_v46, %v56_v45  ;;  %v37_v51 = vld [vmem:[%s13647_s1 + $0x38] sm:$0xff]  ;;  %v60_v57 = vld [vmem:[%s13648_s2 + $0x70] sm:$0xff] }
  0x12   :  { %v61_v58 = vld [vmem:[%s13648_s2 + $0x78] sm:$0xff]  ;;  %v40_v60 = vld [vmem:[%s13647_s1 + $0x50] sm:$0xff]  ;;  %s11302_s2 = smov 104  }
  0x13   :  { %v10846_v59 = vpack.c.bf16 %v61_v58, %v60_v57  ;;  %v41_v61 = vld [vmem:[%s13647_s1 + $0x58] sm:$0xff]  ;;  %v44_v0 = vld [vmem:[%s13647_s1 + $0x70] sm:$0xff] }
  0x14   :  { %10429 = vmatmul.mubr.msk.f32.vlgmr.msra.gmra.mrb[2].mxu0 %vm62_vm0, %v39_v15  ;;  %v45_v1 = vld [vmem:[%s13647_s1 + $0x78] sm:$0xff]  ;;  %s11306_s1 = smov 64  }
  0x15   :  { %10845 = vmatpush3.bf16.xpose.msk.msra.mxu0 %vm11368_vm1, %v10840_v12  ;;  %10442 = vmatprep.mubr.msk.f32.mxu0 %vm62_vm0, %v42_v16  ;;  %v914_v12 = vunpack.c.0.s8 %v913_v6  ;;  %v946_v16 = vunpack.c.0.s8 %v945_v11 }
  0x16   :  { %10853 = vmatprep.subr.bf16.mxu0 %v10852_v17 }
  0x17   :  { %10401 = vmatmul.mubr.msk.f32.vlgmr.msra.gmra.mrb[0].mxu1 %vm62_vm0, %v31_v33  ;;  %v11606_v19 = vsub.s32 %v914_v12, %v916_v13  ;;  %v11618_v26 = vsub.s32 %v946_v16, %v916_v13 }
  0x18   :  { %10815 = vmatpush3.bf16.xpose.msk.msra.mxu1 %vm11368_vm1, %v10810_v32  ;;  %10407 = vmatprep.mubr.msk.f32.mxu1 %vm62_vm0, %v32_v41 }
  0x19   :  { %10824 = vmatprep.subr.msk.bf16.mxu1 %vm11368_vm1, %v10822_v40 }
  0x1c   :  { %10443 = vmatmul.mubr.msk.f32.vlgmr.msra.gmra.mrb[4].mxu0 %vm62_vm0, %v43_v20 }
  0x1d   :  { %10855 = vmatpush3.bf16.msra.mxu0 %v10852_v17  ;;  %10460 = vmatprep.mubr.msk.f32.mxu0 %vm772_vm2, %v759_v22 }
  0x1e   :  { %10857 = vmatprep.subr.bf16.mxu0 %v10856_v21 }
  0x1f   :  { %10408 = vmatmul.mubr.msk.f32.vlgmr.msra.gmra.mrb[2].mxu1 %vm62_vm0, %v33_v42 }
  0x20   :  { %10827 = vmatpush3.bf16.xpose.msk.msra.mxu1 %vm11368_vm1, %v10822_v40  ;;  %10421 = vmatprep.mubr.msk.f32.mxu1 %vm62_vm0, %v36_v49 }
  0x21   :  { %10859 = vmatpush3.bf16.msra.mxu0 %v10856_v21  ;;  %10836 = vmatprep.subr.msk.bf16.mxu1 %vm11368_vm1, %v10834_v48 }
  0x24   :  { %10461 = vmatmul.mubr.msk.f32.vlgmr.msra.gmra.mrb[6].mxu0 %vm772_vm2, %v760_v23 }
  0x25   :  { %10463 = vmatprep.mubr.msk.f32.mxu0 %vm772_vm2, %v761_v24 }
  0x27   :  { %10422 = vmatmul.mubr.msk.f32.vlgmr.msra.gmra.mrb[4].mxu1 %vm62_vm0, %v37_v51 }
  0x28   :  { %10464 = vmatmul.mubr.msk.f32.gmra.mrb[8].mxu0 %vm772_vm2, %v762_v25  ;;  %10839 = vmatpush3.bf16.xpose.msk.msra.mxu1 %vm11368_vm1, %v10834_v48 }
  0x29   :  { %10435 = vmatprep.mubr.msk.f32.mxu1 %vm62_vm0, %v40_v60  ;;  %10848 = vmatprep.subr.msk.bf16.mxu1 %vm11368_vm1, %v10846_v59 }
  0x2f   :  { %10436 = vmatmul.mubr.msk.f32.vlgmr.msra.gmra.mrb[6].mxu1 %vm62_vm0, %v41_v61 }
  0x30   :  { %10851 = vmatpush3.bf16.xpose.msk.msra.mxu1 %vm11368_vm1, %v10846_v59  ;;  %10449 = vmatprep.mubr.msk.f32.mxu1 %vm62_vm0, %v44_v0 }
  0x37   :  { %10450 = vmatmul.mubr.msk.f32.vlgmr.msra.gmra.mrb[8].mxu1 %vm62_vm0, %v45_v1 }
  0xdf   :  { %v11473_v34 = vpop.f32.mrb[0].mxu0 }
  0xe0   :  { %v11475_v35 = vpop.f32.mrb[1].mxu0 }
  0xe7   :  { %v11477_v36 = vpop.f32.mrb[2].mxu0 }
  0xe8   :  { %v11479_v37 = vpop.f32.mrb[3].mxu0 }
  0xe9   :  { %13668 = vst [vmem:[#allocation5_spill] sm:$0xff] %v11479_v37 }
  0xef   :  { %v11496_v43 = vpop.f32.mrb[4].mxu0 }
  0xf0   :  { %13669 = vst [vmem:[#allocation6_spill] sm:$0xff] %v11496_v43  ;;  %v11499_v44 = vpop.f32.mrb[5].mxu0 }
  0xf1   :  { %13670 = vst [vmem:[#allocation7_spill] sm:$0xff] %v11499_v44 }
  0xf7   :  { %v10462_v50 = vpop.f32.mrb[6].mxu0 }
  0xf8   :  { %v11521_v52 = vadd.f32 %v10462_v50, %v9934_v47  ;;  %v851_v53 = vpop.f32.mrb[7].mxu0 }
  0xf9   :  { %v11530_v55 = vadd.f32 %v9934_v47, %v851_v53 }
  0xfa   :  { %888 = vrot.lane.b32.xlu1 %v11521_v52, %s11300_s9  ;;  %876 = vrot.lane.b32.xlu0 %v11521_v52, %s11301_s10 }
  0xfb   :  { %v10465_v54 = vpop.f32.mrb[8].mxu0 }
  0xfc   :  { %v861_v56 = vpop.f32.mrb[9].mxu0  ;;  %v11554_v62 = vadd.f32 %v10465_v54, %v9934_v47 }
  0xfd   :  { %v11560_v63 = vadd.f32 %v9934_v47, %v861_v56 }
  0xfe   :  { %886 = vrot.lane.b32.xlu1 %v11530_v55, %s11300_s9  ;;  %874 = vrot.lane.b32.xlu0 %v11530_v55, %s11301_s10 }
 0x102   :  { %900 = vrot.lane.b32.xlu1 %v11521_v52, %s11302_s2  ;;  %898 = vrot.lane.b32.xlu0 %v11530_v55, %s11302_s2 }
 0x106   :  { %880 = vrot.lane.b32.xlu1 %v11554_v62, %s11301_s10  ;;  %878 = vrot.lane.b32.xlu0 %v11560_v63, %s11301_s10 }
 0x10a   :  { %892 = vrot.lane.b32.xlu1 %v11554_v62, %s11300_s9  ;;  %890 = vrot.lane.b32.xlu0 %v11560_v63, %s11300_s9 }
 0x10e   :  { %904 = vrot.lane.b32.xlu1 %v11554_v62, %s11302_s2  ;;  %902 = vrot.lane.b32.xlu0 %v11560_v63, %s11302_s2 }
 0x112   :  { %1456 = vrot.lane.b32.xlu1 %v11521_v52, %s11303_s23  ;;  %1454 = vrot.lane.b32.xlu0 %v11530_v55, %s11303_s23 }
 0x16c   :  { %v11586_v2 = vpop.permute.xlu1 %888  ;;  %v11588_v4 = vpop.permute.xlu0 %876 }
 0x16d   :  { %1464 = vrot.lane.b32.xlu1 %v11588_v4, %s11303_s23  ;;  %v979_v16 = vcombine.high %v11521_v52, %v11586_v2 }
 0x170   :  { %v11592_v8 = vpop.permute.xlu1 %886  ;;  %v11594_v9 = vpop.permute.xlu0 %874 }
 0x171   :  { %1472 = vrot.lane.b32.xlu1 %v11586_v2, %s11303_s23  ;;  %1462 = vrot.lane.b32.xlu0 %v11594_v9, %s11303_s23  ;;  %v910_v14 = vcombine.low %v11530_v55, %v11592_v8  ;;  %v911_v15 = vcombine.high %v11530_v55, %v11592_v8 }
 0x173   :  { %v918_v24 = vrot.slane %v910_v14, %v11606_v19  ;;  %v925_v25 = vrot.slane %v911_v15, %v11606_v19  ;;  %v978_v15 = vcombine.low %v11521_v52, %v11586_v2 }
 0x174   :  { %v11604_v17 = vpop.permute.xlu1 %900  ;;  %v899_v18 = vpop.permute.xlu0 %898 }
 0x175   :  { %v926_v20 = vcombine.low %v11594_v9, %v899_v18  ;;  %v927_v21 = vcombine.high %v11594_v9, %v899_v18  ;;  %1480 = vrot.lane.b32.xlu1 %v11604_v17, %s11303_s23  ;;  %1470 = vrot.lane.b32.xlu0 %v11592_v8, %s11303_s23  ;;  %v994_v13 = vcombine.low %v11588_v4, %v11604_v17 }
 0x176   :  { %v995_v14 = vcombine.high %v11588_v4, %v11604_v17 }
 0x177   :  { %v934_v22 = vrot.slane %v926_v20, %v11606_v19  ;;  %v941_v23 = vrot.slane %v927_v21, %v11606_v19 }
 0x178   :  { %v11620_v27 = vpop.permute.xlu1 %880  ;;  %v11629_v40 = vpop.permute.xlu0 %878  ;;  %v1009_v20 = vrot.slane %v995_v14, %v11606_v19 }
 0x179   :  { %1460 = vrot.lane.b32.xlu1 %v11554_v62, %s11303_s23  ;;  %v942_v28 = vcombine.low %v918_v24, %v934_v22  ;;  %v943_v29 = vcombine.high %v918_v24, %v934_v22  ;;  %v958_v30 = vcombine.low %v925_v25, %v941_v23  ;;  %v959_v31 = vcombine.high %v925_v25, %v941_v23 }
 0x17a   :  { %1478 = vrot.lane.b32.xlu0 %v899_v18, %s11303_s23  ;;  %v986_v22 = vrot.slane %v978_v15, %v11606_v19  ;;  %v993_v23 = vrot.slane %v979_v16, %v11606_v19 }
 0x17b   :  { %v950_v32 = vrot.slane %v942_v28, %v11618_v26  ;;  %v957_v33 = vrot.slane %v943_v29, %v11618_v26  ;;  %v966_v38 = vrot.slane %v958_v30, %v11618_v26  ;;  %v973_v39 = vrot.slane %v959_v31, %v11618_v26 }
 0x17c   :  { %v11633_v41 = vpop.permute.xlu1 %892  ;;  %v11645_v53 = vpop.permute.xlu0 %890  ;;  %v1027_v28 = vcombine.high %v993_v23, %v1009_v20 }
 0x17d   :  { %1468 = vrot.lane.b32.xlu1 %v11620_v27, %s11303_s23  ;;  %13671 = vst [vmem:[#allocation8_spill] sm:$0xff] %v11633_v41  ;;  %v1182_v42 = vcombine.low %v950_v32, %v957_v33  ;;  %v9939_v45 = vcombine.high %v950_v32, %v957_v33  ;;  %v1198_v46 = vcombine.low %v966_v38, %v973_v39  ;;  %13672 = vst [vmem:[#allocation9_spill] sm:$0xff] %v11645_v53 }
 0x17e   :  { %1458 = vrot.lane.b32.xlu0 %v11560_v63, %s11303_s23  ;;  %v9940_v47 = vcombine.high %v966_v38, %v973_v39  ;;  %v1046_v29 = vcombine.low %v11560_v63, %v11645_v53  ;;  %v1047_v30 = vcombine.high %v11560_v63, %v11645_v53  ;;  %v1114_v33 = vcombine.low %v11554_v62, %v11633_v41 }
 0x17f   :  { %v1189_v48 = vrot.slane %v1182_v42, %v11606_v19  ;;  %v1197_v49 = vrot.slane %v9939_v45, %v11606_v19  ;;  %v1205_v50 = vrot.slane %v1198_v46, %v11606_v19  ;;  %v1115_v38 = vcombine.high %v11554_v62, %v11633_v41 }
 0x180   :  { %v1213_v51 = vrot.slane %v9940_v47, %v11606_v19  ;;  %v11647_v54 = vpop.permute.xlu1 %904  ;;  %v11653_v58 = vpop.permute.xlu0 %902  ;;  %v1041_v46 = vrot.slane %v1027_v28, %v11618_v26  ;;  %v1061_v47 = vrot.slane %v1047_v30, %v11606_v19 }
 0x181   :  { %1476 = vrot.lane.b32.xlu1 %v11633_v41, %s11303_s23  ;;  %13673 = vst [vmem:[#allocation10_spill] sm:$0xff] %v11647_v54  ;;  %v1214_v56 = vcombine.low %v1189_v48, %v1197_v49  ;;  %13674 = vst [vmem:[#allocation11_spill] sm:$0xff] %v11653_v58  ;;  %v1215_v61 = vcombine.high %v1189_v48, %v1197_v49  ;;  %v1130_v31 = vcombine.low %v11620_v27, %v11647_v54 }
 0x182   :  { %1466 = vrot.lane.b32.xlu0 %v11629_v40, %s11303_s23  ;;  %v1230_v57 = vcombine.low %v1205_v50, %v1213_v51  ;;  %v1231_v0 = vcombine.high %v1205_v50, %v1213_v51  ;;  %v1131_v32 = vcombine.high %v11620_v27, %v11647_v54  ;;  %v1122_v50 = vrot.slane %v1114_v33, %v11606_v19 }
 0x183   :  { %v1222_v59 = vrot.slane %v1214_v56, %v11618_v26  ;;  %v11664_v6 = vrot.slane %v1215_v61, %v11618_v26  ;;  %v1138_v48 = vrot.slane %v1130_v31, %v11606_v19  ;;  %v1129_v51 = vrot.slane %v1115_v38, %v11606_v19 }
 0x184   :  { %v1238_v60 = vrot.slane %v1230_v57, %v11618_v26  ;;  %v11667_v7 = vrot.slane %v1231_v0, %v11618_v26 }
 0x185   :  { %1484 = vrot.lane.b32.xlu1 %v11647_v54, %s11303_s23  ;;  %v1146_v14 = vcombine.low %v1122_v50, %v1138_v48  ;;  %v1147_v15 = vcombine.high %v1122_v50, %v1138_v48  ;;  %v1455_v50 = vpop.permute.xlu0 %1454 }
 0x186   :  { %1474 = vrot.lane.b32.xlu0 %v11645_v53, %s11303_s23  ;;  %v1246_v1 = vcombine.low %v1222_v59, %v1238_v60  ;;  %v1247_v5 = vcombine.high %v1222_v59, %v1238_v60 }
 0x187   :  { %v1154_v28 = vrot.slane %v1146_v14, %v11618_v26 }
 0x188   :  { %10470 = vmatprep.mubr.msk.f32.mxu1 %vm62_vm0, %v1246_v1  ;;  %10477 = vmatprep.mubr.msk.f32.mxu0 %vm62_vm0, %v1247_v5 }
 0x189   :  { %2046 = vrot.lane.b32.xlu1 %v11530_v55, %s11306_s1 }
 0x18a   :  { %1482 = vrot.lane.b32.xlu0 %v11653_v58, %s11303_s23 }
 0x18d   :  { %2054 = vrot.lane.b32.xlu1 %v11594_v9, %s11306_s1 }
 0x18e   :  { %2048 = vrot.lane.b32.xlu0 %v11521_v52, %s11306_s1 }
 0x191   :  { %2056 = vrot.lane.b32.xlu1 %v11588_v4, %s11306_s1  ;;  %v1062_v4 = vcombine.low %v11629_v40, %v11653_v58 }
 0x192   :  { %2062 = vrot.lane.b32.xlu0 %v11592_v8, %s11306_s1  ;;  %v11694_v8 = vpop.f32.mrb[0].mxu1 }
 0x193   :  { %v11696_v9 = vpop.f32.mrb[1].mxu1  ;;  %v1070_v39 = vrot.slane %v1062_v4, %v11606_v19 }
 0x194   :  { %v11698_v11 = vpop.f32.mrb[2].mxu1 }
 0x195   :  { %2064 = vrot.lane.b32.xlu1 %v11586_v2, %s11306_s1  ;;  %v11700_v12 = vpop.f32.mrb[3].mxu1  ;;  %v1026_v2 = vcombine.low %v993_v23, %v1009_v20 }
 0x196   :  { %2070 = vrot.lane.b32.xlu0 %v899_v18, %s11306_s1  ;;  %v1002_v18 = vrot.slane %v994_v13, %v11606_v19  ;;  %v11712_v21 = vpop.f32.mrb[4].mxu1 }
 0x197   :  { %v11716_v24 = vpop.f32.mrb[5].mxu1  ;;  %v1034_v45 = vrot.slane %v1026_v2, %v11618_v26 }
 0x198   :  { %v1010_v25 = vcombine.low %v986_v22, %v1002_v18  ;;  %v1011_v52 = vcombine.high %v986_v22, %v1002_v18  ;;  %v11744_v49 = vpop.f32.mrb[6].mxu1 }
 0x199   :  { %2072 = vrot.lane.b32.xlu1 %v11604_v17, %s11306_s1  ;;  %v1063_v17 = vcombine.high %v11629_v40, %v11653_v58  ;;  %13675 = vst [vmem:[#allocation12_spill] sm:$0xff] %v11744_v49  ;;  %v11748_v56 = vpop.f32.mrb[7].mxu1  ;;  %v1266_v5 = vcombine.low %v1034_v45, %v1041_v46  ;;  %v9942_v13 = vcombine.high %v1034_v45, %v1041_v46 }
 0x19a   :  { %2052 = vrot.lane.b32.xlu0 %v11554_v62, %s11306_s1  ;;  %v1018_v42 = vrot.slane %v1010_v25, %v11618_v26  ;;  %v1145_v62 = vrot.slane %v1131_v32, %v11606_v19  ;;  %13676 = vst [vmem:[#allocation13_spill] sm:$0xff] %v11748_v56  ;;  %v1457_v32 = vpop.permute.xlu1 %1456  ;;  %v11762_v33 = vpop.f32.mrb[8].mxu1 }
 0x19b   :  { %v1281_v2 = vrot.slane %v9942_v13, %v11606_v19  ;;  %13677 = vst [vmem:[#allocation14_spill] sm:$0xff] %v11762_v33  ;;  %v11764_v38 = vpop.f32.mrb[9].mxu1 }
 0x19c   :  { %v1162_v16 = vcombine.low %v1129_v51, %v1145_v62  ;;  %v1163_v18 = vcombine.high %v1129_v51, %v1145_v62  ;;  %13678 = vst [vmem:[#allocation15_spill] sm:$0xff] %v11764_v38 }
 0x19d   :  { %2050 = vrot.lane.b32.xlu1 %v11560_v63, %s11306_s1  ;;  %v1025_v63 = vrot.slane %v1011_v52, %v11618_v26  ;;  %v1273_v52 = vrot.slane %v1266_v5, %v11606_v19 }
 0x19e   :  { %v1170_v30 = vrot.slane %v1162_v16, %v11618_v26  ;;  %v1177_v31 = vrot.slane %v1163_v18, %v11618_v26 }
 0x19f   :  { %v1250_v0 = vcombine.low %v1018_v42, %v1025_v63  ;;  %v9941_v1 = vcombine.high %v1018_v42, %v1025_v63  ;;  %v1298_v46 = vcombine.low %v1273_v52, %v1281_v2 }
 0x1a0   :  { %v1402_v48 = vcombine.low %v1170_v30, %v1177_v31  ;;  %v9946_v62 = vcombine.high %v1170_v30, %v1177_v31 }
 0x1a1   :  { %2060 = vrot.lane.b32.xlu1 %v11620_v27, %s11306_s1  ;;  %v1054_v27 = vrot.slane %v1046_v29, %v11606_v19  ;;  %v1265_v25 = vrot.slane %v9941_v1, %v11606_v19  ;;  %v1161_v29 = vrot.slane %v1147_v15, %v11618_v26  ;;  %v11778_v13 = vrot.slane %v1298_v46, %v11618_v26 }
 0x1a3   :  { %v1078_v57 = vcombine.low %v1054_v27, %v1070_v39  ;;  %v1079_v59 = vcombine.high %v1054_v27, %v1070_v39  ;;  %v1386_v27 = vcombine.low %v1154_v28, %v1161_v29 }
 0x1a5   :  { %2058 = vrot.lane.b32.xlu1 %v11629_v40, %s11306_s1  ;;  %v1077_v40 = vrot.slane %v1063_v17, %v11606_v19  ;;  %v1086_v20 = vrot.slane %v1078_v57, %v11618_v26  ;;  %v1093_v22 = vrot.slane %v1079_v59, %v11618_v26  ;;  %v1257_v17 = vrot.slane %v1250_v0, %v11606_v19 }
 0x1a6   :  { %v1299_v59 = vcombine.high %v1273_v52, %v1281_v2  ;;  %v11781_v16 = vrot.slane %v1386_v27, %v11606_v19 }
 0x1a7   :  { %v1094_v60 = vcombine.low %v1061_v47, %v1077_v40  ;;  %v1095_v61 = vcombine.high %v1061_v47, %v1077_v40  ;;  %v1318_v39 = vcombine.low %v1086_v20, %v1093_v22  ;;  %v9943_v40 = vcombine.high %v1086_v20, %v1093_v22 }
 0x1a8   :  { %v1282_v45 = vcombine.low %v1257_v17, %v1265_v25  ;;  %v9945_v47 = vcombine.high %v1154_v28, %v1161_v29  ;;  %v1283_v57 = vcombine.high %v1257_v17, %v1265_v25  ;;  %v11787_v20 = vrot.slane %v1402_v48, %v11606_v19 }
 0x1a9   :  { %v1102_v23 = vrot.slane %v1094_v60, %v11618_v26  ;;  %v1109_v4 = vrot.slane %v1095_v61, %v11618_v26  ;;  %v1325_v60 = vrot.slane %v1318_v39, %v11606_v19  ;;  %v1333_v61 = vrot.slane %v9943_v40, %v11606_v19 }
 0x1aa   :  { %v11775_v5 = vrot.slane %v1282_v45, %v11618_v26  ;;  %v11784_v18 = vrot.slane %v9945_v47, %v11606_v19  ;;  %v11790_v22 = vrot.slane %v9946_v62, %v11606_v19 }
 0x1ab   :  { %v1334_v42 = vcombine.low %v1102_v23, %v1109_v4  ;;  %v9944_v63 = vcombine.high %v1102_v23, %v1109_v4  ;;  %v11793_v23 = vrot.slane %v1283_v57, %v11618_v26  ;;  %v11796_v4 = vrot.slane %v1299_v59, %v11618_v26 }
 0x1ac   :  { %v1350_v17 = vcombine.low %v1325_v60, %v1333_v61  ;;  %v1351_v52 = vcombine.high %v1325_v60, %v1333_v61  ;;  %v1418_v39 = vcombine.low %v11781_v16, %v11784_v18  ;;  %v1434_v40 = vcombine.low %v11787_v20, %v11790_v22 }
 0x1ad   :  { %v11769_v0 = vrot.slane %v1334_v42, %v11606_v19  ;;  %v11772_v1 = vrot.slane %v9944_v63, %v11606_v19 }
 0x1ae   :  { %v11813_v27 = vrot.slane %v1350_v17, %v11618_v26  ;;  %v11819_v48 = vrot.slane %v1351_v52, %v11618_v26  ;;  %v11831_v52 = vrot.slane %v1434_v40, %v11618_v26 }
 0x1af   :  { %v1366_v25 = vcombine.low %v11769_v0, %v11772_v1 }
 0x1b1   :  { %v11816_v47 = vrot.slane %v1366_v25, %v11618_v26  ;;  %v11828_v25 = vrot.slane %v1418_v39, %v11618_v26 }
 0x1df   :  { %v1465_v51 = vpop.permute.xlu1 %1464 }
 0x1e3   :  { %v1473_v14 = vpop.permute.xlu1 %1472  ;;  %v1463_v15 = vpop.permute.xlu0 %1462 }
 0x1e4   :  { %v1570_v2 = vcombine.low %v1457_v32, %v1473_v14  ;;  %v1571_v28 = vcombine.high %v1457_v32, %v1473_v14 }
 0x1e6   :  { %v1585_v57 = vrot.slane %v1571_v28, %v11606_v19 }
 0x1e7   :  { %v1481_v29 = vpop.permute.xlu1 %1480  ;;  %v1471_v45 = vpop.permute.xlu0 %1470 }
 0x1e8   :  { %v1586_v42 = vcombine.low %v1465_v51, %v1481_v29  ;;  %v1587_v63 = vcombine.high %v1465_v51, %v1481_v29  ;;  %v1578_v51 = vrot.slane %v1570_v2, %v11606_v19  ;;  %v1502_v61 = vcombine.low %v1455_v50, %v1471_v45 }
 0x1e9   :  { %v1503_v14 = vcombine.high %v1455_v50, %v1471_v45 }
 0x1ea   :  { %v1594_v59 = vrot.slane %v1586_v42, %v11606_v19  ;;  %v1601_v60 = vrot.slane %v1587_v63, %v11606_v19 }
 0x1eb   :  { %v1461_v17 = vpop.permute.xlu1 %1460 }
 0x1ec   :  { %v1602_v29 = vcombine.low %v1578_v51, %v1594_v59  ;;  %v1603_v32 = vcombine.high %v1578_v51, %v1594_v59  ;;  %v1618_v62 = vcombine.low %v1585_v57, %v1601_v60  ;;  %v1619_v46 = vcombine.high %v1585_v57, %v1601_v60  ;;  %v1479_v2 = vpop.permute.xlu0 %1478 }
 0x1ed   :  { %v1518_v10 = vcombine.low %v1463_v15, %v1479_v2  ;;  %v1519_v28 = vcombine.high %v1463_v15, %v1479_v2  ;;  %v1510_v51 = vrot.slane %v1502_v61, %v11606_v19  ;;  %v1517_v57 = vrot.slane %v1503_v14, %v11606_v19 }
 0x1ee   :  { %v1610_v63 = vrot.slane %v1602_v29, %v11618_v26  ;;  %v1617_v39 = vrot.slane %v1603_v32, %v11618_v26  ;;  %v1626_v40 = vrot.slane %v1618_v62, %v11618_v26  ;;  %v1633_v45 = vrot.slane %v1619_v46, %v11618_v26 }
 0x1ef   :  { %v1526_v15 = vrot.slane %v1518_v10, %v11606_v19  ;;  %v1533_v59 = vrot.slane %v1519_v28, %v11606_v19  ;;  %v1469_v60 = vpop.permute.xlu1 %1468 }
 0x1f0   :  { %v1842_v2 = vcombine.low %v1610_v63, %v1617_v39  ;;  %v9949_v42 = vcombine.high %v1610_v63, %v1617_v39  ;;  %v1858_v50 = vcombine.low %v1626_v40, %v1633_v45  ;;  %v9950_v55 = vcombine.high %v1626_v40, %v1633_v45  ;;  %v1459_v29 = vpop.permute.xlu0 %1458 }
 0x1f1   :  { %v1534_v31 = vcombine.low %v1510_v51, %v1526_v15  ;;  %v1535_v32 = vcombine.high %v1510_v51, %v1526_v15  ;;  %v1550_v30 = vcombine.low %v1517_v57, %v1533_v59  ;;  %v1551_v62 = vcombine.high %v1517_v57, %v1533_v59 }
 0x1f2   :  { %v11846_v46 = vrot.slane %v1842_v2, %v11606_v19  ;;  %v11849_v61 = vrot.slane %v9949_v42, %v11606_v19  ;;  %v11852_v10 = vrot.slane %v1858_v50, %v11606_v19  ;;  %v11855_v14 = vrot.slane %v9950_v55, %v11606_v19 }
 0x1f3   :  { %v1542_v28 = vrot.slane %v1534_v31, %v11618_v26  ;;  %v1549_v63 = vrot.slane %v1535_v32, %v11618_v26  ;;  %v1558_v39 = vrot.slane %v1550_v30, %v11618_v26  ;;  %v1565_v40 = vrot.slane %v1551_v62, %v11618_v26  ;;  %v1477_v45 = vpop.permute.xlu1 %1476 }
 0x1f4   :  { %v1706_v51 = vcombine.low %v1461_v17, %v1477_v45  ;;  %v1707_v57 = vcombine.high %v1461_v17, %v1477_v45  ;;  %v1467_v15 = vpop.permute.xlu0 %1466  ;;  %v1874_v42 = vcombine.low %v11846_v46, %v11849_v61  ;;  %v1890_v50 = vcombine.low %v11852_v10, %v11855_v14 }
 0x1f5   :  { %v1774_v55 = vcombine.low %v1542_v28, %v1549_v63  ;;  %v9947_v59 = vcombine.high %v1542_v28, %v1549_v63  ;;  %v1790_v2 = vcombine.low %v1558_v39, %v1565_v40  ;;  %v9948_v31 = vcombine.high %v1558_v39, %v1565_v40 }
 0x1f6   :  { %v1714_v32 = vrot.slane %v1706_v51, %v11606_v19  ;;  %v1721_v30 = vrot.slane %v1707_v57, %v11606_v19  ;;  %v1882_v62 = vrot.slane %v1874_v42, %v11618_v26  ;;  %v1898_v58 = vrot.slane %v1890_v50, %v11618_v26 }
 0x1f7   :  { %v11870_v17 = vrot.slane %v1774_v55, %v11606_v19  ;;  %v11873_v45 = vrot.slane %v9947_v59, %v11606_v19  ;;  %v11876_v54 = vrot.slane %v1790_v2, %v11606_v19  ;;  %v1805_v28 = vrot.slane %v9948_v31, %v11606_v19  ;;  %v1485_v63 = vpop.permute.xlu1 %1484 }
 0x1f8   :  { %v1722_v39 = vcombine.low %v1469_v60, %v1485_v63  ;;  %v1723_v40 = vcombine.high %v1469_v60, %v1485_v63  ;;  %v1475_v51 = vpop.permute.xlu0 %1474  ;;  %v1906_v57 = vcombine.low %v1882_v62, %v1898_v58  ;;  %v1907_v53 = vcombine.high %v1882_v62, %v1898_v58 }
 0x1f9   :  { %v1638_v42 = vcombine.low %v1459_v29, %v1475_v51  ;;  %v1639_v41 = vcombine.high %v1459_v29, %v1475_v51  ;;  %v1806_v50 = vcombine.low %v11870_v17, %v11873_v45  ;;  %v1822_v55 = vcombine.low %v11876_v54, %v1805_v28 }
 0x1fa   :  { %v1730_v59 = vrot.slane %v1722_v39, %v11606_v19  ;;  %v1737_v2 = vrot.slane %v1723_v40, %v11606_v19  ;;  %v1807_v31 = vcombine.high %v11870_v17, %v11873_v45  ;;  %v1823_v38 = vcombine.high %v11876_v54, %v1805_v28 }
 0x1fb   :  { %v1646_v60 = vrot.slane %v1638_v42, %v11606_v19  ;;  %v1653_v58 = vrot.slane %v1639_v41, %v11606_v19  ;;  %v11889_v62 = vpop.permute.xlu1 %2046  ;;  %v1814_v29 = vrot.slane %v1806_v50, %v11618_v26  ;;  %v1830_v63 = vrot.slane %v1822_v55, %v11618_v26 }
 0x1fc   :  { %v1738_v51 = vcombine.low %v1714_v32, %v1730_v59  ;;  %v1739_v44 = vcombine.high %v1714_v32, %v1730_v59  ;;  %v1754_v39 = vcombine.low %v1721_v30, %v1737_v2  ;;  %v1755_v33 = vcombine.high %v1721_v30, %v1737_v2  ;;  %v1483_v40 = vpop.permute.xlu0 %1482 }
 0x1fd   :  { %v1654_v43 = vcombine.low %v1467_v15, %v1483_v40  ;;  %v1655_v56 = vcombine.high %v1467_v15, %v1483_v40  ;;  %v1838_v17 = vcombine.low %v1814_v29, %v1830_v63  ;;  %v1839_v45 = vcombine.high %v1814_v29, %v1830_v63 }
 0x1fe   :  { %v1746_v54 = vrot.slane %v1738_v51, %v11618_v26  ;;  %v1753_v28 = vrot.slane %v1739_v44, %v11618_v26  ;;  %v1762_v41 = vrot.slane %v1754_v39, %v11618_v26  ;;  %v1769_v42 = vrot.slane %v1755_v33, %v11618_v26 }
 0x1ff   :  { %v1662_v50 = vrot.slane %v1654_v43, %v11606_v19  ;;  %v1669_v55 = vrot.slane %v1655_v56, %v11606_v19  ;;  %v11899_v32 = vpop.permute.xlu1 %2054  ;;  %v10860_v30 = vpack.c.bf16 %v1906_v57, %v1838_v17  ;;  %v10866_v59 = vpack.c.bf16 %v1907_v53, %v1839_v45 }
 0x200   :  { %v1978_v2 = vcombine.low %v1746_v54, %v1753_v28  ;;  %v9953_v15 = vcombine.high %v1746_v54, %v1753_v28  ;;  %v1994_v40 = vcombine.low %v1762_v41, %v1769_v42  ;;  %v9954_v29 = vcombine.high %v1762_v41, %v1769_v42  ;;  %v2049_v49 = vpop.permute.xlu0 %2048 }
 0x201   :  { %v1670_v63 = vcombine.low %v1646_v60, %v1662_v50  ;;  %v1671_v51 = vcombine.high %v1646_v60, %v1662_v50  ;;  %v1686_v37 = vcombine.low %v1653_v58, %v1669_v55  ;;  %v1687_v44 = vcombine.high %v1653_v58, %v1669_v55  ;;  %10862 = vmatprep.subr.msk.bf16.mxu1 %vm11368_vm1, %v10860_v30 }
 0x202   :  { %v11904_v43 = vrot.slane %v1978_v2, %v11606_v19  ;;  %v11907_v56 = vrot.slane %v9953_v15, %v11606_v19  ;;  %v11910_v53 = vrot.slane %v1994_v40, %v11606_v19  ;;  %v11913_v33 = vrot.slane %v9954_v29, %v11606_v19  ;;  %10868 = vmatprep.subr.msk.bf16.mxu0 %vm11368_vm1, %v10866_v59 }
 0x203   :  { %v1678_v57 = vrot.slane %v1670_v63, %v11618_v26  ;;  %v1685_v60 = vrot.slane %v1671_v51, %v11618_v26  ;;  %v1694_v58 = vrot.slane %v1686_v37, %v11618_v26  ;;  %v1701_v39 = vrot.slane %v1687_v44, %v11618_v26  ;;  %10865 = vmatpush3.bf16.xpose.msk.msra.mxu1 %vm11368_vm1, %v10860_v30  ;;  %v2057_v17 = vpop.permute.xlu1 %2056 }
 0x204   :  { %10871 = vmatpush3.bf16.xpose.msk.msra.mxu0 %vm11368_vm1, %v10866_v59  ;;  %v1821_v45 = vrot.slane %v1807_v31, %v11618_v26  ;;  %v1837_v54 = vrot.slane %v1823_v38, %v11618_v26  ;;  %v1875_v28 = vcombine.high %v11846_v46, %v11849_v61  ;;  %v1891_v41 = vcombine.high %v11852_v10, %v11855_v14  ;;  %v2063_v2 = vpop.permute.xlu0 %2062 }
 0x205   :  { %v1910_v37 = vcombine.low %v1678_v57, %v1685_v60  ;;  %v9951_v42 = vcombine.high %v1678_v57, %v1685_v60  ;;  %v1926_v50 = vcombine.low %v1694_v58, %v1701_v39  ;;  %v9952_v55 = vcombine.high %v1694_v58, %v1701_v39 }
 0x206   :  { %v1840_v30 = vcombine.low %v1821_v45, %v1837_v54  ;;  %v1889_v15 = vrot.slane %v1875_v28, %v11618_v26  ;;  %v1905_v59 = vrot.slane %v1891_v41, %v11618_v26  ;;  %v1841_v40 = vcombine.high %v1821_v45, %v1837_v54 }
 0x207   :  { %v11934_v31 = vrot.slane %v1910_v37, %v11606_v19  ;;  %v11937_v38 = vrot.slane %v9951_v42, %v11606_v19  ;;  %v11940_v46 = vrot.slane %v1926_v50, %v11606_v19  ;;  %v11943_v61 = vrot.slane %v9952_v55, %v11606_v19  ;;  %v2065_v10 = vpop.permute.xlu1 %2064 }
 0x208   :  { %v1908_v14 = vcombine.low %v1889_v15, %v1905_v59  ;;  %v1909_v29 = vcombine.high %v1889_v15, %v1905_v59  ;;  %v2094_v63 = vcombine.low %v11889_v62, %v2063_v2  ;;  %v2095_v51 = vcombine.high %v11889_v62, %v2063_v2  ;;  %v2071_v60 = vpop.permute.xlu0 %2070 }
 0x209   :  { %v2162_v44 = vcombine.low %v2049_v49, %v2065_v10  ;;  %v2163_v57 = vcombine.high %v2049_v49, %v2065_v10  ;;  %v1942_v58 = vcombine.low %v11934_v31, %v11937_v38  ;;  %v1958_v39 = vcombine.low %v11940_v46, %v11943_v61 }
 0x20a   :  { %v10872_v45 = vpack.c.bf16 %v1908_v14, %v1840_v30  ;;  %v10878_v54 = vpack.c.bf16 %v1909_v29, %v1841_v40  ;;  %v2102_v28 = vrot.slane %v2094_v63, %v11606_v19  ;;  %v2109_v41 = vrot.slane %v2095_v51, %v11606_v19 }
 0x20b   :  { %v13679_v37 = vcombine.low %v11775_v5, %v11778_v13  ;;  %v2170_v49 = vrot.slane %v2162_v44, %v11606_v19  ;;  %v2177_v62 = vrot.slane %v2163_v57, %v11606_v19  ;;  %v2110_v42 = vcombine.low %v11899_v32, %v2071_v60  ;;  %v2073_v2 = vpop.permute.xlu1 %2072 }
 0x20c   :  { %v2111_v50 = vcombine.high %v11899_v32, %v2071_v60  ;;  %v13680_v55 = vcombine.high %v11775_v5, %v11778_v13  ;;  %10874 = vmatprep.subr.msk.bf16.mxu1 %vm11368_vm1, %v10872_v45  ;;  %10880 = vmatprep.subr.msk.bf16.mxu0 %vm11368_vm1, %v10878_v54  ;;  %v2178_v30 = vcombine.low %v2057_v17, %v2073_v2 }
 0x20d   :  { %10471 = vmatmul.mubr.msk.f32.vlgmr.msra.gmra.mrb[10].mxu1 %vm62_vm0, %v13679_v37  ;;  %v2179_v15 = vcombine.high %v2057_v17, %v2073_v2  ;;  %v11970_v59 = vrot.slane %v1942_v58, %v11618_v26  ;;  %v2118_v40 = vrot.slane %v2110_v42, %v11606_v19  ;;  %v13681_v5 = vcombine.low %v11664_v6, %v11667_v7 }
 0x20e   :  { %10478 = vmatmul.mubr.msk.f32.vlgmr.msra.gmra.mrb[10].mxu0 %vm62_vm0, %v13680_v55  ;;  %v2125_v32 = vrot.slane %v2111_v50, %v11606_v19  ;;  %10877 = vmatpush3.bf16.xpose.msk.msra.mxu1 %vm11368_vm1, %v10872_v45  ;;  %v1966_v13 = vrot.slane %v1958_v39, %v11618_v26  ;;  %v13682_v17 = vcombine.high %v11664_v6, %v11667_v7 }
 0x20f   :  { %10484 = vmatprep.mubr.msk.f32.mxu1 %vm62_vm0, %v13681_v5  ;;  %10883 = vmatpush3.bf16.xpose.msk.msra.mxu0 %vm11368_vm1, %v10878_v54  ;;  %v2186_v10 = vrot.slane %v2178_v30, %v11606_v19  ;;  %v2193_v14 = vrot.slane %v2179_v15, %v11606_v19  ;;  %v2010_v29 = vcombine.low %v11904_v43, %v11907_v56 }
 0x210   :  { %10491 = vmatprep.mubr.msk.f32.mxu0 %vm62_vm0, %v13682_v17  ;;  %v2126_v63 = vcombine.low %v2102_v28, %v2118_v40  ;;  %v2127_v51 = vcombine.high %v2102_v28, %v2118_v40  ;;  %v2142_v44 = vcombine.low %v2109_v41, %v2125_v32  ;;  %v2143_v57 = vcombine.high %v2109_v41, %v2125_v32 }
 0x211   :  { %v2194_v60 = vcombine.low %v2170_v49, %v2186_v10  ;;  %v2195_v58 = vcombine.high %v2170_v49, %v2186_v10  ;;  %v2210_v39 = vcombine.low %v2177_v62, %v2193_v14  ;;  %v2211_v45 = vcombine.high %v2177_v62, %v2193_v14 }
 0x212   :  { %v2134_v54 = vrot.slane %v2126_v63, %v11618_v26  ;;  %v2141_v6 = vrot.slane %v2127_v51, %v11618_v26  ;;  %v2150_v7 = vrot.slane %v2142_v44, %v11618_v26  ;;  %v2157_v37 = vrot.slane %v2143_v57, %v11618_v26 }
 0x213   :  { %v2202_v42 = vrot.slane %v2194_v60, %v11618_v26  ;;  %v2209_v50 = vrot.slane %v2195_v58, %v11618_v26  ;;  %v2218_v28 = vrot.slane %v2210_v39, %v11618_v26  ;;  %v2225_v41 = vrot.slane %v2211_v45, %v11618_v26 }
 0x214   :  { %v2366_v55 = vcombine.low %v2134_v54, %v2141_v6  ;;  %v9955_v49 = vcombine.high %v2134_v54, %v2141_v6  ;;  %v2382_v2 = vcombine.low %v2150_v7, %v2157_v37  ;;  %v9956_v62 = vcombine.high %v2150_v7, %v2157_v37 }
 0x215   :  { %v2434_v30 = vcombine.low %v2202_v42, %v2209_v50  ;;  %v9957_v15 = vcombine.high %v2202_v42, %v2209_v50  ;;  %v2450_v40 = vcombine.low %v2218_v28, %v2225_v41  ;;  %v9958_v32 = vcombine.high %v2218_v28, %v2225_v41 }
 0x216   :  { %v13683_v5 = vcombine.low %v11793_v23, %v11796_v4  ;;  %v13684_v17 = vcombine.high %v11793_v23, %v11796_v4  ;;  %v1974_v10 = vcombine.low %v11970_v59, %v1966_v13  ;;  %v2018_v14 = vrot.slane %v2010_v29, %v11618_v26 }
 0x217   :  { %v2026_v63 = vcombine.low %v11910_v53, %v11913_v33  ;;  %v1975_v51 = vcombine.high %v11970_v59, %v1966_v13  ;;  %v13685_v44 = vcombine.low %v11813_v27, %v11816_v47  ;;  %v13686_v57 = vcombine.high %v11813_v27, %v11816_v47 }
 0x218   :  { %10485 = vmatmul.mubr.msk.f32.vlgmr.msra.gmra.mrb[12].mxu1 %vm62_vm0, %v13683_v5  ;;  %10492 = vmatmul.mubr.msk.f32.vlgmr.msra.gmra.mrb[12].mxu0 %vm62_vm0, %v13684_v17  ;;  %v1943_v23 = vcombine.high %v11934_v31, %v11937_v38  ;;  %v1959_v4 = vcombine.high %v11940_v46, %v11943_v61  ;;  %v2011_v29 = vcombine.high %v11904_v43, %v11907_v56 }
 0x219   :  { %10498 = vmatprep.mubr.msk.f32.mxu1 %vm62_vm0, %v13685_v44  ;;  %10505 = vmatprep.mubr.msk.f32.mxu0 %vm62_vm0, %v13686_v57  ;;  %v2034_v59 = vrot.slane %v2026_v63, %v11618_v26  ;;  %v2027_v13 = vcombine.high %v11910_v53, %v11913_v33  ;;  %v2373_v60 = vrot.slane %v2366_v55, %v11606_v19 }
 0x21a   :  { %v2381_v27 = vrot.slane %v9955_v49, %v11606_v19  ;;  %v1957_v47 = vrot.slane %v1943_v23, %v11618_v26  ;;  %v1973_v58 = vrot.slane %v1959_v4, %v11618_v26  ;;  %v2025_v31 = vrot.slane %v2011_v29, %v11618_v26 }
 0x21b   :  { %v2389_v38 = vrot.slane %v2382_v2, %v11606_v19  ;;  %v2042_v46 = vcombine.low %v2018_v14, %v2034_v59  ;;  %v2043_v61 = vcombine.high %v2018_v14, %v2034_v59  ;;  %v2041_v43 = vrot.slane %v2027_v13, %v11618_v26 }
 0x21c   :  { %v2397_v56 = vrot.slane %v9956_v62, %v11606_v19  ;;  %v1976_v39 = vcombine.low %v1957_v47, %v1973_v58  ;;  %v1977_v53 = vcombine.high %v1957_v47, %v1973_v58  ;;  %v2398_v33 = vcombine.low %v2373_v60, %v2381_v27 }
 0x21d   :  { %v2441_v45 = vrot.slane %v2434_v30, %v11606_v19  ;;  %v10884_v54 = vpack.c.bf16 %v2042_v46, %v1974_v10  ;;  %v10890_v6 = vpack.c.bf16 %v2043_v61, %v1975_v51  ;;  %v2044_v7 = vcombine.low %v2025_v31, %v2041_v43 }
 0x21e   :  { %v2045_v37 = vcombine.high %v2025_v31, %v2041_v43  ;;  %v2406_v42 = vrot.slane %v2398_v33, %v11618_v26  ;;  %v2414_v50 = vcombine.low %v2389_v38, %v2397_v56  ;;  %v2449_v28 = vrot.slane %v9957_v15, %v11606_v19 }
 0x21f   :  { %v2457_v41 = vrot.slane %v2450_v40, %v11606_v19  ;;  %10886 = vmatprep.subr.msk.bf16.mxu1 %vm11368_vm1, %v10884_v54  ;;  %10892 = vmatprep.subr.msk.bf16.mxu0 %vm11368_vm1, %v10890_v6  ;;  %v10896_v55 = vpack.c.bf16 %v2044_v7, %v1976_v39  ;;  %v2465_v2 = vrot.slane %v9958_v32, %v11606_v19 }
 0x220   :  { %v10902_v49 = vpack.c.bf16 %v2045_v37, %v1977_v53  ;;  %10889 = vmatpush3.bf16.xpose.msk.msra.mxu1 %vm11368_vm1, %v10884_v54  ;;  %10895 = vmatpush3.bf16.xpose.msk.msra.mxu0 %vm11368_vm1, %v10890_v6  ;;  %v2422_v62 = vrot.slane %v2414_v50, %v11618_v26  ;;  %v2466_v30 = vcombine.low %v2441_v45, %v2449_v28 }
 0x221   :  { %v2399_v15 = vcombine.high %v2373_v60, %v2381_v27  ;;  %10898 = vmatprep.subr.msk.bf16.mxu1 %vm11368_vm1, %v10896_v55  ;;  %v2482_v40 = vcombine.low %v2457_v41, %v2465_v2  ;;  %v2415_v5 = vcombine.high %v2389_v38, %v2397_v56  ;;  %v2467_v17 = vcombine.high %v2441_v45, %v2449_v28 }
 0x222   :  { %10904 = vmatprep.subr.msk.bf16.mxu0 %vm11368_vm1, %v10902_v49  ;;  %v13687_v32 = vcombine.high %v11769_v0, %v11772_v1  ;;  %v2474_v14 = vrot.slane %v2466_v30, %v11618_v26  ;;  %v2483_v51 = vcombine.high %v2457_v41, %v2465_v2  ;;  %v1450_v4 = vcombine.low %v11828_v25, %v11831_v52 }
 0x223   :  { %v2413_v63 = vrot.slane %v2399_v15, %v11618_v26  ;;  %v2490_v44 = vrot.slane %v2482_v40, %v11618_v26  ;;  %v2429_v57 = vrot.slane %v2415_v5, %v11618_v26  ;;  %v2481_v23 = vrot.slane %v2467_v17, %v11618_v26 }
 0x224   :  { %v1381_v10 = vrot.slane %v13687_v32, %v11618_v26  ;;  %v1419_v29 = vcombine.high %v11781_v16, %v11784_v18  ;;  %v1435_v0 = vcombine.high %v11787_v20, %v11790_v22  ;;  %v2497_v1 = vrot.slane %v2483_v51, %v11618_v26 }
 0x225   :  { %v1451_v59 = vcombine.high %v11828_v25, %v11831_v52  ;;  %v2430_v13 = vcombine.low %v2406_v42, %v2422_v62  ;;  %v2498_v60 = vcombine.low %v2474_v14, %v2490_v44  ;;  %v2433_v27 = vcombine.high %v2413_v63, %v2429_v57 }
 0x226   :  { %v1384_v47 = vcombine.low %v11819_v48, %v1381_v10  ;;  %v2432_v58 = vcombine.low %v2413_v63, %v2429_v57  ;;  %v2500_v31 = vcombine.low %v2481_v23, %v2497_v1  ;;  %v2501_v38 = vcombine.high %v2481_v23, %v2497_v1  ;;  %v13688_v57 = vld [vmem:[#allocation12_spill] sm:$0xff] }
 0x227   :  { %10499 = vmatmul.mubr.msk.f32.vlgmr.msra.gmra.mrb[14].mxu1 %vm62_vm0, %v1450_v4  ;;  %10506 = vmatmul.mubr.msk.f32.vlgmr.msra.gmra.mrb[14].mxu0 %vm62_vm0, %v1451_v59  ;;  %v1385_v16 = vcombine.high %v11819_v48, %v1381_v10  ;;  %v10908_v18 = vpack.c.bf16 %v2498_v60, %v2430_v13  ;;  %v1433_v25 = vrot.slane %v1419_v29, %v11618_v26  ;;  %v13690_v59 = vld [vmem:[#allocation13_spill] sm:$0xff] }
 0x228   :  { %10901 = vmatpush3.bf16.xpose.msk.msra.mxu1 %vm11368_vm1, %v10896_v55  ;;  %10512 = vmatprep.mubr.msk.f32.mxu1 %vm62_vm0, %v1384_v47  ;;  %v10916_v20 = vpack.c.bf16 %v2500_v31, %v2432_v58  ;;  %v12080_v22 = vpack.c.bf16 %v2501_v38, %v2433_v27  ;;  %v1449_v52 = vrot.slane %v1435_v0, %v11618_v26  ;;  %v13689_v0 = vld [vmem:[#allocation5_spill] sm:$0xff]  ;;  %v13691_v38 = vld [vmem:[#allocation6_spill] sm:$0xff] }
 0x229   :  { %10907 = vmatpush3.bf16.xpose.msk.msra.mxu0 %vm11368_vm1, %v10902_v49  ;;  %10519 = vmatprep.mubr.msk.f32.mxu0 %vm62_vm0, %v1385_v16  ;;  %v2499_v48 = vcombine.high %v2474_v14, %v2490_v44  ;;  %v2431_v61 = vcombine.high %v2406_v42, %v2422_v62 }
 0x22a   :  { %10909 = vmatprep.subr.bf16.mxu1 %v10908_v18  ;;  %10917 = vmatprep.subr.bf16.mxu0 %v10916_v20  ;;  %v1452_v46 = vcombine.low %v1433_v25, %v1449_v52  ;;  %v1453_v43 = vcombine.high %v1433_v25, %v1449_v52  ;;  %v13692_v25 = vld [vmem:[#allocation14_spill] sm:$0xff] }
 0x22b   :  { %v12088_v56 = vpack.c.bf16 %v2499_v48, %v2431_v61  ;;  %v13693_v48 = vld [vmem:[#allocation7_spill] sm:$0xff] }
 0x22f   :  { %10513 = vmatmul.mubr.msk.f32.vlgmr.msra.gmra.mrb[16].mxu1 %vm62_vm0, %v1452_v46 }
 0x230   :  { %10520 = vmatmul.mubr.msk.f32.vlgmr.msra.gmra.mrb[16].mxu0 %vm62_vm0, %v1453_v43  ;;  %10911 = vmatpush3.bf16.msra.mxu1 %v10908_v18  ;;  %v13694_v43 = vld [vmem:[#allocation15_spill] sm:$0xff] }
 0x231   :  { %10919 = vmatpush3.bf16.msra.mxu0 %v10916_v20  ;;  %10913 = vmatprep.subr.bf16.mxu1 %v12088_v56 }
 0x2e0   :  { %v10472_v39 = vpop.f32.mrb[10].mxu1 }
 0x2e1   :  { %v12093_v53 = vadd.f32 %v10472_v39, %v11694_v8  ;;  %v10479_v33 = vpop.f32.mrb[10].mxu0  ;;  %v2716_v45 = vpop.f32.mrb[11].mxu1 }
 0x2e2   :  { %v12096_v54 = vadd.f32 %v10479_v33, %v11698_v11  ;;  %v12099_v6 = vadd.f32 %v2716_v45, %v11696_v9  ;;  %v2803_v7 = vpop.f32.mrb[11].mxu0 }
 0x2e3   :  { %v12102_v37 = vadd.f32 %v2803_v7, %v11700_v12  ;;  %v3338_v42 = vsel %vm3334_vm3, %v12093_v53, -inf }
 0x2e4   :  { %v3344_v50 = vsel %vm3334_vm3, %v12096_v54, -inf  ;;  %3339 = vmax.xlane.f32.xlu1 %v3338_v42  ;;  %v3335_v28 = vsel %vm3334_vm3, %v12099_v6, -inf }
 0x2e5   :  { %3345 = vmax.xlane.f32.xlu0 %v3344_v50  ;;  %v3341_v40 = vsel %vm3334_vm3, %v12102_v37, -inf  ;;  %v13695_v50 = vld [vmem:[#allocation8_spill] sm:$0xff] }
 0x2e9   :  { %3336 = vmax.xlane.f32.xlu0 %v3335_v28  ;;  %v13696_v28 = vld [vmem:[#allocation9_spill] sm:$0xff] }
 0x2eb   :  { %v10486_v41 = vpop.f32.mrb[12].mxu1  ;;  %v10493_v49 = vpop.f32.mrb[12].mxu0 }
 0x2ec   :  { %v12111_v55 = vadd.f32 %v10486_v41, %v11473_v34  ;;  %v2890_v2 = vpop.f32.mrb[13].mxu1  ;;  %v12114_v62 = vadd.f32 %v10493_v49, %v11712_v21  ;;  %v2977_v15 = vpop.f32.mrb[13].mxu0 }
 0x2ed   :  { %v12117_v30 = vadd.f32 %v2890_v2, %v11475_v35  ;;  %v12122_v5 = vadd.f32 %v2977_v15, %v11716_v24  ;;  %3342 = vmax.xlane.f32.xlu0 %v3341_v40  ;;  %v12176_v41 = vpop.permute.xlu1 %2050  ;;  %v12182_v15 = vpop.permute.xlu0 %2052 }
 0x2ee   :  { %v3350_v17 = vsel %vm3334_vm3, %v12111_v55, -inf  ;;  %v3356_v32 = vsel %vm3334_vm3, %v12114_v62, -inf }
 0x2ef   :  { %3351 = vmax.xlane.f32.xlu1 %v3350_v17  ;;  %v3347_v10 = vsel %vm3334_vm3, %v12117_v30, -inf  ;;  %v3353_v14 = vsel %vm3334_vm3, %v12122_v5, -inf }
 0x2f1   :  { %3357 = vmax.xlane.f32.xlu0 %v3356_v32  ;;  %v12178_v49 = vpop.permute.xlu1 %2060 }
 0x2f3   :  { %3348 = vmax.xlane.f32.xlu1 %v3347_v10 }
 0x2f5   :  { %3354 = vmax.xlane.f32.xlu0 %v3353_v14  ;;  %v12180_v2 = vpop.permute.xlu1 %2058 }
 0x2fa   :  { %v10500_v63 = vpop.f32.mrb[14].mxu1  ;;  %v10507_v51 = vpop.f32.mrb[14].mxu0 }
 0x2fb   :  { %v12133_v44 = vadd.f32 %v10500_v63, %v11477_v36  ;;  %v12136_v23 = vadd.f32 %v10507_v51, %v13688_v57  ;;  %v3064_v4 = vpop.f32.mrb[15].mxu1  ;;  %v3151_v29 = vpop.f32.mrb[15].mxu0 }
 0x2fc   :  { %v12139_v1 = vadd.f32 %v3064_v4, %v13689_v0  ;;  %v12142_v13 = vadd.f32 %v3151_v29, %v13690_v59 }
 0x2fd   :  { %v3362_v60 = vsel %vm3334_vm3, %v12133_v44, -inf  ;;  %v3368_v27 = vsel %vm3334_vm3, %v12136_v23, -inf }
 0x2fe   :  { %3363 = vmax.xlane.f32.xlu1 %v3362_v60  ;;  %3369 = vmax.xlane.f32.xlu0 %v3368_v27  ;;  %v3359_v47 = vsel %vm3334_vm3, %v12139_v1, -inf  ;;  %v3365_v58 = vsel %vm3334_vm3, %v12142_v13, -inf }
 0x302   :  { %v10514_v31 = vpop.f32.mrb[16].mxu1  ;;  %3360 = vmax.xlane.f32.xlu1 %v3359_v47  ;;  %3366 = vmax.xlane.f32.xlu0 %v3365_v58 }
 0x303   :  { %v12153_v16 = vadd.f32 %v10514_v31, %v13691_v38  ;;  %v10521_v18 = vpop.f32.mrb[16].mxu0  ;;  %v3238_v20 = vpop.f32.mrb[17].mxu1 }
 0x304   :  { %v12156_v52 = vadd.f32 %v10521_v18, %v13692_v25  ;;  %v12159_v46 = vadd.f32 %v3238_v20, %v13693_v48  ;;  %v3325_v61 = vpop.f32.mrb[17].mxu0 }
 0x305   :  { %v12162_v39 = vadd.f32 %v3325_v61, %v13694_v43  ;;  %v3374_v33 = vsel %vm3334_vm3, %v12153_v16, -inf }
 0x306   :  { %3375 = vmax.xlane.f32.xlu1 %v3374_v33  ;;  %v3380_v45 = vsel %vm3334_vm3, %v12156_v52, -inf  ;;  %v3371_v7 = vsel %vm3334_vm3, %v12159_v46, -inf }
 0x307   :  { %3381 = vmax.xlane.f32.xlu0 %v3380_v45  ;;  %v3377_v42 = vsel %vm3334_vm3, %v12162_v39, -inf }
 0x30a   :  { %3372 = vmax.xlane.f32.xlu1 %v3371_v7 }
 0x30b   :  { %3378 = vmax.xlane.f32.xlu0 %v3377_v42 }
 0x31b   :  { %2068 = vrot.lane.b32.xlu1 %v13695_v50, %s11306_s1 }
 0x321   :  { %2066 = vrot.lane.b32.xlu0 %v13696_v28, %s11306_s1 }
 0x371   :  { %v3340_v40 = vpop.xlane.xlu1 %3339 }
 0x372   :  { %v3346_v17 = vpop.xlane.xlu0 %3345  ;;  %v3384_v32 = vsub.f32 %v12093_v53, %v3340_v40 }
 0x373   :  { %v3386_v10 = vsub.f32 %v12096_v54, %v3346_v17 }
 0x374   :  { %v3401_v14 = vmul.f32 1.442695, %v3384_v32 }
 0x375   :  { %v3405_v63 = vmul.f32 1.442695, %v3386_v10 }
 0x376   :  { %11104 = vpow2.f32 %v3401_v14  ;;  %v3337_v51 = vpop.xlane.xlu0 %3336 }
 0x377   :  { %v3383_v4 = vsub.f32 %v12099_v6, %v3337_v51  ;;  %11106 = vpow2.f32 %v3405_v63 }
 0x379   :  { %v3399_v29 = vmul.f32 1.442695, %v3383_v4 }
 0x37a   :  { %v3343_v60 = vpop.xlane.xlu0 %3342 }
 0x37b   :  { %11108 = vpow2.f32 %v3399_v29  ;;  %v3385_v47 = vsub.f32 %v12102_v37, %v3343_v60 }
 0x37c   :  { %v3352_v27 = vpop.xlane.xlu1 %3351 }
 0x37d   :  { %v3388_v58 = vsub.f32 %v12111_v55, %v3352_v27  ;;  %v3403_v31 = vmul.f32 1.442695, %v3385_v47 }
 0x37e   :  { %v3358_v53 = vpop.xlane.xlu0 %3357 }
 0x37f   :  { %v3409_v18 = vmul.f32 1.442695, %v3388_v58  ;;  %11110 = vpow2.f32 %v3403_v31  ;;  %v3390_v20 = vsub.f32 %v12114_v62, %v3358_v53 }
 0x380   :  { %v3349_v54 = vpop.xlane.xlu1 %3348  ;;  %v12190_v61 = vpop.eup %11104 }
 0x381   :  { %v3387_v6 = vsub.f32 %v12117_v30, %v3349_v54  ;;  %11112 = vpow2.f32 %v3409_v18  ;;  %v3413_v33 = vmul.f32 1.442695, %v3390_v20  ;;  %v3434_v45 = vsel %vm3334_vm3, %v12190_v61, 0.0  ;;  %v12195_v7 = vpop.eup %11106 }
 0x382   :  { %v3355_v55 = vpop.xlane.xlu0 %3354  ;;  %3435 = vadd.xlane.f32.xlu0 %v3434_v45  ;;  %v3440_v30 = vsel %vm3334_vm3, %v12195_v7, 0.0 }
 0x383   :  { %v3407_v37 = vmul.f32 1.442695, %v3387_v6  ;;  %11114 = vpow2.f32 %v3413_v33  ;;  %v3389_v42 = vsub.f32 %v12122_v5, %v3355_v55 }
 0x385   :  { %v12198_v50 = vpop.eup %11108  ;;  %11116 = vpow2.f32 %v3407_v37  ;;  %v3411_v62 = vmul.f32 1.442695, %v3389_v42 }
 0x386   :  { %3441 = vadd.xlane.f32.xlu0 %v3440_v30  ;;  %v3431_v28 = vsel %vm3334_vm3, %v12198_v50, 0.0 }
 0x387   :  { %11118 = vpow2.f32 %v3411_v62  ;;  %3432 = vadd.xlane.f32.xlu1 %v3431_v28 }
 0x389   :  { %v12204_v40 = vpop.eup %11110 }
 0x38a   :  { %v3437_v17 = vsel %vm3334_vm3, %v12204_v40, 0.0 }
 0x38b   :  { %v12208_v32 = vpop.eup %11112  ;;  %3438 = vadd.xlane.f32.xlu1 %v3437_v17  ;;  %v3364_v5 = vpop.xlane.xlu1 %3363 }
 0x38c   :  { %v3370_v10 = vpop.xlane.xlu0 %3369  ;;  %v3392_v63 = vsub.f32 %v12133_v44, %v3364_v5  ;;  %v3446_v4 = vsel %vm3334_vm3, %v12208_v32, 0.0 }
 0x38d   :  { %v12210_v14 = vpop.eup %11114  ;;  %v3394_v51 = vsub.f32 %v12136_v23, %v3370_v10 }
 0x38e   :  { %v3452_v29 = vsel %vm3334_vm3, %v12210_v14, 0.0  ;;  %v3417_v27 = vmul.f32 1.442695, %v3392_v63 }
 0x38f   :  { %v12218_v60 = vpop.eup %11116  ;;  %v3421_v47 = vmul.f32 1.442695, %v3394_v51  ;;  %3447 = vadd.xlane.f32.xlu1 %v3446_v4  ;;  %3453 = vadd.xlane.f32.xlu0 %v3452_v29  ;;  %v3361_v58 = vpop.xlane.xlu1 %3360 }
 0x390   :  { %v3367_v31 = vpop.xlane.xlu0 %3366  ;;  %11120 = vpow2.f32 %v3417_v27  ;;  %v3391_v44 = vsub.f32 %v12139_v1, %v3361_v58  ;;  %v3443_v53 = vsel %vm3334_vm3, %v12218_v60, 0.0 }
 0x391   :  { %v12220_v18 = vpop.eup %11118  ;;  %v3393_v23 = vsub.f32 %v12142_v13, %v3367_v31  ;;  %11122 = vpow2.f32 %v3421_v47 }
 0x392   :  { %v3449_v54 = vsel %vm3334_vm3, %v12220_v18, 0.0  ;;  %v3415_v20 = vmul.f32 1.442695, %v3391_v44 }
 0x393   :  { %v3419_v6 = vmul.f32 1.442695, %v3393_v23  ;;  %3444 = vadd.xlane.f32.xlu1 %v3443_v53  ;;  %3450 = vadd.xlane.f32.xlu0 %v3449_v54  ;;  %v3376_v33 = vpop.xlane.xlu1 %3375  ;;  %v13697_v54 = vld [vmem:[#allocation10_spill] sm:$0xff] }
 0x394   :  { %v3396_v45 = vsub.f32 %v12153_v16, %v3376_v33  ;;  %v3382_v37 = vpop.xlane.xlu0 %3381 }
 0x395   :  { %11124 = vpow2.f32 %v3419_v6  ;;  %v3398_v1 = vsub.f32 %v12156_v52, %v3382_v37 }
 0x396   :  { %11126 = vpow2.f32 %v3415_v20  ;;  %v3425_v13 = vmul.f32 1.442695, %v3396_v45  ;;  %v13698_v20 = vld [vmem:[#allocation11_spill] sm:$0xff] }
 0x397   :  { %v3373_v55 = vpop.xlane.xlu1 %3372  ;;  %v3429_v42 = vmul.f32 1.442695, %v3398_v1 }
 0x398   :  { %11128 = vpow2.f32 %v3425_v13  ;;  %v3395_v62 = vsub.f32 %v12159_v46, %v3373_v55  ;;  %v3379_v30 = vpop.xlane.xlu0 %3378 }
 0x399   :  { %v3397_v28 = vsub.f32 %v12162_v39, %v3379_v30  ;;  %11130 = vpow2.f32 %v3429_v42 }
 0x39a   :  { %v12232_v17 = vpop.eup %11120  ;;  %v3423_v5 = vmul.f32 1.442695, %v3395_v62 }
 0x39b   :  { %v3427_v10 = vmul.f32 1.442695, %v3397_v28  ;;  %v3458_v16 = vsel %vm3334_vm3, %v12232_v17, 0.0  ;;  %v12236_v63 = vpop.eup %11122  ;;  %v12270_v45 = vpop.permute.xlu1 %2068 }
 0x39c   :  { %11132 = vpow2.f32 %v3423_v5  ;;  %3459 = vadd.xlane.f32.xlu0 %v3458_v16  ;;  %v3464_v46 = vsel %vm3334_vm3, %v12236_v63, 0.0  ;;  %v12268_v6 = vpop.permute.xlu0 %2066 }
 0x39d   :  { %11134 = vpow2.f32 %v3427_v10 }
 0x39f   :  { %v12238_v52 = vpop.eup %11124 }
 0x3a0   :  { %v12242_v51 = vpop.eup %11126  ;;  %3465 = vadd.xlane.f32.xlu0 %v3464_v46  ;;  %v3461_v39 = vsel %vm3334_vm3, %v12238_v52, 0.0 }
 0x3a1   :  { %3462 = vadd.xlane.f32.xlu1 %v3461_v39  ;;  %v3455_v29 = vsel %vm3334_vm3, %v12242_v51, 0.0 }
 0x3a2   :  { %v12246_v4 = vpop.eup %11128 }
 0x3a3   :  { %v12250_v27 = vpop.eup %11130  ;;  %v3470_v47 = vsel %vm3334_vm3, %v12246_v4, 0.0 }
 0x3a4   :  { %3456 = vadd.xlane.f32.xlu0 %v3455_v29  ;;  %v3476_v31 = vsel %vm3334_vm3, %v12250_v27, 0.0 }
 0x3a5   :  { %3471 = vadd.xlane.f32.xlu1 %v3470_v47 }
 0x3a6   :  { %v12254_v58 = vpop.eup %11132 }
 0x3a7   :  { %v12258_v44 = vpop.eup %11134  ;;  %v3467_v23 = vsel %vm3334_vm3, %v12254_v58, 0.0 }
 0x3a8   :  { %3477 = vadd.xlane.f32.xlu0 %v3476_v31  ;;  %v3473_v53 = vsel %vm3334_vm3, %v12258_v44, 0.0 }
 0x3a9   :  { %3468 = vadd.xlane.f32.xlu1 %v3467_v23 }
 0x3ac   :  { %3474 = vadd.xlane.f32.xlu0 %v3473_v53 }
 0x3ba   :  { %2076 = vrot.lane.b32.xlu1 %v13697_v54, %s11306_s1 }
 0x3c2   :  { %2074 = vrot.lane.b32.xlu0 %v13698_v20, %s11306_s1 }
 0x40f   :  { %v3436_v33 = vpop.xlane.xlu0 %3435 }
 0x410   :  { %11136 = vrcp.f32 %v3436_v33 }
 0x413   :  { %v3442_v37 = vpop.xlane.xlu0 %3441 }
 0x414   :  { %v3433_v1 = vpop.xlane.xlu1 %3432  ;;  %11138 = vrcp.f32 %v3442_v37 }
 0x415   :  { %11140 = vrcp.f32 %v3433_v1 }
 0x418   :  { %v3439_v13 = vpop.xlane.xlu1 %3438 }
 0x419   :  { %11142 = vrcp.f32 %v3439_v13 }
 0x41a   :  { %v11137_v55 = vpop.eup %11136 }
 0x41b   :  { %v3496_v42 = vmul.f32 %v11137_v55, %v3436_v33 }
 0x41c   :  { %v3448_v62 = vpop.xlane.xlu1 %3447  ;;  %v3454_v30 = vpop.xlane.xlu0 %3453 }
 0x41d   :  { %11144 = vrcp.f32 %v3448_v62  ;;  %v3512_v10 = vsub.f32 2.0, %v3496_v42 }
 0x41e   :  { %v11139_v28 = vpop.eup %11138  ;;  %11146 = vrcp.f32 %v3454_v30 }
 0x41f   :  { %v11141_v5 = vpop.eup %11140  ;;  %v3498_v16 = vmul.f32 %v11139_v28, %v3442_v37  ;;  %v3528_v23 = vmul.f32 %v11137_v55, %v3512_v10 }
 0x420   :  { %v3495_v46 = vmul.f32 %v11141_v5, %v3433_v1  ;;  %v3445_v39 = vpop.xlane.xlu1 %3444  ;;  %v3451_v29 = vpop.xlane.xlu0 %3450 }
 0x421   :  { %11148 = vrcp.f32 %v3445_v39  ;;  %v3514_v53 = vsub.f32 2.0, %v3498_v16  ;;  %v3544_v38 = vmul.f32 %v12190_v61, %v3528_v23 }
 0x422   :  { %v3511_v47 = vsub.f32 2.0, %v3495_v46  ;;  %11150 = vrcp.f32 %v3451_v29 }
 0x423   :  { %v11143_v31 = vpop.eup %11142  ;;  %v3530_v25 = vmul.f32 %v11139_v28, %v3514_v53 }
 0x424   :  { %v3527_v54 = vmul.f32 %v11141_v5, %v3511_v47  ;;  %v3497_v20 = vmul.f32 %v11143_v31, %v3439_v13 }
 0x426   :  { %v3513_v33 = vsub.f32 2.0, %v3497_v20  ;;  %v3543_v43 = vmul.f32 %v12198_v50, %v3527_v54  ;;  %v3546_v50 = vmul.f32 %v12195_v7, %v3530_v25 }
 0x427   :  { %v11145_v48 = vpop.eup %11144 }
 0x428   :  { %v11147_v42 = vpop.eup %11146  ;;  %v3529_v37 = vmul.f32 %v11143_v31, %v3513_v33  ;;  %v3500_v1 = vmul.f32 %v11145_v48, %v3448_v62  ;;  %10526 = vmatprep.mubr.msk.f32.mxu1 %vm3334_vm3, %v3543_v43 }
 0x429   :  { %v3502_v59 = vmul.f32 %v11147_v42, %v3454_v30  ;;  %10527 = vmatmul.mubr.msk.f32.vlgmr.msra.gmra.mrb[18].mxu1 %vm3334_vm3, %v3544_v38  ;;  %v12276_v46 = vpop.xlane.xlu0 %3459 }
 0x42a   :  { %10915 = vmatpush3.bf16.msra.mxu1 %v12088_v56  ;;  %v3545_v13 = vmul.f32 %v12204_v40, %v3529_v37  ;;  %v3516_v5 = vsub.f32 2.0, %v3500_v1 }
 0x42b   :  { %v11149_v55 = vpop.eup %11148  ;;  %10921 = vmatprep.subr.bf16.mxu1 %v12080_v22  ;;  %v3518_v28 = vsub.f32 2.0, %v3502_v59 }
 0x42c   :  { %v11151_v61 = vpop.eup %11150  ;;  %v3499_v62 = vmul.f32 %v11149_v55, %v3445_v39  ;;  %10533 = vmatprep.mubr.msk.f32.mxu1 %vm3334_vm3, %v3545_v13  ;;  %v3532_v56 = vmul.f32 %v11145_v48, %v3516_v5 }
 0x42d   :  { %v3501_v43 = vmul.f32 %v11151_v61, %v3451_v29  ;;  %10534 = vmatmul.mubr.msk.f32.vlgmr.msra.gmra.mrb[20].mxu1 %vm3334_vm3, %v3546_v50  ;;  %v12284_v30 = vpop.xlane.xlu0 %3465  ;;  %v3534_v25 = vmul.f32 %v11147_v42, %v3518_v28 }
 0x42e   :  { %v3515_v38 = vsub.f32 2.0, %v3499_v62  ;;  %10923 = vmatpush3.bf16.msra.mxu1 %v12080_v22  ;;  %v3463_v10 = vpop.xlane.xlu1 %3462  ;;  %v3548_v39 = vmul.f32 %v12208_v32, %v3532_v56 }
 0x42f   :  { %v3517_v40 = vsub.f32 2.0, %v3501_v43  ;;  %11152 = vrcp.f32 %v3463_v10  ;;  %v3550_v23 = vmul.f32 %v12210_v14, %v3534_v25  ;;  %v2299_v14 = vcombine.high %v12182_v15, %v12270_v45 }
 0x430   :  { %v3531_v7 = vmul.f32 %v11149_v55, %v3515_v38 }
 0x431   :  { %v3533_v16 = vmul.f32 %v11151_v61, %v3517_v40  ;;  %v3457_v47 = vpop.xlane.xlu0 %3456 }
 0x432   :  { %v3547_v59 = vmul.f32 %v12218_v60, %v3531_v7  ;;  %v12289_v29 = vpop.xlane.xlu1 %3471  ;;  %11154 = vrcp.f32 %v3457_v47  ;;  %v2298_v60 = vcombine.low %v12182_v15, %v12270_v45  ;;  %v2313_v15 = vrot.slane %v2299_v14, %v11606_v19 }
 0x433   :  { %v3549_v31 = vmul.f32 %v12220_v18, %v3533_v16  ;;  %11156 = vrcp.f32 %v12276_v46  ;;  %v2230_v45 = vcombine.low %v12176_v41, %v12268_v6 }
 0x434   :  { %10540 = vmatprep.mubr.msk.f32.mxu0 %vm3334_vm3, %v3547_v59  ;;  %11158 = vrcp.f32 %v12284_v30  ;;  %v2306_v37 = vrot.slane %v2298_v60, %v11606_v19 }
 0x435   :  { %10547 = vmatprep.mubr.msk.f32.mxu1 %vm3334_vm3, %v3549_v31  ;;  %10541 = vmatmul.mubr.msk.f32.vlgmr.msra.gmra.mrb[18].mxu0 %vm3334_vm3, %v3548_v39  ;;  %v12296_v22 = vpop.xlane.xlu0 %3477 }
 0x436   :  { %10548 = vmatmul.mubr.msk.f32.vlgmr.msra.gmra.mrb[22].mxu1 %vm3334_vm3, %v3550_v23  ;;  %v12300_v48 = vpop.xlane.xlu1 %3468 }
 0x437   :  { %11160 = vrcp.f32 %v12300_v48 }
 0x439   :  { %v11153_v32 = vpop.eup %11152  ;;  %v12304_v18 = vpop.xlane.xlu0 %3474 }
 0x43a   :  { %v3505_v53 = vmul.f32 %v11153_v32, %v3463_v10  ;;  %v2077_v54 = vpop.permute.xlu1 %2076  ;;  %11162 = vrcp.f32 %v12304_v18 }
 0x43b   :  { %v2314_v20 = vcombine.low %v12178_v49, %v2077_v54  ;;  %v2315_v33 = vcombine.high %v12178_v49, %v2077_v54  ;;  %v2231_v49 = vcombine.high %v12176_v41, %v12268_v6  ;;  %11164 = vrcp.f32 %v12289_v29 }
 0x43c   :  { %v11155_v42 = vpop.eup %11154  ;;  %v3521_v5 = vsub.f32 2.0, %v3505_v53  ;;  %11166 = vrcp.f32 %v12296_v22 }
 0x43d   :  { %v3503_v1 = vmul.f32 %v11155_v42, %v3457_v47  ;;  %v2322_v13 = vrot.slane %v2314_v20, %v11606_v19  ;;  %v2329_v55 = vrot.slane %v2315_v33, %v11606_v19  ;;  %v2075_v50 = vpop.permute.xlu0 %2074  ;;  %v12322_v38 = vpop.eup %11156  ;;  %v2238_v47 = vrot.slane %v2230_v45, %v11606_v19 }
 0x43e   :  { %v2246_v61 = vcombine.low %v12180_v2, %v2075_v50  ;;  %v2247_v43 = vcombine.high %v12180_v2, %v2075_v50  ;;  %v3537_v41 = vmul.f32 %v11153_v32, %v3521_v5  ;;  %v12335_v59 = vmul.f32 %v12322_v38, %v12276_v46  ;;  %v12338_v31 = vpop.eup %11158 }
 0x43f   :  { %v2330_v28 = vcombine.low %v2306_v37, %v2322_v13  ;;  %v2331_v62 = vcombine.high %v2306_v37, %v2322_v13  ;;  %v3519_v56 = vsub.f32 2.0, %v3503_v1  ;;  %v2346_v40 = vcombine.low %v2313_v15, %v2329_v55 }
 0x440   :  { %v2347_v10 = vcombine.high %v2313_v15, %v2329_v55  ;;  %v2254_v16 = vrot.slane %v2246_v61, %v11606_v19  ;;  %v2261_v39 = vrot.slane %v2247_v43, %v11606_v19  ;;  %v2245_v23 = vrot.slane %v2231_v49, %v11606_v19 }
 0x441   :  { %v2338_v25 = vrot.slane %v2330_v28, %v11618_v26  ;;  %v2345_v7 = vrot.slane %v2331_v62, %v11618_v26  ;;  %v2354_v2 = vrot.slane %v2346_v40, %v11618_v26  ;;  %v3535_v60 = vmul.f32 %v11155_v42, %v3519_v56  ;;  %v12341_v33 = vpop.eup %11160 }
 0x442   :  { %v2361_v6 = vrot.slane %v2347_v10, %v11618_v26  ;;  %v2262_v54 = vcombine.low %v2238_v47, %v2254_v16  ;;  %v2263_v20 = vcombine.high %v2238_v47, %v2254_v16  ;;  %v2278_v1 = vcombine.low %v2245_v23, %v2261_v39 }
 0x443   :  { %v2570_v32 = vcombine.low %v2338_v25, %v2345_v7  ;;  %v9961_v14 = vcombine.high %v2338_v25, %v2345_v7  ;;  %v2279_v13 = vcombine.high %v2245_v23, %v2261_v39  ;;  %v3553_v46 = vmul.f32 %v12238_v52, %v3537_v41 }
 0x444   :  { %v2586_v53 = vcombine.low %v2354_v2, %v2361_v6  ;;  %v9962_v37 = vcombine.high %v2354_v2, %v2361_v6  ;;  %v3520_v55 = vsub.f32 2.0, %v12335_v59  ;;  %v3506_v50 = vmul.f32 %v12338_v31, %v12284_v30  ;;  %v11163_v43 = vpop.eup %11162 }
 0x445   :  { %v2270_v15 = vrot.slane %v2262_v54, %v11618_v26  ;;  %v2277_v42 = vrot.slane %v2263_v20, %v11618_v26  ;;  %v2286_v45 = vrot.slane %v2278_v1, %v11618_v26  ;;  %v2293_v5 = vrot.slane %v2279_v13, %v11618_v26  ;;  %10561 = vmatprep.mubr.msk.f32.mxu1 %vm3334_vm3, %v3553_v46  ;;  %v11165_v7 = vpop.eup %11164 }
 0x446   :  { %v3551_v61 = vmul.f32 %v12242_v51, %v3535_v60  ;;  %v2577_v49 = vrot.slane %v2570_v32, %v11606_v19  ;;  %v3507_v52 = vmul.f32 %v12341_v33, %v12300_v48  ;;  %v2585_v30 = vrot.slane %v9961_v14, %v11606_v19  ;;  %v11167_v2 = vpop.eup %11166 }
 0x447   :  { %v2502_v28 = vcombine.low %v2270_v15, %v2277_v42  ;;  %v9959_v62 = vcombine.high %v2270_v15, %v2277_v42  ;;  %v2518_v56 = vcombine.low %v2286_v45, %v2293_v5  ;;  %v9960_v40 = vcombine.high %v2286_v45, %v2293_v5 }
 0x448   :  { %10554 = vmatprep.mubr.msk.f32.mxu0 %vm3334_vm3, %v3551_v61  ;;  %v2593_v10 = vrot.slane %v2586_v53, %v11606_v19  ;;  %v2601_v25 = vrot.slane %v9962_v37, %v11606_v19  ;;  %v2602_v41 = vcombine.low %v2577_v49, %v2585_v30  ;;  %v2603_v48 = vcombine.high %v2577_v49, %v2585_v30 }
 0x449   :  { %v2509_v51 = vrot.slane %v2502_v28, %v11606_v19  ;;  %v2517_v16 = vrot.slane %v9959_v62, %v11606_v19  ;;  %v2525_v6 = vrot.slane %v2518_v56, %v11606_v19  ;;  %v2533_v47 = vrot.slane %v9960_v40, %v11606_v19 }
 0x44a   :  { %v2618_v59 = vcombine.low %v2593_v10, %v2601_v25  ;;  %v2619_v39 = vcombine.high %v2593_v10, %v2601_v25  ;;  %v3509_v23 = vmul.f32 %v11163_v43, %v12304_v18  ;;  %v2610_v32 = vrot.slane %v2602_v41, %v11618_v26 }
 0x44b   :  { %v2534_v60 = vcombine.low %v2509_v51, %v2517_v16  ;;  %v2535_v14 = vcombine.high %v2509_v51, %v2517_v16  ;;  %v3522_v53 = vsub.f32 2.0, %v3506_v50  ;;  %v2550_v54 = vcombine.low %v2525_v6, %v2533_v47 }
 0x44c   :  { %v2626_v20 = vrot.slane %v2618_v59, %v11618_v26  ;;  %v2551_v37 = vcombine.high %v2525_v6, %v2533_v47  ;;  %v3508_v1 = vmul.f32 %v11165_v7, %v12289_v29  ;;  %v3510_v13 = vmul.f32 %v11167_v2, %v12296_v22 }
 0x44d   :  { %v2542_v46 = vrot.slane %v2534_v60, %v11618_v26  ;;  %v2549_v15 = vrot.slane %v2535_v14, %v11618_v26  ;;  %v2558_v42 = vrot.slane %v2550_v54, %v11618_v26  ;;  %v2617_v45 = vrot.slane %v2603_v48, %v11618_v26 }
 0x44e   :  { %v2565_v18 = vrot.slane %v2551_v37, %v11618_v26  ;;  %v2633_v50 = vrot.slane %v2619_v39, %v11618_v26  ;;  %v3523_v5 = vsub.f32 2.0, %v3507_v52  ;;  %v3525_v61 = vsub.f32 2.0, %v3509_v23 }
 0x44f   :  { %v2634_v49 = vcombine.low %v2610_v32, %v2626_v20  ;;  %v2635_v28 = vcombine.high %v2610_v32, %v2626_v20  ;;  %v2566_v62 = vcombine.low %v2542_v46, %v2558_v42  ;;  %v2567_v29 = vcombine.high %v2542_v46, %v2558_v42 }
 0x450   :  { %v2568_v30 = vcombine.low %v2549_v15, %v2565_v18  ;;  %v2569_v22 = vcombine.high %v2549_v15, %v2565_v18  ;;  %v3536_v56 = vmul.f32 %v12322_v38, %v3520_v55  ;;  %v3538_v40 = vmul.f32 %v12338_v31, %v3522_v53 }
 0x451   :  { %v3524_v10 = vsub.f32 2.0, %v3508_v1  ;;  %v10924_v25 = vpack.c.bf16 %v2634_v49, %v2566_v62  ;;  %v10928_v51 = vpack.c.bf16 %v2635_v28, %v2567_v29  ;;  %v2636_v16 = vcombine.low %v2617_v45, %v2633_v50 }
 0x452   :  { %v2637_v41 = vcombine.high %v2617_v45, %v2633_v50  ;;  %v3539_v48 = vmul.f32 %v12341_v33, %v3523_v5  ;;  %v3526_v6 = vsub.f32 2.0, %v3510_v13  ;;  %v3541_v52 = vmul.f32 %v11163_v43, %v3525_v61 }
 0x453   :  { %10925 = vmatprep.subr.bf16.mxu0 %v10924_v25  ;;  %10929 = vmatprep.subr.bf16.mxu1 %v10928_v51  ;;  %v10932_v47 = vpack.c.bf16 %v2636_v16, %v2568_v30  ;;  %v3552_v39 = vmul.f32 %v12232_v17, %v3536_v56  ;;  %v3554_v38 = vmul.f32 %v12236_v63, %v3538_v40 }
 0x454   :  { %v10936_v59 = vpack.c.bf16 %v2637_v41, %v2569_v22  ;;  %10927 = vmatpush3.bf16.msra.mxu0 %v10924_v25  ;;  %10931 = vmatpush3.bf16.msra.mxu1 %v10928_v51  ;;  %v3540_v31 = vmul.f32 %v11165_v7, %v3524_v10  ;;  %v3542_v55 = vmul.f32 %v11167_v2, %v3526_v6 }
 0x455   :  { %10933 = vmatprep.subr.bf16.mxu0 %v10932_v47  ;;  %v3555_v23 = vmul.f32 %v12254_v58, %v3539_v48  ;;  %v3557_v33 = vmul.f32 %v12258_v44, %v3541_v52 }
 0x456   :  { %10937 = vmatprep.subr.bf16.mxu1 %v10936_v59  ;;  %v3556_v43 = vmul.f32 %v12246_v4, %v3540_v31  ;;  %v3558_v17 = vmul.f32 %v12250_v27, %v3542_v55 }
 0x457   :  { %10555 = vmatmul.mubr.msk.f32.vlgmr.msra.gmra.mrb[20].mxu0 %vm3334_vm3, %v3552_v39  ;;  %10562 = vmatmul.mubr.msk.f32.vlgmr.msra.gmra.mrb[24].mxu1 %vm3334_vm3, %v3554_v38 }
 0x458   :  { %10935 = vmatpush3.bf16.msra.mxu0 %v10932_v47  ;;  %10568 = vmatprep.mubr.msk.f32.mxu0 %vm3334_vm3, %v3555_v23 }
 0x459   :  { %10939 = vmatpush3.bf16.msra.mxu1 %v10936_v59  ;;  %10575 = vmatprep.mubr.msk.f32.mxu1 %vm3334_vm3, %v3557_v33 }
 0x45b   :  { %10569 = vmatmul.mubr.msk.f32.vlgmr.msra.gmra.mrb[22].mxu0 %vm3334_vm3, %v3556_v43 }
 0x45c   :  { %10576 = vmatmul.mubr.msk.f32.vlgmr.msra.gmra.mrb[26].mxu1 %vm3334_vm3, %v3558_v17 }
 0x4fc   :  { %v10528_v63 = vpop.f32.mrb[18].mxu1 }
 0x4fd   :  { %v3631_v58 = vpop.f32.mrb[19].mxu1 }
 0x500   :  { %v10535_v7 = vpop.f32.mrb[20].mxu1 }
 0x501   :  { %v3712_v2 = vpop.f32.mrb[21].mxu1 }
 0x508   :  { %v10542_v60 = vpop.f32.mrb[18].mxu0 }
 0x509   :  { %v4275_v44 = vcombine.low %v10528_v63, %v10542_v60  ;;  %v4276_v32 = vcombine.high %v10528_v63, %v10542_v60  ;;  %v10549_v14 = vpop.f32.mrb[22].mxu1  ;;  %v3793_v53 = vpop.f32.mrb[19].mxu0 }
 0x50a   :  { %v4291_v54 = vcombine.low %v10535_v7, %v10549_v14  ;;  %v4292_v4 = vcombine.high %v10535_v7, %v10549_v14  ;;  %v4207_v20 = vcombine.low %v3631_v58, %v3793_v53  ;;  %v4208_v37 = vcombine.high %v3631_v58, %v3793_v53  ;;  %v3874_v1 = vpop.f32.mrb[23].mxu1 }
 0x50b   :  { %v4283_v27 = vrot.slane %v4275_v44, %v11606_v19  ;;  %v4290_v13 = vrot.slane %v4276_v32, %v11606_v19  ;;  %v4223_v46 = vcombine.low %v3712_v2, %v3874_v1  ;;  %v4224_v15 = vcombine.high %v3712_v2, %v3874_v1 }
 0x50c   :  { %v4299_v42 = vrot.slane %v4291_v54, %v11606_v19  ;;  %v4306_v18 = vrot.slane %v4292_v4, %v11606_v19  ;;  %v4215_v45 = vrot.slane %v4207_v20, %v11606_v19  ;;  %v4222_v50 = vrot.slane %v4208_v37, %v11606_v19 }
 0x50d   :  { %v4231_v5 = vrot.slane %v4223_v46, %v11606_v19  ;;  %v4238_v61 = vrot.slane %v4224_v15, %v11606_v19 }
 0x50e   :  { %v4307_v49 = vcombine.low %v4283_v27, %v4299_v42  ;;  %v4308_v28 = vcombine.high %v4283_v27, %v4299_v42  ;;  %v4323_v62 = vcombine.low %v4290_v13, %v4306_v18  ;;  %v4324_v29 = vcombine.high %v4290_v13, %v4306_v18  ;;  %v4812_v42 = vld [vmem:[%s13650_s4] sm:$0xff] }
 0x50f   :  { %v4239_v30 = vcombine.low %v4215_v45, %v4231_v5  ;;  %v4240_v22 = vcombine.high %v4215_v45, %v4231_v5  ;;  %v4255_v56 = vcombine.low %v4222_v50, %v4238_v61  ;;  %v4256_v40 = vcombine.high %v4222_v50, %v4238_v61  ;;  %v4813_v61 = vld [vmem:[%s13650_s4 + $0x8] sm:$0xff] }
 0x510   :  { %v4315_v10 = vrot.slane %v4307_v49, %v11618_v26  ;;  %v4322_v25 = vrot.slane %v4308_v28, %v11618_v26  ;;  %v4331_v51 = vrot.slane %v4323_v62, %v11618_v26  ;;  %v4338_v16 = vrot.slane %v4324_v29, %v11618_v26  ;;  %v4814_v49 = vld [vmem:[%s13650_s4 + $0x10] sm:$0xff]  ;;  %v4815_v28 = vld [vmem:[%s13650_s4 + $0x18] sm:$0xff] }
 0x511   :  { %v4247_v41 = vrot.slane %v4239_v30, %v11618_v26  ;;  %v4254_v48 = vrot.slane %v4240_v22, %v11618_v26  ;;  %v4263_v6 = vrot.slane %v4255_v56, %v11618_v26  ;;  %v4270_v52 = vrot.slane %v4256_v40, %v11618_v26 }
 0x512   :  { %v4547_v47 = vcombine.low %v4315_v10, %v4322_v25  ;;  %v10013_v59 = vcombine.high %v4315_v10, %v4322_v25  ;;  %v4563_v39 = vcombine.low %v4331_v51, %v4338_v16  ;;  %v10014_v38 = vcombine.high %v4331_v51, %v4338_v16 }
 0x513   :  { %v4479_v31 = vcombine.low %v4247_v41, %v4254_v48  ;;  %v10011_v55 = vcombine.high %v4247_v41, %v4254_v48  ;;  %v4495_v23 = vcombine.low %v4263_v6, %v4270_v52  ;;  %v10012_v33 = vcombine.high %v4263_v6, %v4270_v52 }
 0x514   :  { %v4554_v43 = vrot.slane %v4547_v47, %v11606_v19  ;;  %v4562_v17 = vrot.slane %v10013_v59, %v11606_v19  ;;  %v4570_v63 = vrot.slane %v4563_v39, %v11606_v19  ;;  %v4578_v58 = vrot.slane %v10014_v38, %v11606_v19 }
 0x515   :  { %v4486_v7 = vrot.slane %v4479_v31, %v11606_v19  ;;  %v4494_v2 = vrot.slane %v10011_v55, %v11606_v19  ;;  %v4502_v60 = vrot.slane %v4495_v23, %v11606_v19  ;;  %v4510_v44 = vrot.slane %v10012_v33, %v11606_v19 }
 0x516   :  { %v4579_v32 = vcombine.low %v4554_v43, %v4562_v17  ;;  %v4595_v14 = vcombine.low %v4570_v63, %v4578_v58  ;;  %v4580_v53 = vcombine.high %v4554_v43, %v4562_v17  ;;  %v4596_v54 = vcombine.high %v4570_v63, %v4578_v58 }
 0x517   :  { %v4511_v4 = vcombine.low %v4486_v7, %v4494_v2  ;;  %v4527_v20 = vcombine.low %v4502_v60, %v4510_v44  ;;  %v4512_v37 = vcombine.high %v4486_v7, %v4494_v2  ;;  %v4528_v1 = vcombine.high %v4502_v60, %v4510_v44 }
 0x518   :  { %v12415_v27 = vrot.slane %v4579_v32, %v11618_v26  ;;  %v12418_v13 = vrot.slane %v4595_v14, %v11618_v26  ;;  %v4594_v46 = vrot.slane %v4580_v53, %v11618_v26  ;;  %v4610_v15 = vrot.slane %v4596_v54, %v11618_v26 }
 0x519   :  { %v12426_v18 = vrot.slane %v4511_v4, %v11618_v26  ;;  %v12429_v45 = vrot.slane %v4527_v20, %v11618_v26  ;;  %v4526_v50 = vrot.slane %v4512_v37, %v11618_v26  ;;  %v4542_v5 = vrot.slane %v4528_v1, %v11618_v26 }
 0x51a   :  { %v4612_v62 = vcombine.high %v12415_v27, %v12418_v13  ;;  %v4613_v29 = vcombine.low %v4594_v46, %v4610_v15  ;;  %v4614_v30 = vcombine.high %v4594_v46, %v4610_v15  ;;  %v4611_v22 = vcombine.low %v12415_v27, %v12418_v13 }
 0x51b   :  { %v4544_v56 = vcombine.high %v12426_v18, %v12429_v45  ;;  %v4545_v40 = vcombine.low %v4526_v50, %v4542_v5  ;;  %v4546_v10 = vcombine.high %v4526_v50, %v4542_v5  ;;  %v4543_v25 = vcombine.low %v12426_v18, %v12429_v45 }
 0x51c   :  { %4757 = vrot.lane.b32.xlu1 %v4612_v62, %s11307_s12  ;;  %v10940_v51 = vpack.c.bf16 %v4813_v61, %v4812_v42  ;;  %v10944_v16 = vpack.c.bf16 %v4815_v28, %v4814_v49 }
 0x51d   :  { %4755 = vrot.lane.b32.xlu0 %v4544_v56, %s11307_s12 }
 0x51e   :  { %10941 = vmatprep.subr.bf16.mxu0 %v10940_v51 }
 0x51f   :  { %10943 = vmatpush3.bf16.msra.mxu0 %v10940_v51 }
 0x520   :  { %4773 = vrot.lane.b32.xlu1 %v4613_v29, %s11308_s13  ;;  %10945 = vmatprep.subr.bf16.mxu0 %v10944_v16 }
 0x521   :  { %4771 = vrot.lane.b32.xlu0 %v4545_v40, %s11308_s13 }
 0x523   :  { %10947 = vmatpush3.bf16.msra.mxu0 %v10944_v16 }
 0x524   :  { %4789 = vrot.lane.b32.xlu1 %v4614_v30, %s11309_s14 }
 0x525   :  { %4787 = vrot.lane.b32.xlu0 %v4546_v10, %s11309_s14 }
 0x52a   :  { %v10556_v41 = vpop.f32.mrb[20].mxu0  ;;  %v10563_v48 = vpop.f32.mrb[24].mxu1 }
 0x52b   :  { %v3955_v6 = vpop.f32.mrb[21].mxu0  ;;  %v4036_v52 = vpop.f32.mrb[25].mxu1 }
 0x52e   :  { %v10570_v47 = vpop.f32.mrb[22].mxu0 }
 0x52f   :  { %v4411_v59 = vcombine.low %v10556_v41, %v10570_v47  ;;  %v4412_v39 = vcombine.high %v10556_v41, %v10570_v47  ;;  %v10577_v38 = vpop.f32.mrb[26].mxu1  ;;  %v4117_v31 = vpop.f32.mrb[23].mxu0 }
 0x530   :  { %v4427_v55 = vcombine.low %v10563_v48, %v10577_v38  ;;  %v4428_v23 = vcombine.high %v10563_v48, %v10577_v38  ;;  %v4343_v33 = vcombine.low %v3955_v6, %v4117_v31  ;;  %v4344_v43 = vcombine.high %v3955_v6, %v4117_v31  ;;  %v4198_v17 = vpop.f32.mrb[27].mxu1 }
 0x531   :  { %v4419_v63 = vrot.slane %v4411_v59, %v11606_v19  ;;  %v4426_v58 = vrot.slane %v4412_v39, %v11606_v19  ;;  %v4359_v7 = vcombine.low %v4036_v52, %v4198_v17  ;;  %v4360_v2 = vcombine.high %v4036_v52, %v4198_v17 }
 0x532   :  { %v4435_v60 = vrot.slane %v4427_v55, %v11606_v19  ;;  %v4442_v44 = vrot.slane %v4428_v23, %v11606_v19  ;;  %v4351_v32 = vrot.slane %v4343_v33, %v11606_v19  ;;  %v4358_v14 = vrot.slane %v4344_v43, %v11606_v19 }
 0x533   :  { %v4367_v53 = vrot.slane %v4359_v7, %v11606_v19  ;;  %v4374_v54 = vrot.slane %v4360_v2, %v11606_v19 }
 0x534   :  { %v4443_v4 = vcombine.low %v4419_v63, %v4435_v60  ;;  %v4444_v20 = vcombine.high %v4419_v63, %v4435_v60  ;;  %v4459_v37 = vcombine.low %v4426_v58, %v4442_v44  ;;  %v4460_v1 = vcombine.high %v4426_v58, %v4442_v44 }
 0x535   :  { %v4375_v46 = vcombine.low %v4351_v32, %v4367_v53  ;;  %v4376_v15 = vcombine.high %v4351_v32, %v4367_v53  ;;  %v4391_v42 = vcombine.low %v4358_v14, %v4374_v54  ;;  %v4392_v50 = vcombine.high %v4358_v14, %v4374_v54 }
 0x536   :  { %v4451_v5 = vrot.slane %v4443_v4, %v11618_v26  ;;  %v4458_v61 = vrot.slane %v4444_v20, %v11618_v26  ;;  %v4467_v49 = vrot.slane %v4459_v37, %v11618_v26  ;;  %v4474_v28 = vrot.slane %v4460_v1, %v11618_v26 }
 0x537   :  { %v4383_v62 = vrot.slane %v4375_v46, %v11618_v26  ;;  %v4390_v29 = vrot.slane %v4376_v15, %v11618_v26  ;;  %v4399_v30 = vrot.slane %v4391_v42, %v11618_v26  ;;  %v4406_v56 = vrot.slane %v4392_v50, %v11618_v26 }
 0x538   :  { %v4683_v40 = vcombine.low %v4451_v5, %v4458_v61  ;;  %v10017_v10 = vcombine.high %v4451_v5, %v4458_v61  ;;  %v4699_v51 = vcombine.low %v4467_v49, %v4474_v28  ;;  %v10018_v16 = vcombine.high %v4467_v49, %v4474_v28 }
 0x539   :  { %v4615_v41 = vcombine.low %v4383_v62, %v4390_v29  ;;  %v10015_v48 = vcombine.high %v4383_v62, %v4390_v29  ;;  %v4631_v6 = vcombine.low %v4399_v30, %v4406_v56  ;;  %v10016_v52 = vcombine.high %v4399_v30, %v4406_v56 }
 0x53a   :  { %v4690_v47 = vrot.slane %v4683_v40, %v11606_v19  ;;  %v4698_v59 = vrot.slane %v10017_v10, %v11606_v19  ;;  %v4706_v39 = vrot.slane %v4699_v51, %v11606_v19  ;;  %v4714_v38 = vrot.slane %v10018_v16, %v11606_v19 }
 0x53b   :  { %v4622_v31 = vrot.slane %v4615_v41, %v11606_v19  ;;  %v4630_v55 = vrot.slane %v10015_v48, %v11606_v19  ;;  %v4638_v23 = vrot.slane %v4631_v6, %v11606_v19  ;;  %v4646_v33 = vrot.slane %v10016_v52, %v11606_v19 }
 0x53c   :  { %v4715_v43 = vcombine.low %v4690_v47, %v4698_v59  ;;  %v4731_v17 = vcombine.low %v4706_v39, %v4714_v38  ;;  %v4716_v63 = vcombine.high %v4690_v47, %v4698_v59  ;;  %v4732_v58 = vcombine.high %v4706_v39, %v4714_v38 }
 0x53d   :  { %v4647_v7 = vcombine.low %v4622_v31, %v4630_v55  ;;  %v4663_v2 = vcombine.low %v4638_v23, %v4646_v33  ;;  %v4648_v60 = vcombine.high %v4622_v31, %v4630_v55  ;;  %v4664_v44 = vcombine.high %v4638_v23, %v4646_v33  ;;  %v10019_v23 = vld [vmem:[%s13653_s7 + $0x1] ss:$0 sm:$0xff] }
 0x53e   :  { %v4723_v32 = vrot.slane %v4715_v43, %v11618_v26  ;;  %v4739_v14 = vrot.slane %v4731_v17, %v11618_v26  ;;  %v4730_v53 = vrot.slane %v4716_v63, %v11618_v26  ;;  %v4746_v54 = vrot.slane %v4732_v58, %v11618_v26  ;;  %v11272_v58 = vld [vmem:[%s13646_s0 + $0x8] sm:$0xff] }
 0x53f   :  { %v4655_v4 = vrot.slane %v4647_v7, %v11618_v26  ;;  %v4671_v20 = vrot.slane %v4663_v2, %v11618_v26  ;;  %v4662_v37 = vrot.slane %v4648_v60, %v11618_v26  ;;  %v4678_v1 = vrot.slane %v4664_v44, %v11618_v26  ;;  %v11273_v2 = vld [vmem:[%s13646_s0] sm:$0xff] }
 0x540   :  { %v4748_v46 = vcombine.high %v4723_v32, %v4739_v14  ;;  %v4749_v15 = vcombine.low %v4730_v53, %v4746_v54  ;;  %v4750_v42 = vcombine.high %v4730_v53, %v4746_v54  ;;  %v4747_v50 = vcombine.low %v4723_v32, %v4739_v14 }
 0x541   :  { %v4680_v5 = vcombine.high %v4655_v4, %v4671_v20  ;;  %v4681_v61 = vcombine.low %v4662_v37, %v4678_v1  ;;  %v4682_v49 = vcombine.high %v4662_v37, %v4678_v1  ;;  %v4679_v28 = vcombine.low %v4655_v4, %v4671_v20  ;;  %v11274_v20 = vld [vmem:[%s13646_s0 + $0x10] sm:$0xff] }
 0x542   :  { %4761 = vrot.lane.b32.xlu1 %v4748_v46, %s11307_s12  ;;  %v11275_v46 = vld [vmem:[%s13646_s0 + $0x18] sm:$0xff] }
 0x543   :  { %4759 = vrot.lane.b32.xlu0 %v4680_v5, %s11307_s12 }
 0x546   :  { %4777 = vrot.lane.b32.xlu1 %v4749_v15, %s11308_s13 }
 0x547   :  { %4775 = vrot.lane.b32.xlu0 %v4681_v61, %s11308_s13 }
 0x54a   :  { %4793 = vrot.lane.b32.xlu1 %v4750_v42, %s11309_s14 }
 0x54b   :  { %4791 = vrot.lane.b32.xlu0 %v4682_v49, %s11309_s14 }
 0x58e   :  { %v4758_v62 = vpop.permute.xlu1 %4757 }
 0x58f   :  { %v4756_v29 = vpop.permute.xlu0 %4755  ;;  %v4800_v51 = vsel %vm62_vm0, %v4611_v22, %v4758_v62 }
 0x590   :  { %v4799_v40 = vsel %vm62_vm0, %v4543_v25, %v4756_v29 }
 0x592   :  { %v4774_v30 = vpop.permute.xlu1 %4773 }
 0x593   :  { %v4772_v56 = vpop.permute.xlu0 %4771  ;;  %v4804_v48 = vsel %vm3334_vm3, %v4800_v51, %v4774_v30  ;;  %v4994_v51 = vld [vmem:[%s13651_s5 + $0x8] sm:$0xff] }
 0x594   :  { %v4803_v16 = vsel %vm3334_vm3, %v4799_v40, %v4772_v56 }
 0x596   :  { %v4790_v10 = vpop.permute.xlu1 %4789 }
 0x597   :  { %v4788_v41 = vpop.permute.xlu0 %4787  ;;  %v4809_v52 = vsel %vm4807_vm4, %v4804_v48, %v4790_v10  ;;  %v4993_v10 = vld [vmem:[%s13651_s5] sm:$0xff]  ;;  %v4996_v48 = vld [vmem:[%s13651_s5 + $0x18] sm:$0xff] }
 0x598   :  { %v4808_v6 = vsel %vm4807_vm4, %v4803_v16, %v4788_v41  ;;  %v4995_v16 = vld [vmem:[%s13651_s5 + $0x10] sm:$0xff]  ;;  %v10948_v41 = vpack.c.bf16 %v4994_v51, %v4993_v10 }
 0x599   :  { %10586 = vmatprep.mubr.msk.f32.mxu0 %vm772_vm2, %v4808_v6  ;;  %v10952_v6 = vpack.c.bf16 %v4996_v48, %v4995_v16 }
 0x59a   :  { %10587 = vmatmul.mubr.msk.f32.vlgmr.msra.gmra.mrb[24].mxu0 %vm772_vm2, %v4809_v52  ;;  %10949 = vmatprep.subr.bf16.mxu1 %v10948_v41 }
 0x59b   :  { %10951 = vmatpush3.bf16.msra.mxu1 %v10948_v41 }
 0x59c   :  { %10953 = vmatprep.subr.bf16.mxu1 %v10952_v6 }
 0x59f   :  { %10955 = vmatpush3.bf16.msra.mxu1 %v10952_v6  ;;  %v5109_v6 = vld [vmem:[%s13652_s6 + $0x30] sm:$0xff] }
 0x5b4   :  { %v4762_v18 = vpop.permute.xlu1 %4761 }
 0x5b5   :  { %v4760_v45 = vpop.permute.xlu0 %4759  ;;  %v4802_v22 = vsel %vm62_vm0, %v4747_v50, %v4762_v18 }
 0x5b6   :  { %v4801_v27 = vsel %vm62_vm0, %v4679_v28, %v4760_v45 }
 0x5b8   :  { %v4778_v25 = vpop.permute.xlu1 %4777 }
 0x5b9   :  { %v4776_v47 = vpop.permute.xlu0 %4775  ;;  %v4806_v38 = vsel %vm3334_vm3, %v4802_v22, %v4778_v25 }
 0x5ba   :  { %v4805_v59 = vsel %vm3334_vm3, %v4801_v27, %v4776_v47 }
 0x5bc   :  { %v4794_v13 = vpop.permute.xlu1 %4793 }
 0x5bd   :  { %v4792_v39 = vpop.permute.xlu0 %4791  ;;  %v4811_v55 = vsel %vm4807_vm4, %v4806_v38, %v4794_v13  ;;  %v5103_v38 = vld [vmem:[%s13652_s6] sm:$0xff] }
 0x5be   :  { %v4810_v31 = vsel %vm4807_vm4, %v4805_v59, %v4792_v39 }
 0x5bf   :  { %10589 = vmatprep.mubr.msk.f32.mxu0 %vm772_vm2, %v4810_v31  ;;  %v5104_v31 = vld [vmem:[%s13652_s6 + $0x8] sm:$0xff] }
 0x5c0   :  { %10590 = vmatmul.mubr.msk.f32.gmra.mrb[26].mxu0 %vm772_vm2, %v4811_v55  ;;  %v5105_v55 = vld [vmem:[%s13652_s6 + $0x10] sm:$0xff] }
 0x66d   :  { %v10588_v33 = vpop.f32.mrb[24].mxu0 }
 0x66e   :  { %v4905_v43 = vadd.f32 %v10588_v33, %v10019_v23  ;;  %v4899_v17 = vpop.f32.mrb[25].mxu0  ;;  %v5106_v33 = vld [vmem:[%s13652_s6 + $0x18] sm:$0xff] }
 0x66f   :  { %v4900_v63 = vadd.f32 %v10019_v23, %v4899_v17  ;;  %v5107_v17 = vld [vmem:[%s13652_s6 + $0x20] sm:$0xff] }
 0x670   :  { %v4919_v7 = vadd.f32 %v11272_v58, %v4905_v43  ;;  %v10960_v43 = vpack.c.bf16 %v5106_v33, %v5105_v55 }
 0x671   :  { %v4918_v60 = vadd.f32 %v11273_v2, %v4900_v63  ;;  %v5108_v63 = vld [vmem:[%s13652_s6 + $0x28] sm:$0xff] }
 0x672   :  { %v4927_v44 = vsel %vm772_vm2, %v4919_v7, 0.0  ;;  %v10964_v58 = vpack.c.bf16 %v5108_v63, %v5107_v17 }
 0x673   :  { %4928 = vadd.xlane.f32.xlu1 %v4927_v44  ;;  %v4924_v32 = vsel %vm772_vm2, %v4918_v60, 0.0 }
 0x674   :  { %4925 = vadd.xlane.f32.xlu0 %v4924_v32 }
 0x693   :  { %v10591_v14 = vpop.f32.mrb[26].mxu0 }
 0x694   :  { %v4909_v53 = vpop.f32.mrb[27].mxu0  ;;  %v4915_v54 = vadd.f32 %v10591_v14, %v10019_v23 }
 0x695   :  { %v4910_v4 = vadd.f32 %v10019_v23, %v4909_v53  ;;  %v10956_v23 = vpack.c.bf16 %v5104_v31, %v5103_v38 }
 0x696   :  { %v4921_v15 = vadd.f32 %v11275_v46, %v4915_v54  ;;  %v10024_v54 = vld [vmem:[%s13653_s7 + $0x4] ss:$0 sm:$0xff] }
 0x697   :  { %v4920_v37 = vadd.f32 %v11274_v20, %v4910_v4  ;;  %10957 = vmatprep.subr.bf16.mxu0 %v10956_v23 }
 0x698   :  { %v4933_v42 = vsel %vm772_vm2, %v4921_v15, 0.0  ;;  %10959 = vmatpush3.bf16.msra.mxu0 %v10956_v23 }
 0x699   :  { %v4930_v1 = vsel %vm772_vm2, %v4920_v37, 0.0  ;;  %10961 = vmatprep.subr.bf16.mxu0 %v10960_v43 }
 0x69a   :  { %4931 = vadd.xlane.f32.xlu0 %v4930_v1  ;;  %v10025_v1 = vld [vmem:[%s13653_s7 + $0x5] ss:$0 sm:$0xff] }
 0x69c   :  { %10963 = vmatpush3.bf16.msra.mxu0 %v10960_v43  ;;  %v10031_v43 = vld [vmem:[%s13653_s7 + $0x3] ss:$0 sm:$0xff] }
 0x69d   :  { %10965 = vmatprep.subr.bf16.mxu0 %v10964_v58 }
 0x69e   :  { %4934 = vadd.xlane.f32.xlu0 %v4933_v42 }
 0x6a0   :  { %10967 = vmatpush3.bf16.msra.mxu0 %v10964_v58 }
 0x700   :  { %v4929_v50 = vpop.xlane.xlu1 %4928 }
 0x701   :  { %v4938_v5 = vmul.f32 0.03125, %v4929_v50  ;;  %v4926_v61 = vpop.xlane.xlu0 %4925 }
 0x702   :  { %v4937_v49 = vmul.f32 0.03125, %v4926_v61 }
 0x703   :  { %v4942_v28 = vsub.f32 %v4919_v7, %v4938_v5 }
 0x704   :  { %v4941_v62 = vsub.f32 %v4918_v60, %v4937_v49 }
 0x705   :  { %v4946_v29 = vmul.f32 %v4942_v28, %v4942_v28 }
 0x706   :  { %v4945_v30 = vmul.f32 %v4941_v62, %v4941_v62 }
 0x707   :  { %v4952_v56 = vsel %vm772_vm2, %v4946_v29, 0.0 }
 0x708   :  { %4953 = vadd.xlane.f32.xlu0 %v4952_v56  ;;  %v4949_v40 = vsel %vm772_vm2, %v4945_v30, 0.0 }
 0x709   :  { %4950 = vadd.xlane.f32.xlu1 %v4949_v40 }
 0x727   :  { %v4932_v52 = vpop.xlane.xlu0 %4931 }
 0x728   :  { %v4939_v18 = vmul.f32 0.03125, %v4932_v52  ;;  %v5110_v52 = vld [vmem:[%s13652_s6 + $0x38] sm:$0xff] }
 0x72a   :  { %v4943_v45 = vsub.f32 %v4920_v37, %v4939_v18  ;;  %v10968_v18 = vpack.c.bf16 %v5110_v52, %v5109_v6 }
 0x72b   :  { %v4935_v25 = vpop.xlane.xlu0 %4934 }
 0x72c   :  { %v4940_v47 = vmul.f32 0.03125, %v4935_v25  ;;  %v4947_v27 = vmul.f32 %v4943_v45, %v4943_v45  ;;  %10969 = vmatprep.subr.bf16.mxu0 %v10968_v18 }
 0x72d   :  { %10971 = vmatpush3.bf16.msra.mxu0 %v10968_v18 }
 0x72e   :  { %v4944_v13 = vsub.f32 %v4921_v15, %v4940_v47  ;;  %v4955_v22 = vsel %vm772_vm2, %v4947_v27, 0.0 }
 0x72f   :  { %4956 = vadd.xlane.f32.xlu1 %v4955_v22 }
 0x730   :  { %v4948_v59 = vmul.f32 %v4944_v13, %v4944_v13 }
 0x732   :  { %v4958_v39 = vsel %vm772_vm2, %v4948_v59, 0.0 }
 0x733   :  { %4959 = vadd.xlane.f32.xlu0 %v4958_v39 }
 0x795   :  { %v4954_v7 = vpop.xlane.xlu0 %4953 }
 0x796   :  { %v4962_v2 = vmul.f32 0.03125, %v4954_v7  ;;  %v4951_v60 = vpop.xlane.xlu1 %4950 }
 0x797   :  { %v4961_v44 = vmul.f32 0.03125, %v4951_v60 }
 0x798   :  { %v4966_v32 = vadd.f32 1e-05, %v4962_v2 }
 0x799   :  { %v4965_v14 = vadd.f32 1e-05, %v4961_v44 }
 0x79a   :  { %11168 = vrsqrt.f32 %v4966_v32 }
 0x79b   :  { %11170 = vrsqrt.f32 %v4965_v14 }
 0x7a4   :  { %v11169_v53 = vpop.eup %11168 }
 0x7a5   :  { %v11171_v4 = vpop.eup %11170  ;;  %v4974_v20 = vmul.f32 %v11169_v53, %v4942_v28 }
 0x7a6   :  { %v4973_v37 = vmul.f32 %v11171_v4, %v4941_v62 }
 0x7a7   :  { %v4982_v46 = vmul.f32 %v10024_v54, %v4974_v20 }
 0x7a8   :  { %v4981_v15 = vmul.f32 %v10024_v54, %v4973_v37 }
 0x7a9   :  { %v4990_v50 = vadd.f32 %v10025_v1, %v4982_v46 }
 0x7aa   :  { %v4989_v42 = vadd.f32 %v10025_v1, %v4981_v15 }
 0x7ac   :  { %10600 = vmatprep.mubr.msk.f32.mxu1 %vm772_vm2, %v4989_v42 }
 0x7ad   :  { %10601 = vmatmul.mubr.msk.f32.vlgmr.msra.gmra.mrb[28].mxu1 %vm772_vm2, %v4990_v50 }
 0x7bc   :  { %v4957_v5 = vpop.xlane.xlu1 %4956 }
 0x7bd   :  { %v4963_v61 = vmul.f32 0.03125, %v4957_v5 }
 0x7bf   :  { %v4967_v49 = vadd.f32 1e-05, %v4963_v61 }
 0x7c0   :  { %v4960_v29 = vpop.xlane.xlu0 %4959 }
 0x7c1   :  { %11172 = vrsqrt.f32 %v4967_v49  ;;  %v4964_v30 = vmul.f32 0.03125, %v4960_v29 }
 0x7c3   :  { %v4968_v28 = vadd.f32 1e-05, %v4964_v30 }
 0x7c5   :  { %11174 = vrsqrt.f32 %v4968_v28 }
 0x7cb   :  { %v11173_v62 = vpop.eup %11172 }
 0x7cc   :  { %v4975_v56 = vmul.f32 %v11173_v62, %v4943_v45  ;;  %v10026_v45 = vld [vmem:[%s13653_s7 + $0x2] ss:$0 sm:$0xff] }
 0x7ce   :  { %v4983_v40 = vmul.f32 %v10024_v54, %v4975_v56  ;;  %v10038_v56 = vld [vmem:[%s13649_s3 + $0x20] sm:$0xff] }
 0x7cf   :  { %v11175_v10 = vpop.eup %11174 }
 0x7d0   :  { %v4991_v51 = vadd.f32 %v10025_v1, %v4983_v40  ;;  %v4976_v16 = vmul.f32 %v11175_v10, %v4944_v13  ;;  %v10039_v40 = vld [vmem:[%s13649_s3 + $0x28] sm:$0xff]  ;;  %v10040_v10 = vld [vmem:[%s13649_s3 + $0x30] sm:$0xff] }
 0x7d2   :  { %10603 = vmatprep.mubr.msk.f32.mxu1 %vm772_vm2, %v4991_v51  ;;  %v4984_v41 = vmul.f32 %v10024_v54, %v4976_v16  ;;  %v10041_v16 = vld [vmem:[%s13649_s3 + $0x38] sm:$0xff] }
 0x7d4   :  { %v4992_v48 = vadd.f32 %v10025_v1, %v4984_v41  ;;  %v10976_v41 = vpack.c.bf16 %v10041_v16, %v10040_v10 }
 0x7d6   :  { %10604 = vmatmul.mubr.msk.f32.gmra.mrb[30].mxu1 %vm772_vm2, %v4992_v48 }
 0x880   :  { %v10602_v25 = vpop.f32.mrb[28].mxu1 }
 0x881   :  { %v5086_v47 = vadd.f32 %v10602_v25, %v10026_v45  ;;  %v5080_v27 = vpop.f32.mrb[29].mxu1 }
 0x882   :  { %v5081_v13 = vadd.f32 %v10026_v45, %v5080_v27 }
 0x883   :  { %v5100_v59 = vmax.f32 %v5086_v47, 0.0 }
 0x884   :  { %v5099_v22 = vmax.f32 %v5081_v13, 0.0 }
 0x886   :  { %10622 = vmatprep.mubr.msk.f32.mxu0 %vm5116_vm5, %v5099_v22 }
 0x887   :  { %10623 = vmatmul.mubr.msk.f32.vlgmr.msra.gmra.mrb[28].mxu0 %vm5116_vm5, %v5100_v59 }
 0x8a9   :  { %v10605_v39 = vpop.f32.mrb[30].mxu1 }
 0x8aa   :  { %v5096_v38 = vadd.f32 %v10605_v39, %v10026_v45  ;;  %v5090_v31 = vpop.f32.mrb[31].mxu1 }
 0x8ab   :  { %v5091_v55 = vadd.f32 %v10026_v45, %v5090_v31 }
 0x8ac   :  { %v5102_v33 = vmax.f32 %v5096_v38, 0.0 }
 0x8ad   :  { %v5101_v23 = vmax.f32 %v5091_v55, 0.0 }
 0x8af   :  { %10625 = vmatprep.mubr.msk.f32.mxu0 %vm5116_vm5, %v5101_v23 }
 0x8b0   :  { %10626 = vmatmul.mubr.msk.f32.gmra.mrb[30].mxu0 %vm5116_vm5, %v5102_v33 }
 0x95a   :  { %v10624_v17 = vpop.f32.mrb[28].mxu0 }
 0x95b   :  { %v5201_v63 = vadd.f32 %v10624_v17, %v10031_v43  ;;  %v5195_v58 = vpop.f32.mrb[29].mxu0 }
 0x95c   :  { %v5196_v7 = vadd.f32 %v10031_v43, %v5195_v58 }
 0x95d   :  { %v5215_v2 = vadd.f32 %v5201_v63, %v4990_v50 }
 0x95e   :  { %v5214_v60 = vadd.f32 %v5196_v7, %v4989_v42  ;;  %v10037_v7 = vld [vmem:[%s13653_s7 + $0x7] ss:$0 sm:$0xff] }
 0x95f   :  { %v5223_v44 = vsel %vm772_vm2, %v5215_v2, 0.0 }
 0x960   :  { %5224 = vadd.xlane.f32.xlu0 %v5223_v44  ;;  %v5220_v32 = vsel %vm772_vm2, %v5214_v60, 0.0 }
 0x961   :  { %5221 = vadd.xlane.f32.xlu1 %v5220_v32 }
 0x983   :  { %v10627_v14 = vpop.f32.mrb[30].mxu0 }
 0x984   :  { %v5211_v53 = vadd.f32 %v10627_v14, %v10031_v43  ;;  %v5205_v54 = vpop.f32.mrb[31].mxu0 }
 0x985   :  { %v5206_v4 = vadd.f32 %v10031_v43, %v5205_v54  ;;  %v10036_v43 = vld [vmem:[%s13653_s7 + $0x6] ss:$0 sm:$0xff] }
 0x986   :  { %v5217_v20 = vadd.f32 %v5211_v53, %v4992_v48 }
 0x987   :  { %v5216_v37 = vadd.f32 %v5206_v4, %v4991_v51  ;;  %v10972_v51 = vpack.c.bf16 %v10039_v40, %v10038_v56 }
 0x988   :  { %v5229_v1 = vsel %vm772_vm2, %v5217_v20, 0.0 }
 0x989   :  { %5230 = vadd.xlane.f32.xlu0 %v5229_v1  ;;  %v5226_v46 = vsel %vm772_vm2, %v5216_v37, 0.0  ;;  %10973 = vmatprep.subr.bf16.mxu1 %v10972_v51 }
 0x98a   :  { %5227 = vadd.xlane.f32.xlu1 %v5226_v46  ;;  %10975 = vmatpush3.bf16.msra.mxu1 %v10972_v51 }
 0x98b   :  { %10977 = vmatprep.subr.bf16.mxu1 %v10976_v41 }
 0x98e   :  { %10979 = vmatpush3.bf16.msra.mxu1 %v10976_v41 }
 0x9ed   :  { %v5225_v15 = vpop.xlane.xlu0 %5224 }
 0x9ee   :  { %v5233_v42 = vmul.f32 0.03125, %v5225_v15  ;;  %v5222_v50 = vpop.xlane.xlu1 %5221 }
 0x9ef   :  { %v5232_v5 = vmul.f32 0.03125, %v5222_v50 }
 0x9f0   :  { %v5237_v61 = vsub.f32 %v5215_v2, %v5233_v42 }
 0x9f1   :  { %v5236_v49 = vsub.f32 %v5214_v60, %v5232_v5 }
 0x9f2   :  { %v5241_v29 = vmul.f32 %v5237_v61, %v5237_v61 }
 0x9f3   :  { %v5240_v30 = vmul.f32 %v5236_v49, %v5236_v49 }
 0x9f4   :  { %v5247_v28 = vsel %vm772_vm2, %v5241_v29, 0.0  ;;  %v10042_v29 = vld [vmem:[%s13653_s7 + $0x8] ss:$0 sm:$0xff] }
 0x9f5   :  { %5248 = vadd.xlane.f32.xlu0 %v5247_v28  ;;  %v5244_v62 = vsel %vm772_vm2, %v5240_v30, 0.0 }
 0x9f6   :  { %5245 = vadd.xlane.f32.xlu1 %v5244_v62 }
 0xa16   :  { %v5231_v48 = vpop.xlane.xlu0 %5230 }
 0xa17   :  { %v5235_v6 = vmul.f32 0.03125, %v5231_v48  ;;  %v5228_v52 = vpop.xlane.xlu1 %5227 }
 0xa18   :  { %v5234_v18 = vmul.f32 0.03125, %v5228_v52 }
 0xa19   :  { %v5239_v45 = vsub.f32 %v5217_v20, %v5235_v6 }
 0xa1a   :  { %v5238_v25 = vsub.f32 %v5216_v37, %v5234_v18 }
 0xa1b   :  { %v5243_v47 = vmul.f32 %v5239_v45, %v5239_v45 }
 0xa1c   :  { %v5242_v27 = vmul.f32 %v5238_v25, %v5238_v25 }
 0xa1d   :  { %v5253_v13 = vsel %vm772_vm2, %v5243_v47, 0.0 }
 0xa1e   :  { %5254 = vadd.xlane.f32.xlu0 %v5253_v13  ;;  %v5250_v22 = vsel %vm772_vm2, %v5242_v27, 0.0 }
 0xa1f   :  { %5251 = vadd.xlane.f32.xlu1 %v5250_v22 }
 0xa82   :  { %v5249_v59 = vpop.xlane.xlu0 %5248 }
 0xa83   :  { %v5257_v39 = vmul.f32 0.03125, %v5249_v59  ;;  %v5246_v38 = vpop.xlane.xlu1 %5245 }
 0xa84   :  { %v5256_v31 = vmul.f32 0.03125, %v5246_v38 }
 0xa85   :  { %v5261_v55 = vadd.f32 1e-05, %v5257_v39 }
 0xa86   :  { %v5260_v23 = vadd.f32 1e-05, %v5256_v31 }
 0xa87   :  { %11176 = vrsqrt.f32 %v5261_v55 }
 0xa88   :  { %11178 = vrsqrt.f32 %v5260_v23 }
 0xa91   :  { %v11177_v33 = vpop.eup %11176 }
 0xa92   :  { %v11179_v17 = vpop.eup %11178  ;;  %v5269_v63 = vmul.f32 %v11177_v33, %v5237_v61 }
 0xa93   :  { %v5268_v58 = vmul.f32 %v11179_v17, %v5236_v49 }
 0xa94   :  { %v5277_v2 = vmul.f32 %v10036_v43, %v5269_v63 }
 0xa95   :  { %v5276_v60 = vmul.f32 %v10036_v43, %v5268_v58 }
 0xa96   :  { %v12623_v32 = vadd.f32 %v10037_v7, %v5277_v2 }
 0xa97   :  { %v12621_v44 = vadd.f32 %v10037_v7, %v5276_v60 }
 0xa99   :  { %10636 = vmatprep.mubr.msk.f32.mxu1 %vm772_vm2, %v12621_v44 }
 0xa9a   :  { %10637 = vmatmul.mubr.msk.f32.vlgmr.msra.gmra.mrb[32].mxu1 %vm772_vm2, %v12623_v32 }
 0xaab   :  { %v5255_v14 = vpop.xlane.xlu0 %5254 }
 0xaac   :  { %v5259_v53 = vmul.f32 0.03125, %v5255_v14  ;;  %v5252_v54 = vpop.xlane.xlu1 %5251 }
 0xaad   :  { %v5258_v4 = vmul.f32 0.03125, %v5252_v54 }
 0xaae   :  { %v5263_v20 = vadd.f32 1e-05, %v5259_v53 }
 0xaaf   :  { %v5262_v37 = vadd.f32 1e-05, %v5258_v4 }
 0xab0   :  { %11180 = vrsqrt.f32 %v5263_v20 }
 0xab1   :  { %11182 = vrsqrt.f32 %v5262_v37 }
 0xaba   :  { %v11181_v1 = vpop.eup %11180 }
 0xabb   :  { %v11183_v46 = vpop.eup %11182  ;;  %v5271_v15 = vmul.f32 %v11181_v1, %v5239_v45 }
 0xabc   :  { %v5270_v42 = vmul.f32 %v11183_v46, %v5238_v25 }
 0xabd   :  { %v5279_v50 = vmul.f32 %v10036_v43, %v5271_v15 }
 0xabe   :  { %v5278_v5 = vmul.f32 %v10036_v43, %v5270_v42 }
 0xabf   :  { %v12631_v49 = vadd.f32 %v10037_v7, %v5279_v50 }
 0xac0   :  { %v12629_v61 = vadd.f32 %v10037_v7, %v5278_v5 }
 0xac2   :  { %10639 = vmatprep.mubr.msk.f32.mxu1 %vm772_vm2, %v12629_v61 }
 0xac3   :  { %10640 = vmatmul.mubr.msk.f32.gmra.mrb[34].mxu1 %vm772_vm2, %v12631_v49 }
 0xb6d   :  { %v10638_v30 = vpop.f32.mrb[32].mxu1 }
 0xb6e   :  { %v12640_v28 = vadd.f32 %v10638_v30, %v10042_v29  ;;  %v5376_v62 = vpop.f32.mrb[33].mxu1 }
 0xb6f   :  { %v12646_v56 = vadd.f32 %v10042_v29, %v5376_v62 }
 0xb70   :  { %5413 = vrot.lane.b32.xlu1 %v12640_v28, %s11300_s9  ;;  %5401 = vrot.lane.b32.xlu0 %v12640_v28, %s11301_s10 }
 0xb74   :  { %5423 = vrot.lane.b32.xlu0 %v12646_v56, %s11302_s2  ;;  %5399 = vrot.lane.b32.xlu1 %v12646_v56, %s11301_s10 }
 0xb78   :  { %5411 = vrot.lane.b32.xlu1 %v12646_v56, %s11300_s9 }
 0xb7c   :  { %5425 = vrot.lane.b32.xlu1 %v12640_v28, %s11302_s2 }
 0xb96   :  { %v10641_v40 = vpop.f32.mrb[34].mxu1 }
 0xb97   :  { %v12656_v10 = vadd.f32 %v10641_v40, %v10042_v29  ;;  %v5386_v51 = vpop.f32.mrb[35].mxu1 }
 0xb98   :  { %v12658_v16 = vadd.f32 %v10042_v29, %v5386_v51 }
 0xb99   :  { %5405 = vrot.lane.b32.xlu1 %v12656_v10, %s11301_s10 }
 0xb9a   :  { %5403 = vrot.lane.b32.xlu0 %v12658_v16, %s11301_s10 }
 0xb9d   :  { %5417 = vrot.lane.b32.xlu1 %v12656_v10, %s11300_s9 }
 0xb9e   :  { %5415 = vrot.lane.b32.xlu0 %v12658_v16, %s11300_s9 }
 0xba1   :  { %5429 = vrot.lane.b32.xlu1 %v12656_v10, %s11302_s2 }
 0xba2   :  { %5427 = vrot.lane.b32.xlu0 %v12658_v16, %s11302_s2 }
 0xba5   :  { %5981 = vrot.lane.b32.xlu1 %v12640_v28, %s11303_s23 }
 0xba6   :  { %5979 = vrot.lane.b32.xlu0 %v12646_v56, %s11303_s23 }
 0xbe2   :  { %v12676_v41 = vpop.permute.xlu1 %5413  ;;  %v12678_v48 = vpop.permute.xlu0 %5401 }
 0xbe3   :  { %5989 = vrot.lane.b32.xlu1 %v12678_v48, %s11303_s23 }
 0xbe6   :  { %v5400_v6 = vpop.permute.xlu1 %5399  ;;  %v12682_v52 = vpop.permute.xlu0 %5423 }
 0xbe7   :  { %5987 = vrot.lane.b32.xlu0 %v5400_v6, %s11303_s23  ;;  %5997 = vrot.lane.b32.xlu1 %v12676_v41, %s11303_s23  ;;  %v5451_v18 = vcombine.low %v5400_v6, %v12682_v52  ;;  %v5452_v45 = vcombine.high %v5400_v6, %v12682_v52 }
 0xbe9   :  { %v5459_v13 = vrot.slane %v5451_v18, %v11606_v19  ;;  %v5466_v22 = vrot.slane %v5452_v45, %v11606_v19 }
 0xbea   :  { %v5412_v25 = vpop.permute.xlu1 %5411 }
 0xbeb   :  { %v5435_v47 = vcombine.low %v12646_v56, %v5412_v25  ;;  %v5436_v27 = vcombine.high %v12646_v56, %v5412_v25  ;;  %5995 = vrot.lane.b32.xlu0 %v5412_v25, %s11303_s23 }
 0xbed   :  { %v5443_v59 = vrot.slane %v5435_v47, %v11606_v19  ;;  %v5450_v39 = vrot.slane %v5436_v27, %v11606_v19 }
 0xbee   :  { %v12696_v38 = vpop.permute.xlu1 %5425 }
 0xbef   :  { %v5467_v31 = vcombine.low %v5443_v59, %v5459_v13  ;;  %v5468_v55 = vcombine.high %v5443_v59, %v5459_v13  ;;  %v5483_v23 = vcombine.low %v5450_v39, %v5466_v22  ;;  %v5484_v33 = vcombine.high %v5450_v39, %v5466_v22  ;;  %6005 = vrot.lane.b32.xlu1 %v12696_v38, %s11303_s23 }
 0xbf0   :  { %6003 = vrot.lane.b32.xlu0 %v12682_v52, %s11303_s23 }
 0xbf1   :  { %v5475_v43 = vrot.slane %v5467_v31, %v11618_v26  ;;  %v5482_v17 = vrot.slane %v5468_v55, %v11618_v26  ;;  %v5491_v63 = vrot.slane %v5483_v23, %v11618_v26  ;;  %v5498_v58 = vrot.slane %v5484_v33, %v11618_v26 }
 0xbf3   :  { %5985 = vrot.lane.b32.xlu1 %v12656_v10, %s11303_s23  ;;  %v5707_v7 = vcombine.low %v5475_v43, %v5482_v17  ;;  %v10047_v2 = vcombine.high %v5475_v43, %v5482_v17  ;;  %v5723_v60 = vcombine.low %v5491_v63, %v5498_v58  ;;  %v10048_v14 = vcombine.high %v5491_v63, %v5498_v58 }
 0xbf4   :  { %5983 = vrot.lane.b32.xlu0 %v12658_v16, %s11303_s23 }
 0xbf5   :  { %v5714_v53 = vrot.slane %v5707_v7, %v11606_v19  ;;  %v5722_v54 = vrot.slane %v10047_v2, %v11606_v19  ;;  %v5730_v4 = vrot.slane %v5723_v60, %v11606_v19  ;;  %v5738_v20 = vrot.slane %v10048_v14, %v11606_v19 }
 0xbf7   :  { %v5739_v37 = vcombine.low %v5714_v53, %v5722_v54  ;;  %v5755_v1 = vcombine.low %v5730_v4, %v5738_v20  ;;  %v5740_v46 = vcombine.high %v5714_v53, %v5722_v54  ;;  %v5756_v15 = vcombine.high %v5730_v4, %v5738_v20 }
 0xbf9   :  { %v5747_v42 = vrot.slane %v5739_v37, %v11618_v26  ;;  %v5763_v50 = vrot.slane %v5755_v1, %v11618_v26  ;;  %v12717_v5 = vrot.slane %v5740_v46, %v11618_v26  ;;  %v12720_v29 = vrot.slane %v5756_v15, %v11618_v26 }
 0xbfb   :  { %v5771_v30 = vcombine.low %v5747_v42, %v5763_v50  ;;  %v5772_v62 = vcombine.high %v5747_v42, %v5763_v50  ;;  %v5773_v40 = vcombine.low %v12717_v5, %v12720_v29 }
 0xbfd   :  { %10646 = vmatprep.mubr.msk.f32.mxu1 %vm62_vm0, %v5771_v30  ;;  %10653 = vmatprep.mubr.msk.f32.mxu0 %vm62_vm0, %v5772_v62 }
 0xc0b   :  { %v12728_v18 = vpop.permute.xlu1 %5405 }
 0xc0c   :  { %5993 = vrot.lane.b32.xlu1 %v12728_v18, %s11303_s23  ;;  %v5404_v45 = vpop.permute.xlu0 %5403 }
 0xc0d   :  { %5991 = vrot.lane.b32.xlu0 %v5404_v45, %s11303_s23 }
 0xc0f   :  { %v12733_v47 = vpop.permute.xlu1 %5417 }
 0xc10   :  { %6001 = vrot.lane.b32.xlu1 %v12733_v47, %s11303_s23  ;;  %v12737_v27 = vpop.permute.xlu0 %5415  ;;  %v5639_v15 = vcombine.low %v12656_v10, %v12733_v47  ;;  %v5640_v30 = vcombine.high %v12656_v10, %v12733_v47 }
 0xc11   :  { %5999 = vrot.lane.b32.xlu0 %v12737_v27, %s11303_s23  ;;  %v5571_v14 = vcombine.low %v12658_v16, %v12737_v27  ;;  %v5572_v20 = vcombine.high %v12658_v16, %v12737_v27 }
 0xc13   :  { %v12741_v13 = vpop.permute.xlu1 %5429 }
 0xc14   :  { %6009 = vrot.lane.b32.xlu1 %v12741_v13, %s11303_s23  ;;  %v12745_v22 = vpop.permute.xlu0 %5427  ;;  %v5655_v53 = vcombine.low %v12728_v18, %v12741_v13  ;;  %v5656_v37 = vcombine.high %v12728_v18, %v12741_v13 }
 0xc15   :  { %6007 = vrot.lane.b32.xlu0 %v12745_v22, %s11303_s23  ;;  %v5587_v7 = vcombine.low %v5404_v45, %v12745_v22  ;;  %v5588_v2 = vcombine.high %v5404_v45, %v12745_v22 }
 0xc17   :  { %v5982_v63 = vpop.permute.xlu1 %5981  ;;  %v5595_v42 = vrot.slane %v5587_v7, %v11606_v19  ;;  %v5602_v62 = vrot.slane %v5588_v2, %v11606_v19 }
 0xc18   :  { %6571 = vrot.lane.b32.xlu1 %v12646_v56, %s11306_s1  ;;  %v5519_v56 = vcombine.low %v12678_v48, %v12696_v38  ;;  %v5980_v58 = vpop.permute.xlu0 %5979 }
 0xc19   :  { %6573 = vrot.lane.b32.xlu0 %v12640_v28, %s11306_s1 }
 0xc1a   :  { %v5527_v59 = vrot.slane %v5519_v56, %v11606_v19 }
 0xc1c   :  { %6579 = vrot.lane.b32.xlu1 %v5400_v6, %s11306_s1  ;;  %v5520_v6 = vcombine.high %v12678_v48, %v12696_v38 }
 0xc1d   :  { %6587 = vrot.lane.b32.xlu0 %v5412_v25, %s11306_s1  ;;  %v5504_v25 = vcombine.high %v12640_v28, %v12676_v41 }
 0xc1e   :  { %v5534_v39 = vrot.slane %v5520_v6, %v11606_v19  ;;  %v5586_v6 = vrot.slane %v5572_v20, %v11606_v19 }
 0xc1f   :  { %v5518_v55 = vrot.slane %v5504_v25, %v11606_v19 }
 0xc20   :  { %6581 = vrot.lane.b32.xlu1 %v12678_v48, %s11306_s1 }
 0xc21   :  { %6595 = vrot.lane.b32.xlu0 %v12682_v52, %s11306_s1  ;;  %v5503_v52 = vcombine.low %v12640_v28, %v12676_v41  ;;  %v5551_v43 = vcombine.low %v5518_v55, %v5534_v39  ;;  %v5552_v17 = vcombine.high %v5518_v55, %v5534_v39  ;;  %v12820_v39 = vrot.slane %v5639_v15, %v11606_v19 }
 0xc23   :  { %v5511_v31 = vrot.slane %v5503_v52, %v11606_v19  ;;  %v5559_v28 = vrot.slane %v5551_v43, %v11618_v26  ;;  %v12814_v52 = vrot.slane %v5656_v37, %v11606_v19  ;;  %v5619_v43 = vcombine.low %v5586_v6, %v5602_v62 }
 0xc24   :  { %6589 = vrot.lane.b32.xlu1 %v12676_v41, %s11306_s1  ;;  %v5566_v41 = vrot.slane %v5552_v17, %v11618_v26  ;;  %v5620_v17 = vcombine.high %v5586_v6, %v5602_v62 }
 0xc25   :  { %6577 = vrot.lane.b32.xlu0 %v12656_v10, %s11306_s1  ;;  %v5535_v23 = vcombine.low %v5511_v31, %v5527_v59  ;;  %v5536_v33 = vcombine.high %v5511_v31, %v5527_v59 }
 0xc26   :  { %v5791_v46 = vcombine.low %v5559_v28, %v5566_v41  ;;  %v10050_v50 = vcombine.high %v5559_v28, %v5566_v41 }
 0xc27   :  { %v5543_v48 = vrot.slane %v5535_v23, %v11618_v26 }
 0xc28   :  { %6597 = vrot.lane.b32.xlu1 %v12696_v38, %s11306_s1  ;;  %v5550_v38 = vrot.slane %v5536_v33, %v11618_v26  ;;  %v12817_v59 = vrot.slane %v5791_v46, %v11606_v19  ;;  %v12823_v23 = vrot.slane %v10050_v50, %v11606_v19  ;;  %v12826_v33 = vrot.slane %v5640_v30, %v11606_v19 }
 0xc2a   :  { %v5775_v54 = vcombine.low %v5543_v48, %v5550_v38  ;;  %v10049_v4 = vcombine.high %v5543_v48, %v5550_v38  ;;  %v5687_v7 = vcombine.low %v12826_v33, %v12814_v52  ;;  %v5688_v2 = vcombine.high %v12826_v33, %v12814_v52 }
 0xc2c   :  { %6575 = vrot.lane.b32.xlu1 %v12658_v16, %s11306_s1  ;;  %v12804_v16 = vrot.slane %v5655_v53, %v11606_v19  ;;  %v12810_v56 = vrot.slane %v10049_v4, %v11606_v19 }
 0xc2e   :  { %v5671_v48 = vcombine.low %v12820_v39, %v12804_v16  ;;  %v5672_v38 = vcombine.high %v12820_v39, %v12804_v16  ;;  %v5702_v39 = vrot.slane %v5688_v2, %v11618_v26 }
 0xc30   :  { %6585 = vrot.lane.b32.xlu1 %v12728_v18, %s11306_s1  ;;  %v12807_v18 = vrot.slane %v5775_v54, %v11606_v19 }
 0xc34   :  { %6583 = vrot.lane.b32.xlu1 %v5404_v45, %s11306_s1  ;;  %v5579_v45 = vrot.slane %v5571_v14, %v11606_v19 }
 0xc36   :  { %v5603_v31 = vcombine.low %v5579_v45, %v5595_v42  ;;  %v5604_v55 = vcombine.high %v5579_v45, %v5595_v42  ;;  %v12846_v42 = vrot.slane %v5620_v17, %v11618_v26 }
 0xc38   :  { %v12837_v4 = vrot.slane %v5603_v31, %v11618_v26  ;;  %v12840_v20 = vrot.slane %v5604_v55, %v11618_v26 }
 0xc55   :  { %v5990_v60 = vpop.permute.xlu1 %5989 }
 0xc59   :  { %v5988_v1 = vpop.permute.xlu0 %5987  ;;  %v5998_v25 = vpop.permute.xlu1 %5997 }
 0xc5a   :  { %v6095_v28 = vcombine.low %v5982_v63, %v5998_v25  ;;  %v6096_v41 = vcombine.high %v5982_v63, %v5998_v25  ;;  %v12843_v63 = vrot.slane %v5619_v43, %v11618_v26 }
 0xc5c   :  { %v6110_v62 = vrot.slane %v6096_v41, %v11606_v19  ;;  %v10052_v16 = vcombine.high %v12843_v63, %v12846_v42 }
 0xc5d   :  { %v5996_v10 = vpop.permute.xlu0 %5995 }
 0xc5e   :  { %v6027_v14 = vcombine.low %v5980_v58, %v5996_v10  ;;  %v6028_v53 = vcombine.high %v5980_v58, %v5996_v10  ;;  %v6103_v58 = vrot.slane %v6095_v28, %v11606_v19 }
 0xc60   :  { %v6035_v25 = vrot.slane %v6027_v14, %v11606_v19 }
 0xc61   :  { %v6006_v54 = vpop.permute.xlu1 %6005 }
 0xc62   :  { %v6111_v37 = vcombine.low %v5990_v60, %v6006_v54  ;;  %v6112_v46 = vcombine.high %v5990_v60, %v6006_v54  ;;  %v6004_v15 = vpop.permute.xlu0 %6003  ;;  %v6042_v60 = vrot.slane %v6028_v53, %v11606_v19 }
 0xc63   :  { %v6043_v50 = vcombine.low %v5988_v1, %v6004_v15  ;;  %v6044_v30 = vcombine.high %v5988_v1, %v6004_v15 }
 0xc64   :  { %v6119_v45 = vrot.slane %v6111_v37, %v11606_v19  ;;  %v6126_v6 = vrot.slane %v6112_v46, %v11606_v19 }
 0xc65   :  { %v6051_v10 = vrot.slane %v6043_v50, %v11606_v19  ;;  %v6058_v31 = vrot.slane %v6044_v30, %v11606_v19 }
 0xc66   :  { %v6127_v55 = vcombine.low %v6103_v58, %v6119_v45  ;;  %v6128_v43 = vcombine.high %v6103_v58, %v6119_v45  ;;  %v6143_v17 = vcombine.low %v6110_v62, %v6126_v6  ;;  %v6144_v1 = vcombine.high %v6110_v62, %v6126_v6 }
 0xc67   :  { %v6059_v54 = vcombine.low %v6035_v25, %v6051_v10  ;;  %v6060_v28 = vcombine.high %v6035_v25, %v6051_v10  ;;  %v6075_v15 = vcombine.low %v6042_v60, %v6058_v31  ;;  %v6076_v41 = vcombine.high %v6042_v60, %v6058_v31 }
 0xc68   :  { %v6135_v37 = vrot.slane %v6127_v55, %v11618_v26  ;;  %v6142_v46 = vrot.slane %v6128_v43, %v11618_v26  ;;  %v6151_v14 = vrot.slane %v6143_v17, %v11618_v26  ;;  %v6158_v53 = vrot.slane %v6144_v1, %v11618_v26 }
 0xc69   :  { %v6067_v50 = vrot.slane %v6059_v54, %v11618_v26  ;;  %v6074_v30 = vrot.slane %v6060_v28, %v11618_v26  ;;  %v6083_v58 = vrot.slane %v6075_v15, %v11618_v26  ;;  %v6090_v62 = vrot.slane %v6076_v41, %v11618_v26 }
 0xc6a   :  { %v6367_v45 = vcombine.low %v6135_v37, %v6142_v46  ;;  %v10057_v6 = vcombine.high %v6135_v37, %v6142_v46  ;;  %v6383_v25 = vcombine.low %v6151_v14, %v6158_v53  ;;  %v10058_v60 = vcombine.high %v6151_v14, %v6158_v53 }
 0xc6b   :  { %v6299_v10 = vcombine.low %v6067_v50, %v6074_v30  ;;  %v10055_v31 = vcombine.high %v6067_v50, %v6074_v30  ;;  %v6315_v55 = vcombine.low %v6083_v58, %v6090_v62  ;;  %v10056_v43 = vcombine.high %v6083_v58, %v6090_v62 }
 0xc6c   :  { %v6374_v17 = vrot.slane %v6367_v45, %v11606_v19  ;;  %v6382_v1 = vrot.slane %v10057_v6, %v11606_v19  ;;  %v6390_v54 = vrot.slane %v6383_v25, %v11606_v19  ;;  %v6398_v28 = vrot.slane %v10058_v60, %v11606_v19 }
 0xc6d   :  { %v6306_v15 = vrot.slane %v6299_v10, %v11606_v19  ;;  %v6314_v41 = vrot.slane %v10055_v31, %v11606_v19  ;;  %v6322_v37 = vrot.slane %v6315_v55, %v11606_v19  ;;  %v6330_v46 = vrot.slane %v10056_v43, %v11606_v19 }
 0xc6e   :  { %v6399_v14 = vcombine.low %v6374_v17, %v6382_v1  ;;  %v6415_v53 = vcombine.low %v6390_v54, %v6398_v28  ;;  %v6400_v50 = vcombine.high %v6374_v17, %v6382_v1  ;;  %v6416_v30 = vcombine.high %v6390_v54, %v6398_v28 }
 0xc6f   :  { %v6331_v58 = vcombine.low %v6306_v15, %v6314_v41  ;;  %v6347_v62 = vcombine.low %v6322_v37, %v6330_v46  ;;  %v6332_v45 = vcombine.high %v6306_v15, %v6314_v41  ;;  %v6348_v6 = vcombine.high %v6322_v37, %v6330_v46 }
 0xc70   :  { %v6407_v25 = vrot.slane %v6399_v14, %v11618_v26  ;;  %v6423_v60 = vrot.slane %v6415_v53, %v11618_v26  ;;  %v6414_v10 = vrot.slane %v6400_v50, %v11618_v26  ;;  %v6430_v31 = vrot.slane %v6416_v30, %v11618_v26 }
 0xc71   :  { %v6339_v55 = vrot.slane %v6331_v58, %v11618_v26  ;;  %v6355_v43 = vrot.slane %v6347_v62, %v11618_v26  ;;  %v6346_v51 = vrot.slane %v6332_v45, %v11618_v26  ;;  %v6362_v17 = vrot.slane %v6348_v6, %v11618_v26 }
 0xc72   :  { %v6431_v1 = vcombine.low %v6407_v25, %v6423_v60  ;;  %v6432_v54 = vcombine.high %v6407_v25, %v6423_v60  ;;  %v6433_v28 = vcombine.low %v6414_v10, %v6430_v31  ;;  %v6434_v15 = vcombine.high %v6414_v10, %v6430_v31 }
 0xc73   :  { %v6363_v41 = vcombine.low %v6339_v55, %v6355_v43  ;;  %v6364_v37 = vcombine.high %v6339_v55, %v6355_v43  ;;  %v6365_v46 = vcombine.low %v6346_v51, %v6362_v17  ;;  %v6366_v14 = vcombine.high %v6346_v51, %v6362_v17 }
 0xc74   :  { %v5807_v53 = vcombine.low %v12807_v18, %v12810_v56  ;;  %v5823_v50 = vcombine.low %v12817_v59, %v12823_v23  ;;  %v5679_v30 = vrot.slane %v5671_v48, %v11618_v26  ;;  %v5686_v58 = vrot.slane %v5672_v38, %v11618_v26 }
 0xc75   :  { %v5695_v51 = vrot.slane %v5687_v7, %v11618_v26  ;;  %v10980_v62 = vpack.c.bf16 %v6431_v1, %v6363_v41  ;;  %v10986_v45 = vpack.c.bf16 %v6432_v54, %v6364_v37  ;;  %v5843_v6 = vcombine.low %v12837_v4, %v12840_v20  ;;  %v5986_v54 = vpop.permute.xlu1 %5985  ;;  %v5984_v37 = vpop.permute.xlu0 %5983 }
 0xc76   :  { %v10051_v25 = vcombine.high %v12837_v4, %v12840_v20  ;;  %v5859_v48 = vcombine.low %v12843_v63, %v12846_v42  ;;  %v10992_v38 = vpack.c.bf16 %v6433_v28, %v6365_v46  ;;  %v10998_v7 = vpack.c.bf16 %v6434_v15, %v6366_v14 }
 0xc77   :  { %10982 = vmatprep.subr.msk.bf16.mxu1 %vm11368_vm1, %v10980_v62  ;;  %10988 = vmatprep.subr.msk.bf16.mxu0 %vm11368_vm1, %v10986_v45  ;;  %v5911_v4 = vcombine.low %v5679_v30, %v5686_v58  ;;  %v5815_v52 = vrot.slane %v5807_v53, %v11618_v26  ;;  %v5831_v33 = vrot.slane %v5823_v50, %v11618_v26 }
 0xc78   :  { %10985 = vmatpush3.bf16.xpose.msk.msra.mxu1 %vm11368_vm1, %v10980_v62  ;;  %10991 = vmatpush3.bf16.xpose.msk.msra.mxu0 %vm11368_vm1, %v10986_v45  ;;  %v5850_v2 = vrot.slane %v5843_v6, %v11606_v19  ;;  %v5858_v20 = vrot.slane %v10051_v25, %v11606_v19  ;;  %v5866_v63 = vrot.slane %v5859_v48, %v11606_v19 }
 0xc79   :  { %10994 = vmatprep.subr.msk.bf16.mxu1 %vm11368_vm1, %v10992_v38  ;;  %11000 = vmatprep.subr.msk.bf16.mxu0 %vm11368_vm1, %v10998_v7  ;;  %v5874_v42 = vrot.slane %v10052_v16, %v11606_v19  ;;  %v10053_v60 = vcombine.high %v5679_v30, %v5686_v58  ;;  %v5927_v10 = vcombine.low %v5695_v51, %v5702_v39 }
 0xc7a   :  { %v10054_v31 = vcombine.high %v5695_v51, %v5702_v39  ;;  %v5839_v55 = vcombine.low %v5815_v52, %v5831_v33  ;;  %v5840_v43 = vcombine.high %v5815_v52, %v5831_v33  ;;  %v5808_v17 = vcombine.high %v12807_v18, %v12810_v56 }
 0xc7b   :  { %v5824_v1 = vcombine.high %v12817_v59, %v12823_v23  ;;  %v5875_v28 = vcombine.low %v5850_v2, %v5858_v20  ;;  %v5891_v15 = vcombine.low %v5866_v63, %v5874_v42  ;;  %v5918_v41 = vrot.slane %v5911_v4, %v11606_v19 }
 0xc7c   :  { %v5926_v46 = vrot.slane %v10053_v60, %v11606_v19  ;;  %v5934_v14 = vrot.slane %v5927_v10, %v11606_v19  ;;  %v5942_v53 = vrot.slane %v10054_v31, %v11606_v19  ;;  %v13699_v18 = vcombine.high %v12717_v5, %v12720_v29 }
 0xc7d   :  { %v5822_v56 = vrot.slane %v5808_v17, %v11618_v26  ;;  %v5838_v59 = vrot.slane %v5824_v1, %v11618_v26  ;;  %v5883_v50 = vrot.slane %v5875_v28, %v11618_v26  ;;  %v5899_v30 = vrot.slane %v5891_v15, %v11618_v26 }
 0xc7e   :  { %v5994_v23 = vpop.permute.xlu1 %5993  ;;  %v5943_v51 = vcombine.low %v5918_v41, %v5926_v46  ;;  %v5876_v62 = vcombine.high %v5850_v2, %v5858_v20  ;;  %v5892_v45 = vcombine.high %v5866_v63, %v5874_v42  ;;  %v5944_v29 = vcombine.high %v5918_v41, %v5926_v46 }
 0xc7f   :  { %10647 = vmatmul.mubr.msk.f32.vlgmr.msra.gmra.mrb[36].mxu1 %vm62_vm0, %v5839_v55  ;;  %10654 = vmatmul.mubr.msk.f32.vlgmr.msra.gmra.mrb[32].mxu0 %vm62_vm0, %v5840_v43  ;;  %v5992_v58 = vpop.permute.xlu0 %5991  ;;  %v5841_v6 = vcombine.low %v5822_v56, %v5838_v59  ;;  %v5842_v48 = vcombine.high %v5822_v56, %v5838_v59  ;;  %v5907_v5 = vcombine.low %v5883_v50, %v5899_v30 }
 0xc80   :  { %10997 = vmatpush3.bf16.xpose.msk.msra.mxu1 %vm11368_vm1, %v10992_v38  ;;  %10660 = vmatprep.mubr.msk.f32.mxu1 %vm62_vm0, %v5773_v40  ;;  %v5959_v40 = vcombine.low %v5934_v14, %v5942_v53  ;;  %v5960_v16 = vcombine.high %v5934_v14, %v5942_v53  ;;  %v5908_v38 = vcombine.high %v5883_v50, %v5899_v30 }
 0xc81   :  { %11003 = vmatpush3.bf16.xpose.msk.msra.mxu0 %vm11368_vm1, %v10998_v7  ;;  %10667 = vmatprep.mubr.msk.f32.mxu0 %vm62_vm0, %v13699_v18  ;;  %v12954_v7 = vrot.slane %v5943_v51, %v11618_v26  ;;  %v12962_v52 = vrot.slane %v5876_v62, %v11618_v26  ;;  %v12965_v33 = vrot.slane %v5892_v45, %v11618_v26 }
 0xc82   :  { %v6002_v25 = vpop.permute.xlu1 %6001  ;;  %v12957_v4 = vrot.slane %v5959_v40, %v11618_v26  ;;  %v12969_v10 = vrot.slane %v5944_v29, %v11618_v26  ;;  %v12972_v31 = vrot.slane %v5960_v16, %v11618_v26 }
 0xc83   :  { %v6000_v39 = vpop.permute.xlu0 %5999  ;;  %v6231_v2 = vcombine.low %v5986_v54, %v6002_v25  ;;  %v6232_v20 = vcombine.high %v5986_v54, %v6002_v25 }
 0xc84   :  { %v6163_v63 = vcombine.low %v5984_v37, %v6000_v39  ;;  %v6164_v42 = vcombine.high %v5984_v37, %v6000_v39  ;;  %v5975_v1 = vcombine.low %v12954_v7, %v12957_v4 }
 0xc85   :  { %v6239_v46 = vrot.slane %v6231_v2, %v11606_v19  ;;  %v6246_v14 = vrot.slane %v6232_v20, %v11606_v19 }
 0xc86   :  { %v6010_v60 = vpop.permute.xlu1 %6009  ;;  %v6171_v56 = vrot.slane %v6163_v63, %v11606_v19  ;;  %v6178_v59 = vrot.slane %v6164_v42, %v11606_v19 }
 0xc87   :  { %10661 = vmatmul.mubr.msk.f32.vlgmr.msra.gmra.mrb[38].mxu1 %vm62_vm0, %v5841_v6  ;;  %v6247_v55 = vcombine.low %v5994_v23, %v6010_v60  ;;  %v6248_v43 = vcombine.high %v5994_v23, %v6010_v60  ;;  %v6008_v17 = vpop.permute.xlu0 %6007 }
 0xc88   :  { %10668 = vmatmul.mubr.msk.f32.vlgmr.msra.gmra.mrb[34].mxu0 %vm62_vm0, %v5842_v48  ;;  %10674 = vmatprep.mubr.msk.f32.mxu1 %vm62_vm0, %v5907_v5  ;;  %v6179_v28 = vcombine.low %v5992_v58, %v6008_v17  ;;  %v6180_v15 = vcombine.high %v5992_v58, %v6008_v17 }
 0xc89   :  { %10681 = vmatprep.mubr.msk.f32.mxu0 %vm62_vm0, %v5908_v38  ;;  %v6255_v53 = vrot.slane %v6247_v55, %v11606_v19  ;;  %v6262_v18 = vrot.slane %v6248_v43, %v11606_v19 }
 0xc8a   :  { %v6187_v23 = vrot.slane %v6179_v28, %v11606_v19  ;;  %v6194_v50 = vrot.slane %v6180_v15, %v11606_v19  ;;  %v6572_v30 = vpop.permute.xlu1 %6571 }
 0xc8b   :  { %v6263_v58 = vcombine.low %v6239_v46, %v6255_v53  ;;  %v6264_v51 = vcombine.high %v6239_v46, %v6255_v53  ;;  %v6279_v40 = vcombine.low %v6246_v14, %v6262_v18  ;;  %v6280_v62 = vcombine.high %v6246_v14, %v6262_v18  ;;  %v6574_v45 = vpop.permute.xlu0 %6573 }
 0xc8c   :  { %v6195_v6 = vcombine.low %v6171_v56, %v6187_v23  ;;  %v6196_v25 = vcombine.high %v6171_v56, %v6187_v23  ;;  %v6211_v48 = vcombine.low %v6178_v59, %v6194_v50  ;;  %v6212_v5 = vcombine.high %v6178_v59, %v6194_v50 }
 0xc8d   :  { %v6271_v29 = vrot.slane %v6263_v58, %v11618_v26  ;;  %v6278_v16 = vrot.slane %v6264_v51, %v11618_v26  ;;  %v6287_v39 = vrot.slane %v6279_v40, %v11618_v26  ;;  %v6294_v38 = vrot.slane %v6280_v62, %v11618_v26 }
 0xc8e   :  { %v6203_v2 = vrot.slane %v6195_v6, %v11618_v26  ;;  %v6210_v20 = vrot.slane %v6196_v25, %v11618_v26  ;;  %v6219_v63 = vrot.slane %v6211_v48, %v11618_v26  ;;  %v6226_v42 = vrot.slane %v6212_v5, %v11618_v26  ;;  %v6580_v60 = vpop.permute.xlu1 %6579 }
 0xc8f   :  { %v6503_v55 = vcombine.low %v6271_v29, %v6278_v16  ;;  %v10061_v43 = vcombine.high %v6271_v29, %v6278_v16  ;;  %v6519_v17 = vcombine.low %v6287_v39, %v6294_v38  ;;  %v10062_v28 = vcombine.high %v6287_v39, %v6294_v38  ;;  %v6588_v15 = vpop.permute.xlu0 %6587 }
 0xc90   :  { %v6435_v46 = vcombine.low %v6203_v2, %v6210_v20  ;;  %v10059_v14 = vcombine.high %v6203_v2, %v6210_v20  ;;  %v6451_v53 = vcombine.low %v6219_v63, %v6226_v42  ;;  %v10060_v18 = vcombine.high %v6219_v63, %v6226_v42 }
 0xc91   :  { %v12999_v56 = vrot.slane %v6503_v55, %v11606_v19  ;;  %v13002_v59 = vrot.slane %v10061_v43, %v11606_v19  ;;  %v13005_v23 = vrot.slane %v6519_v17, %v11606_v19  ;;  %v13008_v50 = vrot.slane %v10062_v28, %v11606_v19 }
 0xc92   :  { %v13011_v58 = vrot.slane %v6435_v46, %v11606_v19  ;;  %v13014_v51 = vrot.slane %v10059_v14, %v11606_v19  ;;  %v13017_v40 = vrot.slane %v6451_v53, %v11606_v19  ;;  %v13020_v62 = vrot.slane %v10060_v18, %v11606_v19  ;;  %v6582_v6 = vpop.permute.xlu1 %6581 }
 0xc93   :  { %v6619_v25 = vcombine.low %v6572_v30, %v6588_v15  ;;  %v6620_v48 = vcombine.high %v6572_v30, %v6588_v15  ;;  %v6596_v5 = vpop.permute.xlu0 %6595  ;;  %v6535_v29 = vcombine.low %v12999_v56, %v13002_v59  ;;  %v6551_v16 = vcombine.low %v13005_v23, %v13008_v50 }
 0xc94   :  { %v6635_v39 = vcombine.low %v6580_v60, %v6596_v5  ;;  %v6636_v38 = vcombine.high %v6580_v60, %v6596_v5  ;;  %v6467_v2 = vcombine.low %v13011_v58, %v13014_v51  ;;  %v6483_v20 = vcombine.low %v13017_v40, %v13020_v62 }
 0xc95   :  { %v6627_v63 = vrot.slane %v6619_v25, %v11606_v19  ;;  %v6634_v42 = vrot.slane %v6620_v48, %v11606_v19  ;;  %v6543_v30 = vrot.slane %v6535_v29, %v11618_v26  ;;  %v6559_v55 = vrot.slane %v6551_v16, %v11618_v26 }
 0xc96   :  { %v6643_v43 = vrot.slane %v6635_v39, %v11606_v19  ;;  %v6650_v17 = vrot.slane %v6636_v38, %v11606_v19  ;;  %v6590_v28 = vpop.permute.xlu1 %6589  ;;  %v6475_v60 = vrot.slane %v6467_v2, %v11618_v26  ;;  %v6491_v15 = vrot.slane %v6483_v20, %v11618_v26 }
 0xc97   :  { %v6687_v46 = vcombine.low %v6574_v45, %v6590_v28  ;;  %v6688_v14 = vcombine.high %v6574_v45, %v6590_v28  ;;  %v6567_v53 = vcombine.low %v6543_v30, %v6559_v55  ;;  %v6568_v18 = vcombine.high %v6543_v30, %v6559_v55 }
 0xc98   :  { %v6651_v25 = vcombine.low %v6627_v63, %v6643_v43  ;;  %v6652_v5 = vcombine.high %v6627_v63, %v6643_v43  ;;  %v6667_v48 = vcombine.low %v6634_v42, %v6650_v17  ;;  %v6668_v37 = vcombine.high %v6634_v42, %v6650_v17 }
 0xc99   :  { %v6695_v29 = vrot.slane %v6687_v46, %v11606_v19  ;;  %v6702_v16 = vrot.slane %v6688_v14, %v11606_v19  ;;  %v6499_v39 = vcombine.low %v6475_v60, %v6491_v15  ;;  %v6500_v41 = vcombine.high %v6475_v60, %v6491_v15 }
 0xc9a   :  { %v6659_v38 = vrot.slane %v6651_v25, %v11618_v26  ;;  %v6666_v2 = vrot.slane %v6652_v5, %v11618_v26  ;;  %v6675_v20 = vrot.slane %v6667_v48, %v11618_v26  ;;  %v6682_v45 = vrot.slane %v6668_v37, %v11618_v26  ;;  %v6598_v28 = vpop.permute.xlu1 %6597 }
 0xc9b   :  { %v6703_v30 = vcombine.low %v6582_v6, %v6598_v28  ;;  %v6704_v55 = vcombine.high %v6582_v6, %v6598_v28  ;;  %v11004_v63 = vpack.c.bf16 %v6567_v53, %v6499_v39  ;;  %v11010_v43 = vpack.c.bf16 %v6568_v18, %v6500_v41 }
 0xc9c   :  { %v6891_v42 = vcombine.low %v6659_v38, %v6666_v2  ;;  %v10063_v17 = vcombine.high %v6659_v38, %v6666_v2  ;;  %v6907_v46 = vcombine.low %v6675_v20, %v6682_v45  ;;  %v10064_v54 = vcombine.high %v6675_v20, %v6682_v45 }
 0xc9d   :  { %v6711_v14 = vrot.slane %v6703_v30, %v11606_v19  ;;  %v6718_v60 = vrot.slane %v6704_v55, %v11606_v19  ;;  %11006 = vmatprep.subr.msk.bf16.mxu1 %vm11368_vm1, %v11004_v63  ;;  %11012 = vmatprep.subr.msk.bf16.mxu0 %vm11368_vm1, %v11010_v43  ;;  %v6468_v37 = vcombine.high %v13011_v58, %v13014_v51 }
 0xc9e   :  { %v6898_v6 = vrot.slane %v6891_v42, %v11606_v19  ;;  %v6906_v41 = vrot.slane %v10063_v17, %v11606_v19  ;;  %v6914_v15 = vrot.slane %v6907_v46, %v11606_v19  ;;  %v6922_v53 = vrot.slane %v10064_v54, %v11606_v19  ;;  %11009 = vmatpush3.bf16.xpose.msk.msra.mxu1 %vm11368_vm1, %v11004_v63 }
 0xc9f   :  { %v6719_v18 = vcombine.low %v6695_v29, %v6711_v14  ;;  %v6720_v25 = vcombine.high %v6695_v29, %v6711_v14  ;;  %v6735_v5 = vcombine.low %v6702_v16, %v6718_v60  ;;  %v6736_v48 = vcombine.high %v6702_v16, %v6718_v60  ;;  %11015 = vmatpush3.bf16.xpose.msk.msra.mxu0 %vm11368_vm1, %v11010_v43 }
 0xca0   :  { %v6482_v58 = vrot.slane %v6468_v37, %v11618_v26  ;;  %v6484_v51 = vcombine.high %v13017_v40, %v13020_v62  ;;  %v6536_v39 = vcombine.high %v12999_v56, %v13002_v59  ;;  %v6552_v54 = vcombine.high %v13005_v23, %v13008_v50 }
 0xca1   :  { %v6727_v38 = vrot.slane %v6719_v18, %v11618_v26  ;;  %v6734_v29 = vrot.slane %v6720_v25, %v11618_v26  ;;  %v6743_v16 = vrot.slane %v6735_v5, %v11618_v26  ;;  %v6750_v2 = vrot.slane %v6736_v48, %v11618_v26 }
 0xca2   :  { %v6498_v20 = vrot.slane %v6484_v51, %v11618_v26  ;;  %v6550_v45 = vrot.slane %v6536_v39, %v11618_v26  ;;  %v6566_v40 = vrot.slane %v6552_v54, %v11618_v26  ;;  %v6923_v62 = vcombine.low %v6898_v6, %v6906_v41 }
 0xca3   :  { %v6959_v28 = vcombine.low %v6727_v38, %v6734_v29  ;;  %v10065_v56 = vcombine.high %v6727_v38, %v6734_v29  ;;  %v6975_v59 = vcombine.low %v6743_v16, %v6750_v2  ;;  %v10066_v30 = vcombine.high %v6743_v16, %v6750_v2 }
 0xca4   :  { %v6501_v23 = vcombine.low %v6482_v58, %v6498_v20  ;;  %v6569_v50 = vcombine.low %v6550_v45, %v6566_v40  ;;  %v6502_v55 = vcombine.high %v6482_v58, %v6498_v20  ;;  %v6570_v63 = vcombine.high %v6550_v45, %v6566_v40 }
 0xca5   :  { %v6966_v43 = vrot.slane %v6959_v28, %v11606_v19  ;;  %v6974_v42 = vrot.slane %v10065_v56, %v11606_v19  ;;  %v6982_v17 = vrot.slane %v6975_v59, %v11606_v19  ;;  %v6990_v46 = vrot.slane %v10066_v30, %v11606_v19  ;;  %10675 = vmatmul.mubr.msk.f32.vlgmr.msra.gmra.mrb[40].mxu1 %vm62_vm0, %v5975_v1 }
 0xca6   :  { %v11016_v14 = vpack.c.bf16 %v6569_v50, %v6501_v23  ;;  %v11022_v60 = vpack.c.bf16 %v6570_v63, %v6502_v55  ;;  %v13700_v37 = vcombine.high %v12954_v7, %v12957_v4  ;;  %v13701_v18 = vcombine.low %v12962_v52, %v12965_v33 }
 0xca7   :  { %v6931_v25 = vrot.slane %v6923_v62, %v11618_v26  ;;  %v13702_v5 = vcombine.high %v12962_v52, %v12965_v33  ;;  %v6939_v1 = vcombine.low %v6914_v15, %v6922_v53  ;;  %v6991_v48 = vcombine.low %v6966_v43, %v6974_v42 }
 0xca8   :  { %10682 = vmatmul.mubr.msk.f32.vlgmr.msra.gmra.mrb[36].mxu0 %vm62_vm0, %v13700_v37  ;;  %10688 = vmatprep.mubr.msk.f32.mxu1 %vm62_vm0, %v13701_v18  ;;  %v7007_v58 = vcombine.low %v6982_v17, %v6990_v46  ;;  %v6924_v51 = vcombine.high %v6898_v6, %v6906_v41  ;;  %v6940_v7 = vcombine.high %v6914_v15, %v6922_v53 }
 0xca9   :  { %10695 = vmatprep.mubr.msk.f32.mxu0 %vm62_vm0, %v13702_v5  ;;  %11018 = vmatprep.subr.msk.bf16.mxu1 %vm11368_vm1, %v11016_v14  ;;  %v6992_v4 = vcombine.high %v6966_v43, %v6974_v42  ;;  %v7008_v39 = vcombine.high %v6982_v17, %v6990_v46  ;;  %v6947_v52 = vrot.slane %v6939_v1, %v11618_v26 }
 0xcaa   :  { %11024 = vmatprep.subr.msk.bf16.mxu0 %vm11368_vm1, %v11022_v60  ;;  %11021 = vmatpush3.bf16.xpose.msk.msra.mxu1 %vm11368_vm1, %v11016_v14  ;;  %v6999_v33 = vrot.slane %v6991_v48, %v11618_v26  ;;  %v7015_v6 = vrot.slane %v7007_v58, %v11618_v26  ;;  %v6938_v41 = vrot.slane %v6924_v51, %v11618_v26 }
 0xcab   :  { %11027 = vmatpush3.bf16.xpose.msk.msra.mxu0 %vm11368_vm1, %v11022_v60  ;;  %v6954_v54 = vrot.slane %v6940_v7, %v11618_v26  ;;  %v7006_v15 = vrot.slane %v6992_v4, %v11618_v26  ;;  %v7022_v53 = vrot.slane %v7008_v39, %v11618_v26  ;;  %v6955_v38 = vcombine.low %v6931_v25, %v6947_v52 }
 0xcac   :  { %v7023_v29 = vcombine.low %v6999_v33, %v7015_v6  ;;  %v7024_v16 = vcombine.high %v6999_v33, %v7015_v6  ;;  %v5977_v40 = vcombine.low %v12969_v10, %v12972_v31  ;;  %v5978_v28 = vcombine.high %v12969_v10, %v12972_v31  ;;  %v13703_v33 = vld [vmem:[#allocation13_spill] sm:$0xff] }
 0xcad   :  { %v6957_v2 = vcombine.low %v6938_v41, %v6954_v54  ;;  %v7025_v3 = vcombine.low %v7006_v15, %v7022_v53  ;;  %v6958_v20 = vcombine.high %v6938_v41, %v6954_v54  ;;  %v7026_v45 = vcombine.high %v7006_v15, %v7022_v53  ;;  %v13704_v53 = vld [vmem:[#allocation14_spill] sm:$0xff] }
 0xcae   :  { %v11028_v62 = vpack.c.bf16 %v7023_v29, %v6955_v38  ;;  %v6956_v59 = vcombine.high %v6931_v25, %v6947_v52  ;;  %v13705_v29 = vld [vmem:[#allocation6_spill] sm:$0xff] }
 0xcaf   :  { %v11036_v56 = vpack.c.bf16 %v7025_v3, %v6957_v2  ;;  %v13114_v30 = vpack.c.bf16 %v7026_v45, %v6958_v20  ;;  %v13706_v20 = vld [vmem:[#allocation7_spill] sm:$0xff] }
 0xcb0   :  { %11029 = vmatprep.subr.bf16.mxu1 %v11028_v62  ;;  %v13118_v23 = vpack.c.bf16 %v7024_v16, %v6956_v59 }
 0xcb1   :  { %10689 = vmatmul.mubr.msk.f32.vlgmr.msra.gmra.mrb[42].mxu1 %vm62_vm0, %v5977_v40  ;;  %11037 = vmatprep.subr.bf16.mxu0 %v11036_v56  ;;  %v13707_v40 = vld [vmem:[#allocation15_spill] sm:$0xff] }
 0xcb2   :  { %10696 = vmatmul.mubr.msk.f32.vlgmr.msra.gmra.mrb[38].mxu0 %vm62_vm0, %v5978_v28  ;;  %11031 = vmatpush3.bf16.msra.mxu1 %v11028_v62 }
 0xcb3   :  { %11039 = vmatpush3.bf16.msra.mxu0 %v11036_v56  ;;  %11033 = vmatprep.subr.bf16.mxu1 %v13118_v23 }
 0xd52   :  { %v10648_v50 = vpop.f32.mrb[36].mxu1  ;;  %v10655_v55 = vpop.f32.mrb[32].mxu0 }
 0xd53   :  { %v13122_v10 = vadd.f32 %v10648_v50, %v11694_v8  ;;  %v13125_v31 = vadd.f32 %v10655_v55, %v11698_v11  ;;  %v7241_v63 = vpop.f32.mrb[37].mxu1  ;;  %v7328_v43 = vpop.f32.mrb[33].mxu0 }
 0xd54   :  { %v13128_v42 = vadd.f32 %v7241_v63, %v11696_v9  ;;  %v13131_v17 = vadd.f32 %v7328_v43, %v11700_v12  ;;  %v13205_v55 = vpop.permute.xlu1 %6575  ;;  %v13209_v43 = vpop.permute.xlu0 %6577 }
 0xd55   :  { %v7868_v46 = vsel %vm3334_vm3, %v13125_v31, -inf  ;;  %v7862_v14 = vsel %vm3334_vm3, %v13122_v10, -inf }
 0xd56   :  { %7869 = vmax.xlane.f32.xlu0 %v7868_v46  ;;  %7863 = vmax.xlane.f32.xlu1 %v7862_v14  ;;  %v7859_v8 = vsel %vm3334_vm3, %v13128_v42, -inf  ;;  %v7865_v48 = vsel %vm3334_vm3, %v13131_v17, -inf }
 0xd58   :  { %v13207_v63 = vpop.permute.xlu1 %6585 }
 0xd5a   :  { %v10662_v11 = vpop.f32.mrb[38].mxu1  ;;  %7860 = vmax.xlane.f32.xlu0 %v7859_v8 }
 0xd5b   :  { %v13140_v60 = vadd.f32 %v10662_v11, %v11473_v34  ;;  %v10669_v9 = vpop.f32.mrb[34].mxu0  ;;  %v7415_v37 = vpop.f32.mrb[39].mxu1 }
 0xd5c   :  { %v13143_v12 = vadd.f32 %v10669_v9, %v11712_v21  ;;  %v13146_v18 = vadd.f32 %v7415_v37, %v11475_v35  ;;  %v7502_v25 = vpop.f32.mrb[35].mxu0  ;;  %v13211_v46 = vpop.permute.xlu1 %6583 }
 0xd5d   :  { %v13149_v5 = vadd.f32 %v7502_v25, %v11716_v24  ;;  %v7874_v1 = vsel %vm3334_vm3, %v13140_v60, -inf }
 0xd5e   :  { %7875 = vmax.xlane.f32.xlu1 %v7874_v1  ;;  %7866 = vmax.xlane.f32.xlu0 %v7865_v48  ;;  %v7871_v34 = vsel %vm3334_vm3, %v13146_v18, -inf  ;;  %v7880_v21 = vsel %vm3334_vm3, %v13143_v12, -inf }
 0xd5f   :  { %v7877_v35 = vsel %vm3334_vm3, %v13149_v5, -inf }
 0xd62   :  { %7872 = vmax.xlane.f32.xlu1 %v7871_v34  ;;  %7881 = vmax.xlane.f32.xlu0 %v7880_v21 }
 0xd66   :  { %7878 = vmax.xlane.f32.xlu0 %v7877_v35 }
 0xd78   :  { %v10676_v24 = vpop.f32.mrb[40].mxu1 }
 0xd79   :  { %v13162_v58 = vadd.f32 %v10676_v24, %v11477_v36  ;;  %v7589_v7 = vpop.f32.mrb[41].mxu1 }
 0xd7a   :  { %v13168_v39 = vadd.f32 %v7589_v7, %v13689_v0 }
 0xd7b   :  { %v10683_v51 = vpop.f32.mrb[36].mxu0  ;;  %v7886_v41 = vsel %vm3334_vm3, %v13162_v58, -inf }
 0xd7c   :  { %v13165_v4 = vadd.f32 %v10683_v51, %v13688_v57  ;;  %v7676_v52 = vpop.f32.mrb[37].mxu0  ;;  %7887 = vmax.xlane.f32.xlu1 %v7886_v41  ;;  %v7883_v36 = vsel %vm3334_vm3, %v13168_v39, -inf }
 0xd7d   :  { %v13171_v6 = vadd.f32 %v7676_v52, %v13703_v33 }
 0xd7e   :  { %v7892_v54 = vsel %vm3334_vm3, %v13165_v4, -inf }
 0xd7f   :  { %7893 = vmax.xlane.f32.xlu0 %v7892_v54  ;;  %v7889_v57 = vsel %vm3334_vm3, %v13171_v6, -inf }
 0xd80   :  { %7884 = vmax.xlane.f32.xlu1 %v7883_v36 }
 0xd83   :  { %7890 = vmax.xlane.f32.xlu0 %v7889_v57 }
 0xd84   :  { %v10690_v15 = vpop.f32.mrb[42].mxu1 }
 0xd85   :  { %v10697_v0 = vpop.f32.mrb[38].mxu0  ;;  %v13185_v16 = vadd.f32 %v10690_v15, %v13705_v29  ;;  %v7763_v2 = vpop.f32.mrb[43].mxu1 }
 0xd86   :  { %v13182_v38 = vadd.f32 %v10697_v0, %v13704_v53  ;;  %v7850_v3 = vpop.f32.mrb[39].mxu0  ;;  %v13188_v45 = vadd.f32 %v7763_v2, %v13706_v20 }
 0xd87   :  { %v13191_v62 = vadd.f32 %v7850_v3, %v13707_v40  ;;  %v7898_v56 = vsel %vm3334_vm3, %v13185_v16, -inf }
 0xd88   :  { %v7904_v28 = vsel %vm3334_vm3, %v13182_v38, -inf  ;;  %7899 = vmax.xlane.f32.xlu1 %v7898_v56  ;;  %v7895_v50 = vsel %vm3334_vm3, %v13188_v45, -inf }
 0xd89   :  { %7905 = vmax.xlane.f32.xlu0 %v7904_v28  ;;  %v7901_v59 = vsel %vm3334_vm3, %v13191_v62, -inf }
 0xd8c   :  { %7896 = vmax.xlane.f32.xlu1 %v7895_v50 }
 0xd8d   :  { %7902 = vmax.xlane.f32.xlu0 %v7901_v59 }
 0xd9d   :  { %6593 = vrot.lane.b32.xlu1 %v12733_v47, %s11306_s1 }
 0xda3   :  { %6591 = vrot.lane.b32.xlu0 %v12737_v27, %s11306_s1 }
 0xde3   :  { %v7864_v14 = vpop.xlane.xlu1 %7863  ;;  %v7870_v8 = vpop.xlane.xlu0 %7869 }
 0xde4   :  { %v7908_v11 = vsub.f32 %v13122_v10, %v7864_v14  ;;  %v7910_v9 = vsub.f32 %v13125_v31, %v7870_v8 }
 0xde6   :  { %v7925_v37 = vmul.f32 1.442695, %v7908_v11  ;;  %v7929_v25 = vmul.f32 1.442695, %v7910_v9 }
 0xde7   :  { %v7861_v47 = vpop.xlane.xlu0 %7860 }
 0xde8   :  { %11184 = vpow2.f32 %v7925_v37  ;;  %v7907_v27 = vsub.f32 %v13128_v42, %v7861_v47 }
 0xde9   :  { %11186 = vpow2.f32 %v7929_v25 }
 0xdea   :  { %v7923_v1 = vmul.f32 1.442695, %v7907_v27 }
 0xdeb   :  { %v7876_v48 = vpop.xlane.xlu1 %7875  ;;  %v7867_v34 = vpop.xlane.xlu0 %7866 }
 0xdec   :  { %11188 = vpow2.f32 %v7923_v1  ;;  %v7912_v21 = vsub.f32 %v13140_v60, %v7876_v48  ;;  %v7909_v35 = vsub.f32 %v13131_v17, %v7867_v34 }
 0xdee   :  { %v7927_v24 = vmul.f32 1.442695, %v7909_v35  ;;  %v7933_v51 = vmul.f32 1.442695, %v7912_v21 }
 0xdef   :  { %v7873_v10 = vpop.xlane.xlu1 %7872  ;;  %v7882_v7 = vpop.xlane.xlu0 %7881 }
 0xdf0   :  { %v7911_v31 = vsub.f32 %v13146_v18, %v7873_v10  ;;  %v7914_v52 = vsub.f32 %v13143_v12, %v7882_v7  ;;  %11190 = vpow2.f32 %v7927_v24 }
 0xdf1   :  { %11192 = vpow2.f32 %v7933_v51 }
 0xdf2   :  { %v13220_v33 = vpop.eup %11184  ;;  %v7937_v42 = vmul.f32 1.442695, %v7914_v52  ;;  %v7931_v41 = vmul.f32 1.442695, %v7911_v31 }
 0xdf3   :  { %v7879_v54 = vpop.xlane.xlu0 %7878  ;;  %v7958_v60 = vsel %vm3334_vm3, %v13220_v33, 0.0  ;;  %v13224_v36 = vpop.eup %11186 }
 0xdf4   :  { %v7913_v17 = vsub.f32 %v13149_v5, %v7879_v54  ;;  %7959 = vadd.xlane.f32.xlu0 %v7958_v60  ;;  %11194 = vpow2.f32 %v7937_v42  ;;  %v7964_v12 = vsel %vm3334_vm3, %v13224_v36, 0.0 }
 0xdf5   :  { %11196 = vpow2.f32 %v7931_v41 }
 0xdf6   :  { %v13227_v57 = vpop.eup %11188  ;;  %v7935_v18 = vmul.f32 1.442695, %v7913_v17 }
 0xdf7   :  { %v7955_v0 = vsel %vm3334_vm3, %v13227_v57, 0.0 }
 0xdf8   :  { %11198 = vpow2.f32 %v7935_v18  ;;  %7965 = vadd.xlane.f32.xlu0 %v7964_v12  ;;  %7956 = vadd.xlane.f32.xlu1 %v7955_v0 }
 0xdfa   :  { %v13233_v15 = vpop.eup %11190 }
 0xdfb   :  { %v7961_v5 = vsel %vm3334_vm3, %v13233_v15, 0.0  ;;  %v13237_v53 = vpop.eup %11192 }
 0xdfc   :  { %7962 = vadd.xlane.f32.xlu1 %v7961_v5  ;;  %v7970_v2 = vsel %vm3334_vm3, %v13237_v53, 0.0 }
 0xdfe   :  { %v13239_v29 = vpop.eup %11194 }
 0xdff   :  { %v7976_v3 = vsel %vm3334_vm3, %v13239_v29, 0.0  ;;  %v13245_v20 = vpop.eup %11196 }
 0xe00   :  { %7971 = vadd.xlane.f32.xlu1 %v7970_v2  ;;  %7977 = vadd.xlane.f32.xlu0 %v7976_v3  ;;  %v7967_v56 = vsel %vm3334_vm3, %v13245_v20, 0.0 }
 0xe02   :  { %v13247_v40 = vpop.eup %11198 }
 0xe03   :  { %v7973_v28 = vsel %vm3334_vm3, %v13247_v40, 0.0 }
 0xe04   :  { %7968 = vadd.xlane.f32.xlu1 %v7967_v56  ;;  %7974 = vadd.xlane.f32.xlu0 %v7973_v28 }
 0xe09   :  { %v7888_v59 = vpop.xlane.xlu1 %7887 }
 0xe0a   :  { %v7916_v50 = vsub.f32 %v13162_v58, %v7888_v59 }
 0xe0c   :  { %v7894_v14 = vpop.xlane.xlu0 %7893  ;;  %v7941_v11 = vmul.f32 1.442695, %v7916_v50 }
 0xe0d   :  { %v7918_v8 = vsub.f32 %v13165_v4, %v7894_v14  ;;  %v7885_v37 = vpop.xlane.xlu1 %7884 }
 0xe0e   :  { %11200 = vpow2.f32 %v7941_v11  ;;  %v7915_v25 = vsub.f32 %v13168_v39, %v7885_v37 }
 0xe0f   :  { %v7945_v9 = vmul.f32 1.442695, %v7918_v8 }
 0xe10   :  { %v7891_v47 = vpop.xlane.xlu0 %7890  ;;  %v7939_v1 = vmul.f32 1.442695, %v7915_v25 }
 0xe11   :  { %v7917_v27 = vsub.f32 %v13171_v6, %v7891_v47  ;;  %11202 = vpow2.f32 %v7945_v9 }
 0xe13   :  { %v7943_v48 = vmul.f32 1.442695, %v7917_v27 }
 0xe15   :  { %11204 = vpow2.f32 %v7943_v48  ;;  %v7900_v34 = vpop.xlane.xlu1 %7899 }
 0xe16   :  { %11206 = vpow2.f32 %v7939_v1  ;;  %v7906_v21 = vpop.xlane.xlu0 %7905  ;;  %v7920_v58 = vsub.f32 %v13185_v16, %v7900_v34 }
 0xe17   :  { %v7922_v4 = vsub.f32 %v13182_v38, %v7906_v21 }
 0xe18   :  { %v7949_v35 = vmul.f32 1.442695, %v7920_v58  ;;  %v13259_v51 = vpop.eup %11200 }
 0xe19   :  { %v7953_v24 = vmul.f32 1.442695, %v7922_v4  ;;  %v7897_v10 = vpop.xlane.xlu1 %7896  ;;  %v7982_v31 = vsel %vm3334_vm3, %v13259_v51, 0.0 }
 0xe1a   :  { %v7903_v39 = vpop.xlane.xlu0 %7902  ;;  %11208 = vpow2.f32 %v7949_v35  ;;  %v7919_v6 = vsub.f32 %v13188_v45, %v7897_v10  ;;  %7983 = vadd.xlane.f32.xlu0 %v7982_v31 }
 0xe1b   :  { %v7921_v7 = vsub.f32 %v13191_v62, %v7903_v39  ;;  %v13265_v52 = vpop.eup %11202  ;;  %11210 = vpow2.f32 %v7953_v24 }
 0xe1c   :  { %v7947_v16 = vmul.f32 1.442695, %v7919_v6  ;;  %v7988_v41 = vsel %vm3334_vm3, %v13265_v52, 0.0 }
 0xe1d   :  { %v7951_v38 = vmul.f32 1.442695, %v7921_v7  ;;  %v13299_v56 = vpop.permute.xlu1 %6593 }
 0xe1e   :  { %11212 = vpow2.f32 %v7947_v16  ;;  %7989 = vadd.xlane.f32.xlu0 %v7988_v41  ;;  %v13297_v28 = vpop.permute.xlu0 %6591 }
 0xe1f   :  { %v13267_v42 = vpop.eup %11204  ;;  %11214 = vpow2.f32 %v7951_v38 }
 0xe20   :  { %v13271_v54 = vpop.eup %11206  ;;  %v7985_v45 = vsel %vm3334_vm3, %v13267_v42, 0.0 }
 0xe21   :  { %7986 = vadd.xlane.f32.xlu1 %v7985_v45  ;;  %v7979_v62 = vsel %vm3334_vm3, %v13271_v54, 0.0 }
 0xe22   :  { %7980 = vadd.xlane.f32.xlu0 %v7979_v62 }
 0xe24   :  { %v13277_v60 = vpop.eup %11208 }
 0xe25   :  { %v13279_v17 = vpop.eup %11210  ;;  %v7994_v18 = vsel %vm3334_vm3, %v13277_v60, 0.0 }
 0xe26   :  { %7995 = vadd.xlane.f32.xlu1 %v7994_v18  ;;  %v8000_v12 = vsel %vm3334_vm3, %v13279_v17, 0.0 }
 0xe27   :  { %8001 = vadd.xlane.f32.xlu0 %v8000_v12 }
 0xe28   :  { %v13285_v0 = vpop.eup %11212 }
 0xe29   :  { %v13287_v5 = vpop.eup %11214  ;;  %v7991_v2 = vsel %vm3334_vm3, %v13285_v0, 0.0 }
 0xe2a   :  { %7992 = vadd.xlane.f32.xlu1 %v7991_v2  ;;  %v7997_v3 = vsel %vm3334_vm3, %v13287_v5, 0.0 }
 0xe2b   :  { %7998 = vadd.xlane.f32.xlu0 %v7997_v3 }
 0xe3b   :  { %6601 = vrot.lane.b32.xlu1 %v12741_v13, %s11306_s1 }
 0xe41   :  { %6599 = vrot.lane.b32.xlu0 %v12745_v22, %s11306_s1 }
 0xe81   :  { %v7960_v59 = vpop.xlane.xlu0 %7959 }
 0xe82   :  { %11216 = vrcp.f32 %v7960_v59 }
 0xe85   :  { %v7957_v50 = vpop.xlane.xlu1 %7956  ;;  %v7966_v14 = vpop.xlane.xlu0 %7965 }
 0xe86   :  { %11218 = vrcp.f32 %v7957_v50 }
 0xe87   :  { %11220 = vrcp.f32 %v7966_v14 }
 0xe89   :  { %v7963_v8 = vpop.xlane.xlu1 %7962 }
 0xe8a   :  { %11222 = vrcp.f32 %v7963_v8 }
 0xe8c   :  { %v11217_v11 = vpop.eup %11216 }
 0xe8d   :  { %v8020_v9 = vmul.f32 %v11217_v11, %v7960_v59  ;;  %v7972_v37 = vpop.xlane.xlu1 %7971  ;;  %v7978_v25 = vpop.xlane.xlu0 %7977 }
 0xe8e   :  { %11224 = vrcp.f32 %v7972_v37 }
 0xe8f   :  { %v8036_v47 = vsub.f32 2.0, %v8020_v9  ;;  %11226 = vrcp.f32 %v7978_v25 }
 0xe90   :  { %v11219_v13 = vpop.eup %11218 }
 0xe91   :  { %v11221_v22 = vpop.eup %11220  ;;  %v8019_v27 = vmul.f32 %v11219_v13, %v7957_v50  ;;  %v7969_v48 = vpop.xlane.xlu1 %7968  ;;  %v8052_v58 = vmul.f32 %v11217_v11, %v8036_v47 }
 0xe92   :  { %v8022_v1 = vmul.f32 %v11221_v22, %v7966_v14  ;;  %v7975_v34 = vpop.xlane.xlu0 %7974  ;;  %11228 = vrcp.f32 %v7969_v48 }
 0xe93   :  { %v8035_v21 = vsub.f32 2.0, %v8019_v27  ;;  %11230 = vrcp.f32 %v7975_v34  ;;  %v8068_v6 = vmul.f32 %v13220_v33, %v8052_v58  ;;  %v6824_v58 = vcombine.high %v13209_v43, %v13299_v56 }
 0xe94   :  { %v11223_v4 = vpop.eup %11222  ;;  %v8038_v24 = vsub.f32 2.0, %v8022_v1 }
 0xe95   :  { %v8051_v35 = vmul.f32 %v11219_v13, %v8035_v21  ;;  %v8021_v10 = vmul.f32 %v11223_v4, %v7963_v8 }
 0xe96   :  { %v8054_v16 = vmul.f32 %v11221_v22, %v8038_v24 }
 0xe97   :  { %v8067_v39 = vmul.f32 %v13227_v57, %v8051_v35  ;;  %v8037_v7 = vsub.f32 2.0, %v8021_v10 }
 0xe98   :  { %v11225_v31 = vpop.eup %11224  ;;  %v8070_v33 = vmul.f32 %v13224_v36, %v8054_v16 }
 0xe99   :  { %10702 = vmatprep.mubr.msk.f32.mxu1 %vm3334_vm3, %v8067_v39  ;;  %v11227_v38 = vpop.eup %11226  ;;  %v8053_v41 = vmul.f32 %v11223_v4, %v8037_v7  ;;  %v8024_v45 = vmul.f32 %v11225_v31, %v7972_v37  ;;  %v6755_v4 = vcombine.low %v13205_v55, %v13297_v28 }
 0xe9a   :  { %10703 = vmatmul.mubr.msk.f32.vlgmr.msra.gmra.mrb[44].mxu1 %vm3334_vm3, %v8068_v6  ;;  %v8026_v62 = vmul.f32 %v11227_v38, %v7978_v25 }
 0xe9b   :  { %11035 = vmatpush3.bf16.msra.mxu1 %v13118_v23  ;;  %v8069_v18 = vmul.f32 %v13233_v15, %v8053_v41  ;;  %v8040_v12 = vsub.f32 2.0, %v8024_v45  ;;  %v6838_v45 = vrot.slane %v6824_v58, %v11606_v19 }
 0xe9c   :  { %11041 = vmatprep.subr.bf16.mxu1 %v13114_v30  ;;  %v11229_v57 = vpop.eup %11228  ;;  %v8042_v3 = vsub.f32 2.0, %v8026_v62 }
 0xe9d   :  { %v11231_v2 = vpop.eup %11230  ;;  %v8023_v59 = vmul.f32 %v11229_v57, %v7969_v48  ;;  %10709 = vmatprep.mubr.msk.f32.mxu1 %vm3334_vm3, %v8069_v18  ;;  %v8056_v23 = vmul.f32 %v11225_v31, %v8040_v12  ;;  %v6823_v48 = vcombine.low %v13209_v43, %v13299_v56 }
 0xe9e   :  { %v8025_v50 = vmul.f32 %v11231_v2, %v7975_v34  ;;  %10710 = vmatmul.mubr.msk.f32.vlgmr.msra.gmra.mrb[46].mxu1 %vm3334_vm3, %v8070_v33  ;;  %v8058_v15 = vmul.f32 %v11227_v38, %v8042_v3  ;;  %v6763_v3 = vrot.slane %v6755_v4, %v11606_v19 }
 0xe9f   :  { %v8039_v14 = vsub.f32 2.0, %v8023_v59  ;;  %11043 = vmatpush3.bf16.msra.mxu1 %v13114_v30  ;;  %v8072_v36 = vmul.f32 %v13237_v53, %v8056_v23  ;;  %v6831_v31 = vrot.slane %v6823_v48, %v11606_v19 }
 0xea0   :  { %v8041_v8 = vsub.f32 2.0, %v8025_v50  ;;  %v8074_v13 = vmul.f32 %v13239_v29, %v8058_v15 }
 0xea1   :  { %v8055_v11 = vmul.f32 %v11229_v57, %v8039_v14 }
 0xea2   :  { %v8057_v9 = vmul.f32 %v11231_v2, %v8041_v8  ;;  %v6756_v2 = vcombine.high %v13205_v55, %v13297_v28 }
 0xea3   :  { %v8071_v37 = vmul.f32 %v13245_v20, %v8055_v11 }
 0xea4   :  { %v8073_v25 = vmul.f32 %v13247_v40, %v8057_v9 }
 0xea5   :  { %10716 = vmatprep.mubr.msk.f32.mxu0 %vm3334_vm3, %v8071_v37 }
 0xea6   :  { %10723 = vmatprep.mubr.msk.f32.mxu1 %vm3334_vm3, %v8073_v25  ;;  %10717 = vmatmul.mubr.msk.f32.vlgmr.msra.gmra.mrb[40].mxu0 %vm3334_vm3, %v8072_v36  ;;  %v6770_v36 = vrot.slane %v6756_v2, %v11606_v19 }
 0xea7   :  { %10724 = vmatmul.mubr.msk.f32.vlgmr.msra.gmra.mrb[48].mxu1 %vm3334_vm3, %v8074_v13  ;;  %v13320_v30 = vpop.xlane.xlu0 %7983 }
 0xeab   :  { %v13322_v47 = vpop.xlane.xlu0 %7989 }
 0xeae   :  { %v7987_v22 = vpop.xlane.xlu1 %7986 }
 0xeaf   :  { %11232 = vrcp.f32 %v7987_v22  ;;  %v7981_v20 = vpop.xlane.xlu0 %7980 }
 0xeb0   :  { %11234 = vrcp.f32 %v7981_v20 }
 0xeb1   :  { %11236 = vrcp.f32 %v13320_v30 }
 0xeb2   :  { %11238 = vrcp.f32 %v13322_v47 }
 0xeb3   :  { %v13324_v53 = vpop.xlane.xlu1 %7995 }
 0xeb4   :  { %v13326_v40 = vpop.xlane.xlu0 %8001 }
 0xeb7   :  { %v13328_v29 = vpop.xlane.xlu1 %7992 }
 0xeb8   :  { %v13330_v1 = vpop.xlane.xlu0 %7998  ;;  %11240 = vrcp.f32 %v13328_v29 }
 0xeb9   :  { %v11233_v27 = vpop.eup %11232  ;;  %11242 = vrcp.f32 %v13330_v1 }
 0xeba   :  { %v8029_v34 = vmul.f32 %v11233_v27, %v7987_v22  ;;  %v11235_v21 = vpop.eup %11234  ;;  %11244 = vrcp.f32 %v13324_v53 }
 0xebb   :  { %v6602_v24 = vpop.permute.xlu1 %6601  ;;  %v8027_v10 = vmul.f32 %v11235_v21, %v7981_v20  ;;  %11246 = vrcp.f32 %v13326_v40 }
 0xebc   :  { %v8045_v35 = vsub.f32 2.0, %v8029_v34  ;;  %v6839_v39 = vcombine.low %v13207_v63, %v6602_v24  ;;  %v6840_v6 = vcombine.high %v13207_v63, %v6602_v24  ;;  %v6600_v7 = vpop.permute.xlu0 %6599 }
 0xebd   :  { %v6771_v43 = vcombine.low %v13211_v46, %v6600_v7  ;;  %v8043_v56 = vsub.f32 2.0, %v8027_v10  ;;  %v6772_v63 = vcombine.high %v13211_v46, %v6600_v7 }
 0xebe   :  { %v8061_v16 = vmul.f32 %v11233_v27, %v8045_v35  ;;  %v6847_v38 = vrot.slane %v6839_v39, %v11606_v19  ;;  %v6854_v41 = vrot.slane %v6840_v6, %v11606_v19 }
 0xebf   :  { %v8059_v18 = vmul.f32 %v11235_v21, %v8043_v56  ;;  %v6779_v12 = vrot.slane %v6771_v43, %v11606_v19  ;;  %v6786_v15 = vrot.slane %v6772_v63, %v11606_v19 }
 0xec0   :  { %v8077_v62 = vmul.f32 %v13267_v42, %v8061_v16  ;;  %v6855_v57 = vcombine.low %v6831_v31, %v6847_v38  ;;  %v6856_v33 = vcombine.high %v6831_v31, %v6847_v38  ;;  %v6871_v59 = vcombine.low %v6838_v45, %v6854_v41 }
 0xec1   :  { %v6872_v50 = vcombine.high %v6838_v45, %v6854_v41  ;;  %v8075_v42 = vmul.f32 %v13271_v54, %v8059_v18  ;;  %v6787_v11 = vcombine.low %v6763_v3, %v6779_v12  ;;  %v11237_v54 = vpop.eup %11236  ;;  %v6788_v48 = vcombine.high %v6763_v3, %v6779_v12 }
 0xec2   :  { %10737 = vmatprep.mubr.msk.f32.mxu1 %vm3334_vm3, %v8077_v62  ;;  %v6863_v46 = vrot.slane %v6855_v57, %v11618_v26  ;;  %v6870_v14 = vrot.slane %v6856_v33, %v11618_v26  ;;  %v6879_v23 = vrot.slane %v6871_v59, %v11618_v26  ;;  %v11239_v13 = vpop.eup %11238  ;;  %v6803_v58 = vcombine.low %v6770_v36, %v6786_v15 }
 0xec3   :  { %v6886_v55 = vrot.slane %v6872_v50, %v11618_v26  ;;  %10730 = vmatprep.mubr.msk.f32.mxu0 %vm3334_vm3, %v8075_v42  ;;  %v11241_v34 = vpop.eup %11240  ;;  %v6795_v21 = vrot.slane %v6787_v11, %v11618_v26  ;;  %v6804_v4 = vcombine.high %v6770_v36, %v6786_v15  ;;  %v6802_v24 = vrot.slane %v6788_v48, %v11618_v26 }
 0xec4   :  { %v7095_v28 = vcombine.low %v6863_v46, %v6870_v14  ;;  %v10069_v8 = vcombine.high %v6863_v46, %v6870_v14  ;;  %v11243_v35 = vpop.eup %11242  ;;  %v6811_v10 = vrot.slane %v6803_v58, %v11618_v26  ;;  %v8028_v56 = vmul.f32 %v11237_v54, %v13320_v30 }
 0xec5   :  { %v7111_v9 = vcombine.low %v6879_v23, %v6886_v55  ;;  %v10070_v37 = vcombine.high %v6879_v23, %v6886_v55  ;;  %v6818_v39 = vrot.slane %v6804_v4, %v11618_v26  ;;  %v7027_v6 = vcombine.low %v6795_v21, %v6802_v24  ;;  %v11245_v43 = vpop.eup %11244 }
 0xec6   :  { %v7102_v25 = vrot.slane %v7095_v28, %v11606_v19  ;;  %v7110_v22 = vrot.slane %v10069_v8, %v11606_v19  ;;  %v10067_v7 = vcombine.high %v6795_v21, %v6802_v24  ;;  %v8030_v38 = vmul.f32 %v11239_v13, %v13322_v47  ;;  %v11247_v62 = vpop.eup %11246 }
 0xec7   :  { %v7118_v20 = vrot.slane %v7111_v9, %v11606_v19  ;;  %v7126_v27 = vrot.slane %v10070_v37, %v11606_v19  ;;  %v7043_v41 = vcombine.low %v6811_v10, %v6818_v39  ;;  %v10068_v45 = vcombine.high %v6811_v10, %v6818_v39 }
 0xec8   :  { %v7127_v31 = vcombine.low %v7102_v25, %v7110_v22  ;;  %v8031_v63 = vmul.f32 %v11241_v34, %v13328_v29  ;;  %v8033_v18 = vmul.f32 %v11243_v35, %v13330_v1  ;;  %v7034_v57 = vrot.slane %v7027_v6, %v11606_v19 }
 0xec9   :  { %v7143_v16 = vcombine.low %v7118_v20, %v7126_v27  ;;  %v7042_v33 = vrot.slane %v10067_v7, %v11606_v19  ;;  %v7050_v12 = vrot.slane %v7043_v41, %v11606_v19  ;;  %v7058_v2 = vrot.slane %v10068_v45, %v11606_v19 }
 0xeca   :  { %v7128_v3 = vcombine.high %v7102_v25, %v7110_v22  ;;  %v7144_v59 = vcombine.high %v7118_v20, %v7126_v27  ;;  %v7135_v47 = vrot.slane %v7127_v31, %v11618_v26  ;;  %v8044_v46 = vsub.f32 2.0, %v8028_v56 }
 0xecb   :  { %v7059_v30 = vcombine.low %v7034_v57, %v7042_v33  ;;  %v7151_v50 = vrot.slane %v7143_v16, %v11618_v26  ;;  %v7060_v42 = vcombine.high %v7034_v57, %v7042_v33  ;;  %v8046_v29 = vsub.f32 2.0, %v8030_v38 }
 0xecc   :  { %v7075_v14 = vcombine.low %v7050_v12, %v7058_v2  ;;  %v7076_v1 = vcombine.high %v7050_v12, %v7058_v2  ;;  %v8032_v23 = vmul.f32 %v11245_v43, %v13324_v53  ;;  %v8034_v55 = vmul.f32 %v11247_v62, %v13326_v40 }
 0xecd   :  { %v7067_v28 = vrot.slane %v7059_v30, %v11618_v26  ;;  %v7074_v8 = vrot.slane %v7060_v42, %v11618_v26  ;;  %v7142_v9 = vrot.slane %v7128_v3, %v11618_v26  ;;  %v7158_v37 = vrot.slane %v7144_v59, %v11618_v26 }
 0xece   :  { %v7083_v15 = vrot.slane %v7075_v14, %v11618_v26  ;;  %v7090_v11 = vrot.slane %v7076_v1, %v11618_v26  ;;  %v8047_v36 = vsub.f32 2.0, %v8031_v63  ;;  %v8049_v25 = vsub.f32 2.0, %v8033_v18 }
 0xecf   :  { %v7159_v22 = vcombine.low %v7135_v47, %v7151_v50  ;;  %v7160_v20 = vcombine.high %v7135_v47, %v7151_v50  ;;  %v8060_v21 = vmul.f32 %v11237_v54, %v8044_v46  ;;  %v8062_v58 = vmul.f32 %v11239_v13, %v8046_v29 }
 0xed0   :  { %v7091_v27 = vcombine.low %v7067_v28, %v7083_v15  ;;  %v7092_v53 = vcombine.high %v7067_v28, %v7083_v15  ;;  %v7093_v48 = vcombine.low %v7074_v8, %v7090_v11  ;;  %v7094_v40 = vcombine.high %v7074_v8, %v7090_v11 }
 0xed1   :  { %v8048_v4 = vsub.f32 2.0, %v8032_v23  ;;  %v7161_v39 = vcombine.low %v7142_v9, %v7158_v37  ;;  %v7162_v6 = vcombine.high %v7142_v9, %v7158_v37  ;;  %v8063_v7 = vmul.f32 %v11241_v34, %v8047_v36 }
 0xed2   :  { %v11044_v24 = vpack.c.bf16 %v7159_v22, %v7091_v27  ;;  %v11048_v10 = vpack.c.bf16 %v7160_v20, %v7092_v53  ;;  %v8050_v31 = vsub.f32 2.0, %v8034_v55  ;;  %v8065_v16 = vmul.f32 %v11243_v35, %v8049_v25 }
 0xed3   :  { %v11052_v56 = vpack.c.bf16 %v7161_v39, %v7093_v48  ;;  %v11056_v38 = vpack.c.bf16 %v7162_v6, %v7094_v40  ;;  %v8076_v41 = vmul.f32 %v13259_v51, %v8060_v21  ;;  %v8078_v45 = vmul.f32 %v13265_v52, %v8062_v58 }
 0xed4   :  { %11045 = vmatprep.subr.bf16.mxu0 %v11044_v24  ;;  %11049 = vmatprep.subr.bf16.mxu1 %v11048_v10  ;;  %v8064_v54 = vmul.f32 %v11245_v43, %v8048_v4  ;;  %v8079_v13 = vmul.f32 %v13285_v0, %v8063_v7  ;;  %v8066_v63 = vmul.f32 %v11247_v62, %v8050_v31 }
 0xed5   :  { %11047 = vmatpush3.bf16.msra.mxu0 %v11044_v24  ;;  %11051 = vmatpush3.bf16.msra.mxu1 %v11048_v10  ;;  %v8081_v34 = vmul.f32 %v13287_v5, %v8065_v16 }
 0xed6   :  { %11053 = vmatprep.subr.bf16.mxu0 %v11052_v56  ;;  %11057 = vmatprep.subr.bf16.mxu1 %v11056_v38  ;;  %v8080_v35 = vmul.f32 %v13277_v60, %v8064_v54  ;;  %v8082_v51 = vmul.f32 %v13279_v17, %v8066_v63 }
 0xed8   :  { %10731 = vmatmul.mubr.msk.f32.vlgmr.msra.gmra.mrb[42].mxu0 %vm3334_vm3, %v8076_v41  ;;  %10738 = vmatmul.mubr.msk.f32.vlgmr.msra.gmra.mrb[50].mxu1 %vm3334_vm3, %v8078_v45 }
 0xed9   :  { %11055 = vmatpush3.bf16.msra.mxu0 %v11052_v56  ;;  %10744 = vmatprep.mubr.msk.f32.mxu0 %vm3334_vm3, %v8079_v13 }
 0xeda   :  { %11059 = vmatpush3.bf16.msra.mxu1 %v11056_v38  ;;  %10751 = vmatprep.mubr.msk.f32.mxu1 %vm3334_vm3, %v8081_v34 }
 0xedc   :  { %10745 = vmatmul.mubr.msk.f32.vlgmr.msra.gmra.mrb[44].mxu0 %vm3334_vm3, %v8080_v35 }
 0xedd   :  { %10752 = vmatmul.mubr.msk.f32.vlgmr.msra.gmra.mrb[52].mxu1 %vm3334_vm3, %v8082_v51 }
 0xf6d   :  { %v10704_v52 = vpop.f32.mrb[44].mxu1 }
 0xf6e   :  { %v8155_v0 = vpop.f32.mrb[45].mxu1 }
 0xf71   :  { %v10711_v5 = vpop.f32.mrb[46].mxu1 }
 0xf72   :  { %v8236_v43 = vpop.f32.mrb[47].mxu1 }
 0xf79   :  { %v10718_v62 = vpop.f32.mrb[40].mxu0 }
 0xf7a   :  { %v8799_v18 = vcombine.low %v10704_v52, %v10718_v62  ;;  %v8800_v57 = vcombine.high %v10704_v52, %v10718_v62  ;;  %v10725_v33 = vpop.f32.mrb[48].mxu1  ;;  %v8317_v12 = vpop.f32.mrb[41].mxu0 }
 0xf7b   :  { %v8815_v2 = vcombine.low %v10711_v5, %v10725_v33  ;;  %v8816_v60 = vcombine.high %v10711_v5, %v10725_v33  ;;  %v8731_v3 = vcombine.low %v8155_v0, %v8317_v12  ;;  %v8732_v59 = vcombine.high %v8155_v0, %v8317_v12  ;;  %v8398_v30 = vpop.f32.mrb[49].mxu1 }
 0xf7c   :  { %v8807_v17 = vrot.slane %v8799_v18, %v11606_v19  ;;  %v8814_v47 = vrot.slane %v8800_v57, %v11606_v19  ;;  %v8747_v50 = vcombine.low %v8236_v43, %v8398_v30  ;;  %v8748_v42 = vcombine.high %v8236_v43, %v8398_v30 }
 0xf7d   :  { %v8823_v46 = vrot.slane %v8815_v2, %v11606_v19  ;;  %v8830_v29 = vrot.slane %v8816_v60, %v11606_v19  ;;  %v8739_v14 = vrot.slane %v8731_v3, %v11606_v19  ;;  %v8746_v1 = vrot.slane %v8732_v59, %v11606_v19  ;;  %v10127_v60 = vld [vmem:[%s13650_s4 + $0x20] sm:$0xff] }
 0xf7e   :  { %v8755_v23 = vrot.slane %v8747_v50, %v11606_v19  ;;  %v8762_v55 = vrot.slane %v8748_v42, %v11606_v19  ;;  %v10129_v50 = vld [vmem:[%s13650_s4 + $0x30] sm:$0xff]  ;;  %v10130_v42 = vld [vmem:[%s13650_s4 + $0x38] sm:$0xff] }
 0xf7f   :  { %v8831_v28 = vcombine.low %v8807_v17, %v8823_v46  ;;  %v8832_v8 = vcombine.high %v8807_v17, %v8823_v46  ;;  %v8847_v15 = vcombine.low %v8814_v47, %v8830_v29  ;;  %v8848_v11 = vcombine.high %v8814_v47, %v8830_v29  ;;  %v10128_v47 = vld [vmem:[%s13650_s4 + $0x28] sm:$0xff] }
 0xf80   :  { %v8763_v9 = vcombine.low %v8739_v14, %v8755_v23  ;;  %v8764_v37 = vcombine.high %v8739_v14, %v8755_v23  ;;  %v8779_v36 = vcombine.low %v8746_v1, %v8762_v55  ;;  %v8780_v25 = vcombine.high %v8746_v1, %v8762_v55 }
 0xf81   :  { %v8839_v22 = vrot.slane %v8831_v28, %v11618_v26  ;;  %v8846_v20 = vrot.slane %v8832_v8, %v11618_v26  ;;  %v8855_v27 = vrot.slane %v8847_v15, %v11618_v26  ;;  %v8862_v53 = vrot.slane %v8848_v11, %v11618_v26 }
 0xf82   :  { %v8771_v48 = vrot.slane %v8763_v9, %v11618_v26  ;;  %v8778_v40 = vrot.slane %v8764_v37, %v11618_v26  ;;  %v8787_v21 = vrot.slane %v8779_v36, %v11618_v26  ;;  %v8794_v58 = vrot.slane %v8780_v25, %v11618_v26 }
 0xf83   :  { %v9071_v4 = vcombine.low %v8839_v22, %v8846_v20  ;;  %v10121_v24 = vcombine.high %v8839_v22, %v8846_v20  ;;  %v9087_v10 = vcombine.low %v8855_v27, %v8862_v53  ;;  %v10122_v39 = vcombine.high %v8855_v27, %v8862_v53 }
 0xf84   :  { %v9003_v6 = vcombine.low %v8771_v48, %v8778_v40  ;;  %v10119_v7 = vcombine.high %v8771_v48, %v8778_v40  ;;  %v9019_v31 = vcombine.low %v8787_v21, %v8794_v58  ;;  %v10120_v16 = vcombine.high %v8787_v21, %v8794_v58 }
 0xf85   :  { %v9078_v56 = vrot.slane %v9071_v4, %v11606_v19  ;;  %v9086_v38 = vrot.slane %v10121_v24, %v11606_v19  ;;  %v9094_v41 = vrot.slane %v9087_v10, %v11606_v19  ;;  %v9102_v45 = vrot.slane %v10122_v39, %v11606_v19 }
 0xf86   :  { %v9010_v54 = vrot.slane %v9003_v6, %v11606_v19  ;;  %v9018_v13 = vrot.slane %v10119_v7, %v11606_v19  ;;  %v9026_v63 = vrot.slane %v9019_v31, %v11606_v19  ;;  %v9034_v34 = vrot.slane %v10120_v16, %v11606_v19 }
 0xf87   :  { %v9103_v35 = vcombine.low %v9078_v56, %v9086_v38  ;;  %v9119_v51 = vcombine.low %v9094_v41, %v9102_v45  ;;  %v9104_v52 = vcombine.high %v9078_v56, %v9086_v38  ;;  %v9120_v0 = vcombine.high %v9094_v41, %v9102_v45 }
 0xf88   :  { %v9035_v5 = vcombine.low %v9010_v54, %v9018_v13  ;;  %v9051_v43 = vcombine.low %v9026_v63, %v9034_v34  ;;  %v9036_v62 = vcombine.high %v9010_v54, %v9018_v13  ;;  %v9052_v18 = vcombine.high %v9026_v63, %v9034_v34 }
 0xf89   :  { %v13429_v57 = vrot.slane %v9103_v35, %v11618_v26  ;;  %v13432_v33 = vrot.slane %v9119_v51, %v11618_v26  ;;  %v9118_v12 = vrot.slane %v9104_v52, %v11618_v26  ;;  %v9134_v2 = vrot.slane %v9120_v0, %v11618_v26 }
 0xf8a   :  { %v13440_v3 = vrot.slane %v9035_v5, %v11618_v26  ;;  %v13443_v59 = vrot.slane %v9051_v43, %v11618_v26  ;;  %v9050_v30 = vrot.slane %v9036_v62, %v11618_v26  ;;  %v9066_v17 = vrot.slane %v9052_v18, %v11618_v26 }
 0xf8b   :  { %v9136_v46 = vcombine.high %v13429_v57, %v13432_v33  ;;  %v9137_v29 = vcombine.low %v9118_v12, %v9134_v2  ;;  %v9138_v14 = vcombine.high %v9118_v12, %v9134_v2  ;;  %v9135_v1 = vcombine.low %v13429_v57, %v13432_v33 }
 0xf8c   :  { %v9068_v23 = vcombine.high %v13440_v3, %v13443_v59  ;;  %v9069_v55 = vcombine.low %v9050_v30, %v9066_v17  ;;  %v9070_v28 = vcombine.high %v9050_v30, %v9066_v17  ;;  %v9067_v8 = vcombine.low %v13440_v3, %v13443_v59 }
 0xf8d   :  { %9281 = vrot.lane.b32.xlu1 %v9136_v46, %s11307_s12  ;;  %v11060_v15 = vpack.c.bf16 %v10128_v47, %v10127_v60  ;;  %v11064_v11 = vpack.c.bf16 %v10130_v42, %v10129_v50 }
 0xf8e   :  { %9279 = vrot.lane.b32.xlu0 %v9068_v23, %s11307_s12 }
 0xf8f   :  { %11061 = vmatprep.subr.bf16.mxu0 %v11060_v15 }
 0xf90   :  { %11063 = vmatpush3.bf16.msra.mxu0 %v11060_v15 }
 0xf91   :  { %9297 = vrot.lane.b32.xlu1 %v9137_v29, %s11308_s13  ;;  %11065 = vmatprep.subr.bf16.mxu0 %v11064_v11 }
 0xf92   :  { %9295 = vrot.lane.b32.xlu0 %v9069_v55, %s11308_s13 }
 0xf94   :  { %11067 = vmatpush3.bf16.msra.mxu0 %v11064_v11 }
 0xf95   :  { %9313 = vrot.lane.b32.xlu1 %v9138_v14, %s11309_s14 }
 0xf96   :  { %9311 = vrot.lane.b32.xlu0 %v9070_v28, %s11309_s14 }
 0xfab   :  { %v10732_v9 = vpop.f32.mrb[42].mxu0  ;;  %v10739_v37 = vpop.f32.mrb[50].mxu1 }
 0xfac   :  { %v8479_v36 = vpop.f32.mrb[43].mxu0  ;;  %v8560_v25 = vpop.f32.mrb[51].mxu1 }
 0xfaf   :  { %v10746_v22 = vpop.f32.mrb[44].mxu0 }
 0xfb0   :  { %v8935_v20 = vcombine.low %v10732_v9, %v10746_v22  ;;  %v8936_v27 = vcombine.high %v10732_v9, %v10746_v22  ;;  %v10753_v53 = vpop.f32.mrb[52].mxu1  ;;  %v8641_v48 = vpop.f32.mrb[45].mxu0 }
 0xfb1   :  { %v8951_v40 = vcombine.low %v10739_v37, %v10753_v53  ;;  %v8952_v21 = vcombine.high %v10739_v37, %v10753_v53  ;;  %v8867_v58 = vcombine.low %v8479_v36, %v8641_v48  ;;  %v8868_v4 = vcombine.high %v8479_v36, %v8641_v48  ;;  %v8722_v24 = vpop.f32.mrb[53].mxu1 }
 0xfb2   :  { %v8943_v10 = vrot.slane %v8935_v20, %v11606_v19  ;;  %v8950_v39 = vrot.slane %v8936_v27, %v11606_v19  ;;  %v8883_v6 = vcombine.low %v8560_v25, %v8722_v24  ;;  %v8884_v7 = vcombine.high %v8560_v25, %v8722_v24 }
 0xfb3   :  { %v8959_v31 = vrot.slane %v8951_v40, %v11606_v19  ;;  %v8966_v16 = vrot.slane %v8952_v21, %v11606_v19  ;;  %v8875_v56 = vrot.slane %v8867_v58, %v11606_v19  ;;  %v8882_v38 = vrot.slane %v8868_v4, %v11606_v19 }
 0xfb4   :  { %v8891_v41 = vrot.slane %v8883_v6, %v11606_v19  ;;  %v8898_v45 = vrot.slane %v8884_v7, %v11606_v19 }
 0xfb5   :  { %v8967_v54 = vcombine.low %v8943_v10, %v8959_v31  ;;  %v8968_v13 = vcombine.high %v8943_v10, %v8959_v31  ;;  %v8983_v63 = vcombine.low %v8950_v39, %v8966_v16  ;;  %v8984_v34 = vcombine.high %v8950_v39, %v8966_v16 }
 0xfb6   :  { %v8899_v35 = vcombine.low %v8875_v56, %v8891_v41  ;;  %v8900_v51 = vcombine.high %v8875_v56, %v8891_v41  ;;  %v8915_v52 = vcombine.low %v8882_v38, %v8898_v45  ;;  %v8916_v0 = vcombine.high %v8882_v38, %v8898_v45 }
 0xfb7   :  { %v8975_v5 = vrot.slane %v8967_v54, %v11618_v26  ;;  %v8982_v43 = vrot.slane %v8968_v13, %v11618_v26  ;;  %v8991_v62 = vrot.slane %v8983_v63, %v11618_v26  ;;  %v8998_v18 = vrot.slane %v8984_v34, %v11618_v26 }
 0xfb8   :  { %v8907_v12 = vrot.slane %v8899_v35, %v11618_v26  ;;  %v8914_v2 = vrot.slane %v8900_v51, %v11618_v26  ;;  %v8923_v60 = vrot.slane %v8915_v52, %v11618_v26  ;;  %v8930_v30 = vrot.slane %v8916_v0, %v11618_v26 }
 0xfb9   :  { %v9207_v17 = vcombine.low %v8975_v5, %v8982_v43  ;;  %v10125_v47 = vcombine.high %v8975_v5, %v8982_v43  ;;  %v9223_v50 = vcombine.low %v8991_v62, %v8998_v18  ;;  %v10126_v42 = vcombine.high %v8991_v62, %v8998_v18 }
 0xfba   :  { %v9139_v46 = vcombine.low %v8907_v12, %v8914_v2  ;;  %v10123_v29 = vcombine.high %v8907_v12, %v8914_v2  ;;  %v9155_v14 = vcombine.low %v8923_v60, %v8930_v30  ;;  %v10124_v23 = vcombine.high %v8923_v60, %v8930_v30 }
 0xfbb   :  { %v9214_v55 = vrot.slane %v9207_v17, %v11606_v19  ;;  %v9222_v28 = vrot.slane %v10125_v47, %v11606_v19  ;;  %v9230_v15 = vrot.slane %v9223_v50, %v11606_v19  ;;  %v9238_v11 = vrot.slane %v10126_v42, %v11606_v19 }
 0xfbc   :  { %v9146_v9 = vrot.slane %v9139_v46, %v11606_v19  ;;  %v9154_v37 = vrot.slane %v10123_v29, %v11606_v19  ;;  %v9162_v36 = vrot.slane %v9155_v14, %v11606_v19  ;;  %v9170_v25 = vrot.slane %v10124_v23, %v11606_v19  ;;  %v10131_v46 = vld [vmem:[%s13653_s7 + $0x9] ss:$0 sm:$0xff] }
 0xfbd   :  { %v9239_v22 = vcombine.low %v9214_v55, %v9222_v28  ;;  %v9255_v20 = vcombine.low %v9230_v15, %v9238_v11  ;;  %v9240_v27 = vcombine.high %v9214_v55, %v9222_v28  ;;  %v9256_v53 = vcombine.high %v9230_v15, %v9238_v11 }
 0xfbe   :  { %v9171_v48 = vcombine.low %v9146_v9, %v9154_v37  ;;  %v9187_v40 = vcombine.low %v9162_v36, %v9170_v25  ;;  %v9172_v21 = vcombine.high %v9146_v9, %v9154_v37  ;;  %v9188_v58 = vcombine.high %v9162_v36, %v9170_v25 }
 0xfbf   :  { %v9247_v4 = vrot.slane %v9239_v22, %v11618_v26  ;;  %v9263_v24 = vrot.slane %v9255_v20, %v11618_v26  ;;  %v9254_v10 = vrot.slane %v9240_v27, %v11618_v26  ;;  %v9270_v39 = vrot.slane %v9256_v53, %v11618_v26 }
 0xfc0   :  { %v9179_v6 = vrot.slane %v9171_v48, %v11618_v26  ;;  %v9195_v19 = vrot.slane %v9187_v40, %v11618_v26  ;;  %v9186_v7 = vrot.slane %v9172_v21, %v11618_v26  ;;  %v9202_v31 = vrot.slane %v9188_v58, %v11618_v26 }
 0xfc1   :  { %v9272_v16 = vcombine.high %v9247_v4, %v9263_v24  ;;  %v9273_v56 = vcombine.low %v9254_v10, %v9270_v39  ;;  %v9274_v38 = vcombine.high %v9254_v10, %v9270_v39  ;;  %v9271_v41 = vcombine.low %v9247_v4, %v9263_v24 }
 0xfc2   :  { %v9204_v45 = vcombine.high %v9179_v6, %v9195_v19  ;;  %v9205_v54 = vcombine.low %v9186_v7, %v9202_v31  ;;  %v9206_v13 = vcombine.high %v9186_v7, %v9202_v31  ;;  %v9203_v63 = vcombine.low %v9179_v6, %v9195_v19  ;;  %v10139_v6 = vld [vmem:[%s13651_s5 + $0x28] sm:$0xff]  ;;  %v10140_v19 = vld [vmem:[%s13651_s5 + $0x30] sm:$0xff]  ;;  %v10141_v31 = vld [vmem:[%s13651_s5 + $0x38] sm:$0xff] }
 0xfc3   :  { %9285 = vrot.lane.b32.xlu1 %v9272_v16, %s11307_s12  ;;  %v11072_v16 = vpack.c.bf16 %v10141_v31, %v10140_v19 }
 0xfc4   :  { %9283 = vrot.lane.b32.xlu0 %v9204_v45, %s11307_s12 }
 0xfc7   :  { %9301 = vrot.lane.b32.xlu1 %v9273_v56, %s11308_s13 }
 0xfc8   :  { %9299 = vrot.lane.b32.xlu0 %v9205_v54, %s11308_s13 }
 0xfcb   :  { %9317 = vrot.lane.b32.xlu1 %v9274_v38, %s11309_s14 }
 0xfcc   :  { %9315 = vrot.lane.b32.xlu0 %v9206_v13, %s11309_s14 }
 0xfff   :  { %v9282_v26 = vpop.permute.xlu1 %9281 }
0x1000   :  { %v9280_v34 = vpop.permute.xlu0 %9279  ;;  %v9324_v5 = vsel %vm62_vm0, %v9135_v1, %v9282_v26 }
0x1001   :  { %v9323_v52 = vsel %vm62_vm0, %v9067_v8, %v9280_v34 }
0x1003   :  { %v9298_v35 = vpop.permute.xlu1 %9297 }
0x1004   :  { %v9296_v51 = vpop.permute.xlu0 %9295  ;;  %v9328_v18 = vsel %vm3334_vm3, %v9324_v5, %v9298_v35 }
0x1005   :  { %v9327_v43 = vsel %vm3334_vm3, %v9323_v52, %v9296_v51  ;;  %v10147_v51 = vld [vmem:[%s13652_s6 + $0x40] sm:$0xff]  ;;  %v10148_v52 = vld [vmem:[%s13652_s6 + $0x48] sm:$0xff] }
0x1006   :  { %v11076_v5 = vpack.c.bf16 %v10148_v52, %v10147_v51 }
0x1007   :  { %v9314_v0 = vpop.permute.xlu1 %9313 }
0x1008   :  { %v9312_v62 = vpop.permute.xlu0 %9311  ;;  %v9332_v2 = vsel %vm4807_vm4, %v9328_v18, %v9314_v0  ;;  %v10149_v0 = vld [vmem:[%s13652_s6 + $0x50] sm:$0xff]  ;;  %v10151_v18 = vld [vmem:[%s13652_s6 + $0x60] sm:$0xff]  ;;  %11077 = vmatprep.subr.bf16.mxu0 %v11076_v5 }
0x1009   :  { %v9331_v12 = vsel %vm4807_vm4, %v9327_v43, %v9312_v62  ;;  %v10150_v43 = vld [vmem:[%s13652_s6 + $0x58] sm:$0xff] }
0x100a   :  { %10762 = vmatprep.mubr.msk.f32.mxu0 %vm772_vm2, %v9331_v12  ;;  %v11080_v62 = vpack.c.bf16 %v10150_v43, %v10149_v0  ;;  %v10152_v12 = vld [vmem:[%s13652_s6 + $0x68] sm:$0xff] }
0x100b   :  { %10763 = vmatmul.mubr.msk.f32.vlgmr.msra.gmra.mrb[46].mxu0 %vm772_vm2, %v9332_v2  ;;  %v11084_v2 = vpack.c.bf16 %v10152_v12, %v10151_v18 }
0x100c   :  { %11079 = vmatpush3.bf16.msra.mxu0 %v11076_v5 }
0x100d   :  { %11081 = vmatprep.subr.bf16.mxu0 %v11080_v62 }
0x1010   :  { %11083 = vmatpush3.bf16.msra.mxu0 %v11080_v62 }
0x1011   :  { %11085 = vmatprep.subr.bf16.mxu0 %v11084_v2 }
0x1014   :  { %11087 = vmatpush3.bf16.msra.mxu0 %v11084_v2 }
0x1035   :  { %v9286_v3 = vpop.permute.xlu1 %9285 }
0x1036   :  { %v9284_v59 = vpop.permute.xlu0 %9283  ;;  %v9326_v1 = vsel %vm62_vm0, %v9271_v41, %v9286_v3 }
0x1037   :  { %v9325_v57 = vsel %vm62_vm0, %v9203_v63, %v9284_v59 }
0x1039   :  { %v9302_v8 = vpop.permute.xlu1 %9301 }
0x103a   :  { %v9300_v60 = vpop.permute.xlu0 %9299  ;;  %v9330_v47 = vsel %vm3334_vm3, %v9326_v1, %v9302_v8 }
0x103b   :  { %v9329_v30 = vsel %vm3334_vm3, %v9325_v57, %v9300_v60 }
0x103d   :  { %v9318_v33 = vpop.permute.xlu1 %9317 }
0x103e   :  { %v9316_v17 = vpop.permute.xlu0 %9315  ;;  %v9334_v42 = vsel %vm4807_vm4, %v9330_v47, %v9318_v33 }
0x103f   :  { %v9333_v50 = vsel %vm4807_vm4, %v9329_v30, %v9316_v17  ;;  %v10136_v30 = vld [vmem:[%s13653_s7 + $0xc] ss:$0 sm:$0xff] }
0x1040   :  { %10765 = vmatprep.mubr.msk.f32.mxu0 %vm772_vm2, %v9333_v50 }
0x1041   :  { %10766 = vmatmul.mubr.msk.f32.gmra.mrb[48].mxu0 %vm772_vm2, %v9334_v42  ;;  %v10137_v42 = vld [vmem:[%s13653_s7 + $0xd] ss:$0 sm:$0xff] }
0x10de   :  { %v10764_v29 = vpop.f32.mrb[46].mxu0 }
0x10df   :  { %v9429_v14 = vadd.f32 %v10764_v29, %v10131_v46  ;;  %v9423_v23 = vpop.f32.mrb[47].mxu0 }
0x10e0   :  { %v9424_v55 = vadd.f32 %v10131_v46, %v9423_v23 }
0x10e1   :  { %v9443_v28 = vadd.f32 %v9429_v14, %v12623_v32 }
0x10e2   :  { %v9442_v15 = vadd.f32 %v9424_v55, %v12621_v44 }
0x10e3   :  { %v9451_v11 = vsel %vm772_vm2, %v9443_v28, 0.0 }
0x10e4   :  { %9452 = vadd.xlane.f32.xlu1 %v9451_v11  ;;  %v9448_v9 = vsel %vm772_vm2, %v9442_v15, 0.0 }
0x10e5   :  { %9449 = vadd.xlane.f32.xlu0 %v9448_v9 }
0x1114   :  { %v10767_v37 = vpop.f32.mrb[48].mxu0 }
0x1115   :  { %v9439_v36 = vadd.f32 %v10767_v37, %v10131_v46  ;;  %v9433_v25 = vpop.f32.mrb[49].mxu0 }
0x1116   :  { %v9434_v22 = vadd.f32 %v10131_v46, %v9433_v25 }
0x1117   :  { %v9445_v27 = vadd.f32 %v9439_v36, %v12631_v49  ;;  %v10138_v49 = vld [vmem:[%s13651_s5 + $0x20] sm:$0xff] }
0x1118   :  { %v9444_v20 = vadd.f32 %v9434_v22, %v12629_v61  ;;  %v11068_v7 = vpack.c.bf16 %v10139_v6, %v10138_v49 }
0x1119   :  { %v9457_v32 = vsel %vm772_vm2, %v9445_v27, 0.0 }
0x111a   :  { %v9454_v53 = vsel %vm772_vm2, %v9444_v20, 0.0  ;;  %11069 = vmatprep.subr.bf16.mxu1 %v11068_v7 }
0x111b   :  { %9455 = vadd.xlane.f32.xlu0 %v9454_v53  ;;  %11071 = vmatpush3.bf16.msra.mxu1 %v11068_v7 }
0x111c   :  { %11073 = vmatprep.subr.bf16.mxu1 %v11072_v16 }
0x111f   :  { %9458 = vadd.xlane.f32.xlu0 %v9457_v32  ;;  %11075 = vmatpush3.bf16.msra.mxu1 %v11072_v16 }
0x1171   :  { %v9453_v44 = vpop.xlane.xlu1 %9452 }
0x1172   :  { %v9461_v48 = vmul.f32 0.03125, %v9453_v44  ;;  %v9450_v40 = vpop.xlane.xlu0 %9449 }
0x1173   :  { %v9460_v21 = vmul.f32 0.03125, %v9450_v40  ;;  %v10154_v40 = vld [vmem:[%s13652_s6 + $0x78] sm:$0xff] }
0x1174   :  { %v9465_v58 = vsub.f32 %v9443_v28, %v9461_v48  ;;  %v10153_v48 = vld [vmem:[%s13652_s6 + $0x70] sm:$0xff] }
0x1175   :  { %v9464_v4 = vsub.f32 %v9442_v15, %v9460_v21  ;;  %v11088_v21 = vpack.c.bf16 %v10154_v40, %v10153_v48 }
0x1176   :  { %v9469_v24 = vmul.f32 %v9465_v58, %v9465_v58 }
0x1177   :  { %v9468_v10 = vmul.f32 %v9464_v4, %v9464_v4  ;;  %11089 = vmatprep.subr.bf16.mxu0 %v11088_v21 }
0x1178   :  { %v9475_v39 = vsel %vm772_vm2, %v9469_v24, 0.0  ;;  %11091 = vmatpush3.bf16.msra.mxu0 %v11088_v21 }
0x1179   :  { %9476 = vadd.xlane.f32.xlu0 %v9475_v39  ;;  %v9472_v61 = vsel %vm772_vm2, %v9468_v10, 0.0 }
0x117a   :  { %9473 = vadd.xlane.f32.xlu1 %v9472_v61 }
0x11a8   :  { %v9456_v56 = vpop.xlane.xlu0 %9455 }
0x11a9   :  { %v9462_v38 = vmul.f32 0.03125, %v9456_v56 }
0x11ab   :  { %v9466_v41 = vsub.f32 %v9444_v20, %v9462_v38  ;;  %v10155_v38 = vld [vmem:[%s13653_s7 + $0xb] ss:$0 sm:$0xff] }
0x11ac   :  { %v9459_v45 = vpop.xlane.xlu0 %9458 }
0x11ad   :  { %v9463_v54 = vmul.f32 0.03125, %v9459_v45  ;;  %v9470_v13 = vmul.f32 %v9466_v41, %v9466_v41 }
0x11af   :  { %v9467_v63 = vsub.f32 %v9445_v27, %v9463_v54  ;;  %v9478_v26 = vsel %vm772_vm2, %v9470_v13, 0.0 }
0x11b0   :  { %9479 = vadd.xlane.f32.xlu1 %v9478_v26 }
0x11b1   :  { %v9471_v34 = vmul.f32 %v9467_v63, %v9467_v63 }
0x11b3   :  { %v9481_v35 = vsel %vm772_vm2, %v9471_v34, 0.0 }
0x11b4   :  { %9482 = vadd.xlane.f32.xlu0 %v9481_v35 }
0x1206   :  { %v9477_v3 = vpop.xlane.xlu0 %9476 }
0x1207   :  { %v9485_v59 = vmul.f32 0.03125, %v9477_v3  ;;  %v9474_v8 = vpop.xlane.xlu1 %9473 }
0x1208   :  { %v9484_v60 = vmul.f32 0.03125, %v9474_v8 }
0x1209   :  { %v9489_v57 = vadd.f32 1e-05, %v9485_v59 }
0x120a   :  { %v9488_v33 = vadd.f32 1e-05, %v9484_v60 }
0x120b   :  { %11248 = vrsqrt.f32 %v9489_v57 }
0x120c   :  { %11250 = vrsqrt.f32 %v9488_v33 }
0x1215   :  { %v11249_v1 = vpop.eup %11248 }
0x1216   :  { %v11251_v17 = vpop.eup %11250  ;;  %v9497_v47 = vmul.f32 %v11249_v1, %v9465_v58  ;;  %v10142_v58 = vld [vmem:[%s13653_s7 + $0xa] ss:$0 sm:$0xff] }
0x1217   :  { %v9496_v50 = vmul.f32 %v11251_v17, %v9464_v4 }
0x1218   :  { %v9505_v46 = vmul.f32 %v10136_v30, %v9497_v47 }
0x1219   :  { %v9504_v29 = vmul.f32 %v10136_v30, %v9496_v50 }
0x121a   :  { %v9513_v23 = vadd.f32 %v10137_v42, %v9505_v46 }
0x121b   :  { %v9512_v14 = vadd.f32 %v10137_v42, %v9504_v29 }
0x121d   :  { %10776 = vmatprep.mubr.msk.f32.mxu1 %vm772_vm2, %v9512_v14 }
0x121e   :  { %10777 = vmatmul.mubr.msk.f32.vlgmr.msra.gmra.mrb[54].mxu1 %vm772_vm2, %v9513_v23 }
0x123d   :  { %v9480_v55 = vpop.xlane.xlu1 %9479 }
0x123e   :  { %v9486_v28 = vmul.f32 0.03125, %v9480_v55 }
0x1240   :  { %v9490_v15 = vadd.f32 1e-05, %v9486_v28 }
0x1241   :  { %v9483_v11 = vpop.xlane.xlu0 %9482 }
0x1242   :  { %11252 = vrsqrt.f32 %v9490_v15  ;;  %v9487_v9 = vmul.f32 0.03125, %v9483_v11 }
0x1244   :  { %v9491_v37 = vadd.f32 1e-05, %v9487_v9 }
0x1246   :  { %11254 = vrsqrt.f32 %v9491_v37 }
0x124c   :  { %v11253_v36 = vpop.eup %11252 }
0x124d   :  { %v9498_v25 = vmul.f32 %v11253_v36, %v9466_v41 }
0x124f   :  { %v9506_v22 = vmul.f32 %v10136_v30, %v9498_v25 }
0x1250   :  { %v11255_v20 = vpop.eup %11254 }
0x1251   :  { %v9514_v27 = vadd.f32 %v10137_v42, %v9506_v22  ;;  %v9499_v53 = vmul.f32 %v11255_v20, %v9467_v63 }
0x1253   :  { %10779 = vmatprep.mubr.msk.f32.mxu1 %vm772_vm2, %v9514_v27  ;;  %v9507_v32 = vmul.f32 %v10136_v30, %v9499_v53 }
0x1255   :  { %v9515_v44 = vadd.f32 %v10137_v42, %v9507_v32 }
0x1257   :  { %10780 = vmatmul.mubr.msk.f32.gmra.mrb[56].mxu1 %vm772_vm2, %v9515_v44 }
0x12f1   :  { %v10778_v4 = vpop.f32.mrb[54].mxu1 }
0x12f2   :  { %v9610_v24 = vadd.f32 %v10778_v4, %v10142_v58  ;;  %v9604_v10 = vpop.f32.mrb[55].mxu1 }
0x12f3   :  { %v9605_v39 = vadd.f32 %v10142_v58, %v9604_v10 }
0x12f4   :  { %v9624_v49 = vmax.f32 %v9610_v24, 0.0 }
0x12f5   :  { %v9623_v61 = vmax.f32 %v9605_v39, 0.0 }
0x12f7   :  { %10798 = vmatprep.mubr.msk.f32.mxu0 %vm5116_vm5, %v9623_v61 }
0x12f8   :  { %10799 = vmatmul.mubr.msk.f32.vlgmr.msra.gmra.mrb[50].mxu0 %vm5116_vm5, %v9624_v49 }
0x132a   :  { %v10781_v6 = vpop.f32.mrb[56].mxu1 }
0x132b   :  { %v9620_v19 = vadd.f32 %v10781_v6, %v10142_v58  ;;  %v9614_v7 = vpop.f32.mrb[57].mxu1 }
0x132c   :  { %v9615_v31 = vadd.f32 %v10142_v58, %v9614_v7 }
0x132d   :  { %v9626_v56 = vmax.f32 %v9620_v19, 0.0 }
0x132e   :  { %v9625_v16 = vmax.f32 %v9615_v31, 0.0 }
0x1330   :  { %10801 = vmatprep.mubr.msk.f32.mxu0 %vm5116_vm5, %v9625_v16 }
0x1331   :  { %10802 = vmatmul.mubr.msk.f32.gmra.mrb[52].mxu0 %vm5116_vm5, %v9626_v56 }
0x13cb   :  { %v10800_v41 = vpop.f32.mrb[50].mxu0 }
0x13cc   :  { %v9725_v45 = vadd.f32 %v10800_v41, %v10155_v38  ;;  %v9719_v54 = vpop.f32.mrb[51].mxu0 }
0x13cd   :  { %v9720_v13 = vadd.f32 %v10155_v38, %v9719_v54 }
0x13ce   :  { %v9739_v63 = vadd.f32 %v9725_v45, %v9513_v23 }
0x13cf   :  { %v9738_v26 = vadd.f32 %v9720_v13, %v9512_v14 }
0x13d0   :  { %v9747_v34 = vsel %vm772_vm2, %v9739_v63, 0.0 }
0x13d1   :  { %9748 = vadd.xlane.f32.xlu0 %v9747_v34  ;;  %v9744_v35 = vsel %vm772_vm2, %v9738_v26, 0.0 }
0x13d2   :  { %9745 = vadd.xlane.f32.xlu1 %v9744_v35 }
0x1404   :  { %v10803_v51 = vpop.f32.mrb[52].mxu0 }
0x1405   :  { %v9735_v52 = vadd.f32 %v10803_v51, %v10155_v38  ;;  %v9729_v0 = vpop.f32.mrb[53].mxu0 }
0x1406   :  { %v9730_v5 = vadd.f32 %v10155_v38, %v9729_v0 }
0x1407   :  { %v9741_v43 = vadd.f32 %v9735_v52, %v9515_v44  ;;  %v10161_v44 = vld [vmem:[%s13653_s7 + $0xf] ss:$0 sm:$0xff] }
0x1408   :  { %v9740_v62 = vadd.f32 %v9730_v5, %v9514_v27  ;;  %v10160_v27 = vld [vmem:[%s13653_s7 + $0xe] ss:$0 sm:$0xff] }
0x1409   :  { %v9753_v18 = vsel %vm772_vm2, %v9741_v43, 0.0 }
0x140a   :  { %9754 = vadd.xlane.f32.xlu0 %v9753_v18  ;;  %v9750_v12 = vsel %vm772_vm2, %v9740_v62, 0.0 }
0x140b   :  { %9751 = vadd.xlane.f32.xlu1 %v9750_v12 }
0x145e   :  { %v9749_v2 = vpop.xlane.xlu0 %9748 }
0x145f   :  { %v9757_v3 = vmul.f32 0.03125, %v9749_v2  ;;  %v9746_v59 = vpop.xlane.xlu1 %9745 }
0x1460   :  { %v9756_v8 = vmul.f32 0.03125, %v9746_v59 }
0x1461   :  { %v9761_v60 = vsub.f32 %v9739_v63, %v9757_v3 }
0x1462   :  { %v9760_v57 = vsub.f32 %v9738_v26, %v9756_v8 }
0x1463   :  { %v9765_v33 = vmul.f32 %v9761_v60, %v9761_v60 }
0x1464   :  { %v9764_v1 = vmul.f32 %v9760_v57, %v9760_v57 }
0x1465   :  { %v9771_v30 = vsel %vm772_vm2, %v9765_v33, 0.0 }
0x1466   :  { %9772 = vadd.xlane.f32.xlu0 %v9771_v30  ;;  %v9768_v17 = vsel %vm772_vm2, %v9764_v1, 0.0 }
0x1467   :  { %9769 = vadd.xlane.f32.xlu1 %v9768_v17 }
0x1497   :  { %v9755_v47 = vpop.xlane.xlu0 %9754 }
0x1498   :  { %v9759_v50 = vmul.f32 0.03125, %v9755_v47  ;;  %v9752_v42 = vpop.xlane.xlu1 %9751 }
0x1499   :  { %v9758_v46 = vmul.f32 0.03125, %v9752_v42 }
0x149a   :  { %v9763_v29 = vsub.f32 %v9741_v43, %v9759_v50 }
0x149b   :  { %v9762_v14 = vsub.f32 %v9740_v62, %v9758_v46 }
0x149c   :  { %v9767_v23 = vmul.f32 %v9763_v29, %v9763_v29 }
0x149d   :  { %v9766_v55 = vmul.f32 %v9762_v14, %v9762_v14 }
0x149e   :  { %v9777_v28 = vsel %vm772_vm2, %v9767_v23, 0.0 }
0x149f   :  { %9778 = vadd.xlane.f32.xlu0 %v9777_v28  ;;  %v9774_v15 = vsel %vm772_vm2, %v9766_v55, 0.0  ;;  %v10162_v55 = vld [vmem:[%s13653_s7 + $0x10] ss:$0 sm:$0xff] }
0x14a0   :  { %9775 = vadd.xlane.f32.xlu1 %v9774_v15 }
0x14f3   :  { %v9773_v11 = vpop.xlane.xlu0 %9772 }
0x14f4   :  { %v9781_v9 = vmul.f32 0.03125, %v9773_v11  ;;  %v9770_v37 = vpop.xlane.xlu1 %9769  ;;  %v10163_v11 = vld [vmem:[%s13653_s7 + $0x11] ss:$0 sm:$0xff]  ;;  %s11310_s7 = smov [#allocation2]  }
0x14f5   :  { %v9780_v36 = vmul.f32 0.03125, %v9770_v37  ;;  %s9891_s11 = sshll.u32 %s11310_s7, 4  ;;  %s9892_s11 = int_to_ptr.vmem [resolvable:$true] %s9891_s11 }
0x14f6   :  { %v9785_v25 = vadd.f32 1e-05, %v9781_v9  ;;  %s11276_s15 = scalar_lea.vmem %s9892_s11, 512  ;;  %p11281_p1 = scmp.lt.s32.totalorder %s9892_s11, %s9892_s11 }
0x14f7   :  { %v9784_v22 = vadd.f32 1e-05, %v9780_v36  ;;  %p11277_p0 = scmp.ne.s32.totalorder %s9892_s11, %s11276_s15  ;;  %p11282_p2 = scmp.lt.s32.totalorder %s11276_s15, %s11276_s15 }
0x14f8   :  { %11256 = vrsqrt.f32 %v9785_v25 }
0x14f9   :  { %11258 = vrsqrt.f32 %v9784_v22  ;;  %p11283_p3 = por %p11282_p2, %p11281_p1 }
0x14fb   :  { %p11284_p4 = pnand %p11283_p3, %p11277_p0 }
0x1502   :  { %v11257_v20 = vpop.eup %11256 }
0x1503   :  { %v11259_v53 = vpop.eup %11258  ;;  %v9793_v32 = vmul.f32 %v11257_v20, %v9761_v60 }
0x1504   :  { %v9792_v48 = vmul.f32 %v11259_v53, %v9760_v57 }
0x1505   :  { %v9801_v40 = vmul.f32 %v10160_v27, %v9793_v32 }
0x1506   :  { %v9800_v21 = vmul.f32 %v10160_v27, %v9792_v48 }
0x1507   :  { %v9809_v58 = vadd.f32 %v10161_v44, %v9801_v40 }
0x1508   :  { %v9808_v4 = vadd.f32 %v10161_v44, %v9800_v21 }
0x1509   :  { %v9817_v24 = vsel %vm772_vm2, %v9809_v58, 0.0 }
0x150a   :  { %9818 = vadd.xlane.f32.xlu0 %v9817_v24  ;;  %v9814_v10 = vsel %vm772_vm2, %v9808_v4, 0.0 }
0x150b   :  { %9815 = vadd.xlane.f32.xlu1 %v9814_v10 }
0x152c   :  { %v9779_v39 = vpop.xlane.xlu0 %9778 }
0x152d   :  { %v9783_v61 = vmul.f32 0.03125, %v9779_v39  ;;  %v9776_v49 = vpop.xlane.xlu1 %9775 }
0x152e   :  { %v9782_v6 = vmul.f32 0.03125, %v9776_v49 }
0x152f   :  { %v9787_v19 = vadd.f32 1e-05, %v9783_v61 }
0x1530   :  { %v9786_v7 = vadd.f32 1e-05, %v9782_v6 }
0x1531   :  { %11260 = vrsqrt.f32 %v9787_v19 }
0x1532   :  { %11262 = vrsqrt.f32 %v9786_v7 }
0x153b   :  { %v11261_v31 = vpop.eup %11260 }
0x153c   :  { %v11263_v16 = vpop.eup %11262  ;;  %v9795_v56 = vmul.f32 %v11261_v31, %v9763_v29 }
0x153d   :  { %v9794_v38 = vmul.f32 %v11263_v16, %v9762_v14 }
0x153e   :  { %v9803_v41 = vmul.f32 %v10160_v27, %v9795_v56 }
0x153f   :  { %v9802_v45 = vmul.f32 %v10160_v27, %v9794_v38 }
0x1540   :  { %v9811_v54 = vadd.f32 %v10161_v44, %v9803_v41 }
0x1541   :  { %v9810_v13 = vadd.f32 %v10161_v44, %v9802_v45 }
0x1542   :  { %v9823_v63 = vsel %vm772_vm2, %v9811_v54, 0.0 }
0x1543   :  { %9824 = vadd.xlane.f32.xlu0 %v9823_v63  ;;  %v9820_v26 = vsel %vm772_vm2, %v9810_v13, 0.0 }
0x1544   :  { %9821 = vadd.xlane.f32.xlu1 %v9820_v26 }
0x1597   :  { %v9819_v34 = vpop.xlane.xlu0 %9818 }
0x1598   :  { %v9827_v35 = vmul.f32 0.03125, %v9819_v34  ;;  %v9816_v51 = vpop.xlane.xlu1 %9815 }
0x1599   :  { %v9826_v52 = vmul.f32 0.03125, %v9816_v51 }
0x159a   :  { %v9831_v0 = vsub.f32 %v9809_v58, %v9827_v35 }
0x159b   :  { %v9830_v5 = vsub.f32 %v9808_v4, %v9826_v52 }
0x159c   :  { %v9835_v43 = vmul.f32 %v9831_v0, %v9831_v0 }
0x159d   :  { %v9834_v62 = vmul.f32 %v9830_v5, %v9830_v5 }
0x159e   :  { %v9841_v18 = vsel %vm772_vm2, %v9835_v43, 0.0 }
0x159f   :  { %9842 = vadd.xlane.f32.xlu0 %v9841_v18  ;;  %v9838_v12 = vsel %vm772_vm2, %v9834_v62, 0.0 }
0x15a0   :  { %9839 = vadd.xlane.f32.xlu1 %v9838_v12 }
0x15d0   :  { %v9825_v2 = vpop.xlane.xlu0 %9824 }
0x15d1   :  { %v9829_v3 = vmul.f32 0.03125, %v9825_v2  ;;  %v9822_v59 = vpop.xlane.xlu1 %9821 }
0x15d2   :  { %v9828_v8 = vmul.f32 0.03125, %v9822_v59 }
0x15d3   :  { %v9833_v60 = vsub.f32 %v9811_v54, %v9829_v3 }
0x15d4   :  { %v9832_v57 = vsub.f32 %v9810_v13, %v9828_v8 }
0x15d5   :  { %v9837_v33 = vmul.f32 %v9833_v60, %v9833_v60 }
0x15d6   :  { %v9836_v1 = vmul.f32 %v9832_v57, %v9832_v57 }
0x15d7   :  { %v9847_v30 = vsel %vm772_vm2, %v9837_v33, 0.0 }
0x15d8   :  { %9848 = vadd.xlane.f32.xlu0 %v9847_v30  ;;  %v9844_v17 = vsel %vm772_vm2, %v9836_v1, 0.0 }
0x15d9   :  { %9845 = vadd.xlane.f32.xlu1 %v9844_v17 }
0x162c   :  { %v9843_v47 = vpop.xlane.xlu0 %9842 }
0x162d   :  { %v9851_v50 = vmul.f32 0.03125, %v9843_v47  ;;  %v9840_v42 = vpop.xlane.xlu1 %9839 }
0x162e   :  { %v9850_v46 = vmul.f32 0.03125, %v9840_v42 }
0x162f   :  { %v9855_v29 = vadd.f32 1e-05, %v9851_v50 }
0x1630   :  { %v9854_v14 = vadd.f32 1e-05, %v9850_v46 }
0x1631   :  { %11264 = vrsqrt.f32 %v9855_v29 }
0x1632   :  { %11266 = vrsqrt.f32 %v9854_v14 }
0x163b   :  { %v11265_v23 = vpop.eup %11264 }
0x163c   :  { %v11267_v28 = vpop.eup %11266  ;;  %v9863_v15 = vmul.f32 %v11265_v23, %v9831_v0 }
0x163d   :  { %v9862_v9 = vmul.f32 %v11267_v28, %v9830_v5 }
0x163e   :  { %v9871_v37 = vmul.f32 %v10162_v55, %v9863_v15 }
0x163f   :  { %v9870_v36 = vmul.f32 %v10162_v55, %v9862_v9 }
0x1640   :  { %v9879_v25 = vadd.f32 %v10163_v11, %v9871_v37 }
0x1641   :  { %v9878_v22 = vadd.f32 %v10163_v11, %v9870_v36 }
0x1642   :  { %9883 = vst.msk [vmem:[#allocation2 + $0x8] sm:$0xff] %vm772_vm2, %v9879_v25 }
0x1643   :  { %9882 = vst.msk [vmem:[#allocation2] sm:$0xff] %vm772_vm2, %v9878_v22 }
0x1665   :  { %v9849_v20 = vpop.xlane.xlu0 %9848 }
0x1666   :  { %v9853_v27 = vmul.f32 0.03125, %v9849_v20  ;;  %v9846_v53 = vpop.xlane.xlu1 %9845 }
0x1667   :  { %v9852_v32 = vmul.f32 0.03125, %v9846_v53 }
0x1668   :  { %v9857_v44 = vadd.f32 1e-05, %v9853_v27 }
0x1669   :  { %v9856_v48 = vadd.f32 1e-05, %v9852_v32 }
0x166a   :  { %11268 = vrsqrt.f32 %v9857_v44 }
0x166b   :  { %11270 = vrsqrt.f32 %v9856_v48 }
0x1674   :  { %v11269_v40 = vpop.eup %11268 }
0x1675   :  { %v11271_v21 = vpop.eup %11270  ;;  %v9865_v58 = vmul.f32 %v11269_v40, %v9833_v60 }
0x1676   :  { %v9864_v4 = vmul.f32 %v11271_v21, %v9832_v57 }
0x1677   :  { %v9873_v24 = vmul.f32 %v10162_v55, %v9865_v58 }
0x1678   :  { %v9872_v10 = vmul.f32 %v10162_v55, %v9864_v4 }
0x1679   :  { %v9881_v39 = vadd.f32 %v10163_v11, %v9873_v24 }
0x167a   :  { %v9880_v61 = vadd.f32 %v10163_v11, %v9872_v10 }
0x167b   :  { %9885 = vst.msk [vmem:[#allocation2 + $0x18] sm:$0xff] %vm772_vm2, %v9881_v39 }
0x167c   :  { %9884 = vst.msk [vmem:[#allocation2 + $0x10] sm:$0xff] %vm772_vm2, %v9880_v61 }
0x167d   :  { %11287 = shalt.err (!%p11284_p4)
}
0x167e   :  { %s11288_s18 = scalar_lea.hbm %s13654_s8, 512 }
0x167f   :  { %p11289_p5 = scmp.ne.s32.totalorder %s13654_s8, %s11288_s18  ;;  %p11292_p6 = scmp.lt.u32.totalorder %s11288_s18, %s13654_s8 }
0x1681   :  { %p11294_p7 = pnand %p11292_p6, %p11289_p5 }
0x1683   :  { %11297 = shalt.err (!%p11294_p7)
}
0x1684   :  { %s11311_s1 = smov 128  }
0x1685   :  { %9897 = dma.vmem_to_hbm [thread:$0]  %s9892_s11, 512, %s13654_s8, [#allocation3], %s11311_s1, %s11311_s1, %s11307_s12  }
0x1686   :  { %11298 = dma.done.wait [#allocation3], 512  }
0x1687   :  { %11299 = vsyncadd [#allocation3], 4294966784 }
0x1688   :  { %9901 = vsyncpa [#allocation3], 1 }

</bundles_post_ra>
